<compile_context>
chip_gen: v5e
topology: v5e:2x2
jax: 0.10.0
libtpu: 0.0.40
codegen_flags: <defaults>
</compile_context>

<pallas_src>
import math

import jax
import jax.numpy as jnp
from jax.experimental import pallas as pl
from jax.experimental.pallas import tpu as pltpu

# ----------------------------- scaled-down config -----------------------------
EMBED_DIM = 128            # original: 768
ATTR_DIM = 40
IMAGE_SIZE = 32            # original: 64
N_HEADS = 4                # original: 16
N_LAYERS = 2               # original: 8
PATCH_SIZE = 8
N_PATCHES = (IMAGE_SIZE // PATCH_SIZE) ** 2
PATCH_DIM = PATCH_SIZE * PATCH_SIZE * 3          # 192
OUT_PAD = 256                                    # lane-dense padded output width
HEAD_DIM = EMBED_DIM // N_HEADS
FFN_DIM = EMBED_DIM * 4
CLASS_DROP_PROB = 0.1
LN_EPS = 1e-5              # PyTorch LayerNorm default


# --------------------------------- helpers ------------------------------------
def _layernorm(x, g, b):
    """LayerNorm over last dim, f32 math (matches torch defaults)."""
    mu = jnp.mean(x, axis=-1, keepdims=True)
    xc = x - mu
    var = jnp.mean(xc * xc, axis=-1, keepdims=True)
    return xc * jax.lax.rsqrt(var + LN_EPS) * g + b


def _gelu_exact(x):
    """Exact (erf) GELU, matching F.gelu default."""
    return 0.5 * x * (1.0 + jax.lax.erf(x * (1.0 / math.sqrt(2.0))))


# ------------------------ single fused forward kernel --------------------------
def _fused_kernel(
    # embedding inputs (per-batch rows or shared weights)
    patches_ref, patch_w_ref, patch_b_ref,
    y_ref, attr_w_ref, attr_b_ref, keep_ref,
    t_ref, fw_ref, t1w_ref, t1b_ref, t2w_ref, t2b_ref, pos_ref,
    # per-layer stacked transformer weights (leading layer dim squeezed away)
    qkv_w_ref, qkv_b_ref, proj_w_ref, proj_b_ref,
    ln1_g_ref, ln1_b_ref, ffn1_w_ref, ffn1_b_ref,
    ffn2_w_ref, ffn2_b_ref, ln2_g_ref, ln2_b_ref,
    # final out-projection (lane-dense padded)
    out_w_ref, out_b_ref,
    # output + resident token state
    out_ref, h_ref,
):
    layer = pl.program_id(1)
    n_layers = pl.num_programs(1)

    # ---------------- fused embedding on the first layer of each batch --------
    @pl.when(layer == 0)
    def _():
        # patch embedding: (N, PATCH_DIM) @ (PATCH_DIM, D), bf16 MXU / f32 acc
        pe = jnp.dot(patches_ref[...].astype(jnp.bfloat16), patch_w_ref[...],
                     preferred_element_type=jnp.float32) + patch_b_ref[...]

        # attribute embedding + classifier-free drop: PyTorch zeroes the whole
        # attr_emb row (Wy + b) after the linear, so multiply by keep afterwards.
        attr = jnp.dot(y_ref[...].astype(jnp.bfloat16), attr_w_ref[...],
                       preferred_element_type=jnp.float32) + attr_b_ref[...]  # (1, D)
        attr = attr * keep_ref[...]                                           # (1, 1)

        # time MLP: GaussianFourierProjection -> Linear -> SiLU -> Linear (f32)
        proj = t_ref[...] * fw_ref[...] * (2.0 * math.pi)                     # (1, D)
        sin_p = jnp.sin(proj)
        cos_p = jnp.cos(proj)
        tm = (jnp.dot(sin_p, t1w_ref[:EMBED_DIM, :],
                      preferred_element_type=jnp.float32)
              + jnp.dot(cos_p, t1w_ref[EMBED_DIM:, :],
                        preferred_element_type=jnp.float32)
              + t1b_ref[...])                                                 # (1, D)
        tm = tm * jax.nn.sigmoid(tm)                                          # SiLU
        tm = jnp.dot(tm, t2w_ref[...],
                     preferred_element_type=jnp.float32) + t2b_ref[...]       # (1, D)

        h_ref[...] = pe + pos_ref[...] + attr + tm                            # (N, D)

    # -------------------------- transformer encoder layer ---------------------
    x = h_ref[...]                                              # (N, D) f32
    x_bf = x.astype(jnp.bfloat16)

    qkv = jnp.dot(x_bf, qkv_w_ref[...],
                  preferred_element_type=jnp.float32) + qkv_b_ref[...]        # (N, 3D)

    # split only at 128-lane-aligned boundaries first, then per-head slices
    q_all = qkv[:, 0:EMBED_DIM]
    k_all = qkv[:, EMBED_DIM:2 * EMBED_DIM]
    v_all = qkv[:, 2 * EMBED_DIM:3 * EMBED_DIM]

    scale = 1.0 / math.sqrt(HEAD_DIM)
    heads = []
    for hh in range(N_HEADS):                                   # static unroll (heads)
        sl = slice(hh * HEAD_DIM, (hh + 1) * HEAD_DIM)
        q = q_all[:, sl]
        k = k_all[:, sl]
        v = v_all[:, sl]
        s = jax.lax.dot_general(q, k, (((1,), (1,)), ((), ())),
                                preferred_element_type=jnp.float32) * scale
        s = s - jnp.max(s, axis=-1, keepdims=True)
        e = jnp.exp(s)
        p = e * pl.reciprocal(jnp.sum(e, axis=-1, keepdims=True), approx=True)
        heads.append(jnp.dot(p, v, preferred_element_type=jnp.float32))
    attn = jnp.concatenate(heads, axis=-1)                      # (N, D) in registers

    a = jnp.dot(attn.astype(jnp.bfloat16), proj_w_ref[...],
                preferred_element_type=jnp.float32) + proj_b_ref[...]

    # post-norm (norm_first=False): LN(x + attn)
    h1 = _layernorm(x + a, ln1_g_ref[...], ln1_b_ref[...])

    # feed-forward
    f = jnp.dot(h1.astype(jnp.bfloat16), ffn1_w_ref[...],
                preferred_element_type=jnp.float32) + ffn1_b_ref[...]
    f = _gelu_exact(f)
    f = jnp.dot(f.astype(jnp.bfloat16), ffn2_w_ref[...],
                preferred_element_type=jnp.float32) + ffn2_b_ref[...]

    h2 = _layernorm(h1 + f, ln2_g_ref[...], ln2_b_ref[...])
    h_ref[...] = h2                                             # persists to next layer

    # fused out-projection on the final layer only (lane-dense 256-wide output)
    @pl.when(layer == n_layers - 1)
    def _():
        out_ref[...] = jnp.dot(h2.astype(jnp.bfloat16), out_w_ref[...],
                               preferred_element_type=jnp.float32) + out_b_ref[...]


def fused_forward(patches, t, y_f, keep, params, batch):
    lp = params["layers"]
    n_layers = lp["qkv_w"].shape[0]
    m_tok = patches.shape[0]                                    # B * N_PATCHES

    # per-batch row inputs carry a leading batch axis (squeezed) so that the
    # last two block dims always equal the full array dims (layout-legal).
    y3 = y_f.reshape(batch, 1, ATTR_DIM)
    keep3 = keep.reshape(batch, 1, 1)
    t3 = t.reshape(batch, 1, 1)

    def full_spec(arr):
        return pl.BlockSpec(arr.shape, lambda b, l, _nd=arr.ndim: (0,) * _nd)

    def per_batch(arr):        # (B, 1, X) -> kernel sees (1, X)
        return pl.BlockSpec((pl.Squeezed(),) + arr.shape[1:],
                            lambda b, l: (b, 0, 0))

    def per_layer(arr):        # (L, A, B) -> kernel sees (A, B)
        return pl.BlockSpec((pl.Squeezed(),) + arr.shape[1:],
                            lambda b, l: (l, 0, 0))

    patch_b = params["patch_b"].reshape(1, EMBED_DIM)
    attr_b = params["attr_b"].reshape(1, EMBED_DIM)
    fw = params["fourier_w"].reshape(1, EMBED_DIM)
    t1_b = params["t1_b"].reshape(1, EMBED_DIM)
    t2_b = params["t2_b"].reshape(1, EMBED_DIM)
    pos = params["pos_emb"].reshape(N_PATCHES, EMBED_DIM)
    out_b = params["out_b"].reshape(1, OUT_PAD)

    inputs = (
        patches, params["patch_w"], patch_b,
        y3, params["attr_w"], attr_b, keep3,
        t3, fw, params["t1_w"], t1_b, params["t2_w"], t2_b, pos,
        lp["qkv_w"], lp["qkv_b"], lp["proj_w"], lp["proj_b"],
        lp["ln1_g"], lp["ln1_b"], lp["ffn1_w"], lp["ffn1_b"],
        lp["ffn2_w"], lp["ffn2_b"], lp["ln2_g"], lp["ln2_b"],
        params["out_w"], out_b,
    )

    in_specs = [
        pl.BlockSpec((N_PATCHES, PATCH_DIM), lambda b, l: (b, 0)),   # patches
        full_spec(params["patch_w"]), full_spec(patch_b),
        per_batch(y3), full_spec(params["attr_w"]), full_spec(attr_b),
        per_batch(keep3),
        per_batch(t3), full_spec(fw),
        full_spec(params["t1_w"]), full_spec(t1_b),
        full_spec(params["t2_w"]), full_spec(t2_b),
        full_spec(pos),
        per_layer(lp["qkv_w"]), per_layer(lp["qkv_b"]),
        per_layer(lp["proj_w"]), per_layer(lp["proj_b"]),
        per_layer(lp["ln1_g"]), per_layer(lp["ln1_b"]),
        per_layer(lp["ffn1_w"]), per_layer(lp["ffn1_b"]),
        per_layer(lp["ffn2_w"]), per_layer(lp["ffn2_b"]),
        per_layer(lp["ln2_g"]), per_layer(lp["ln2_b"]),
        full_spec(params["out_w"]), full_spec(out_b),
    ]
    out_spec = pl.BlockSpec((N_PATCHES, OUT_PAD), lambda b, l: (b, 0))

    return pl.pallas_call(
        _fused_kernel,
        grid=(batch, n_layers),
        in_specs=in_specs,
        out_specs=out_spec,
        out_shape=jax.ShapeDtypeStruct((m_tok, OUT_PAD), jnp.float32),
        scratch_shapes=[pltpu.VMEM((N_PATCHES, EMBED_DIM), jnp.float32)],  # resident h
        compiler_params=pltpu.CompilerParams(
            dimension_semantics=("parallel", "arbitrary"),   # batch || , layers seq.
            vmem_limit_bytes=64 * 1024 * 1024),
    )(*inputs)


# --------------------------------- full forward --------------------------------
def flow_transformer_forward(params, x, t, y, drop_key):
    B = x.shape[0]
    p = IMAGE_SIZE // PATCH_SIZE

    # x.unfold(2,ps,ps).unfold(3,ps,ps).permute(0,2,3,1,4,5).view(B, n_patches, -1)
    patches = x.reshape(B, 3, p, PATCH_SIZE, p, PATCH_SIZE)
    patches = patches.transpose(0, 2, 4, 1, 3, 5).reshape(B * N_PATCHES, PATCH_DIM)

    # class-drop mask (torch.rand(B) < p) reproduced with a JAX PRNG key
    keep = (jax.random.uniform(drop_key, (B,)) >= CLASS_DROP_PROB).astype(jnp.float32)

    out = fused_forward(patches, t, y.astype(jnp.float32), keep, params, B)
    out = out[:, :PATCH_DIM]                                    # drop lane padding

    out = out.reshape(B, p, p, 3, PATCH_SIZE, PATCH_SIZE)
    out = out.transpose(0, 3, 1, 4, 2, 5).reshape(B, 3, IMAGE_SIZE, IMAGE_SIZE)
    return out


# ------------------------------ parameter init ---------------------------------
def init_params(key):
    ks = jax.random.split(key, 11)

    def w(k, shape, scale=0.02, dtype=jnp.float32):
        return (jax.random.normal(k, shape, jnp.float32) * scale).astype(dtype)

    # NOTE: weights are stored as (in, out) and applied as x @ W; porting real
    # PyTorch weights ((out, in) layout) would require transposing them.
    out_w = w(ks[6], (EMBED_DIM, PATCH_DIM), dtype=jnp.float32)
    out_w = jnp.pad(out_w, ((0, 0), (0, OUT_PAD - PATCH_DIM))).astype(jnp.bfloat16)
    out_b = jnp.zeros((OUT_PAD,), jnp.float32)

    params = {
        "patch_w": w(ks[0], (PATCH_DIM, EMBED_DIM), dtype=jnp.bfloat16),
        "patch_b": jnp.zeros((EMBED_DIM,), jnp.float32),
        "attr_w": w(ks[1], (ATTR_DIM, EMBED_DIM), dtype=jnp.bfloat16),
        "attr_b": jnp.zeros((EMBED_DIM,), jnp.float32),
        "fourier_w": jax.random.normal(ks[2], (EMBED_DIM,), jnp.float32) * 10.0,
        "t1_w": w(ks[3], (2 * EMBED_DIM, EMBED_DIM)),
        "t1_b": jnp.zeros((EMBED_DIM,), jnp.float32),
        "t2_w": w(ks[4], (EMBED_DIM, EMBED_DIM)),
        "t2_b": jnp.zeros((EMBED_DIM,), jnp.float32),
        "pos_emb": jax.random.normal(ks[5], (1, N_PATCHES, EMBED_DIM), jnp.float32)
                   * (1.0 / math.sqrt(EMBED_DIM)),
        "out_w": out_w,              # lane-dense padded (D, 256); last 64 cols zero
        "out_b": out_b,
        # per-layer weights stacked along a leading N_LAYERS axis (bf16 MXU inputs,
        # f32 biases / LayerNorm params)
        "layers": {
            "qkv_w": w(ks[7], (N_LAYERS, EMBED_DIM, 3 * EMBED_DIM), dtype=jnp.bfloat16),
            "qkv_b": jnp.zeros((N_LAYERS, 1, 3 * EMBED_DIM), jnp.float32),
            "proj_w": w(ks[8], (N_LAYERS, EMBED_DIM, EMBED_DIM), dtype=jnp.bfloat16),
            "proj_b": jnp.zeros((N_LAYERS, 1, EMBED_DIM), jnp.float32),
            "ln1_g": jnp.ones((N_LAYERS, 1, EMBED_DIM), jnp.float32),
            "ln1_b": jnp.zeros((N_LAYERS, 1, EMBED_DIM), jnp.float32),
            "ffn1_w": w(ks[9], (N_LAYERS, EMBED_DIM, FFN_DIM), dtype=jnp.bfloat16),
            "ffn1_b": jnp.zeros((N_LAYERS, 1, FFN_DIM), jnp.float32),
            "ffn2_w": w(ks[10], (N_LAYERS, FFN_DIM, EMBED_DIM), dtype=jnp.bfloat16),
            "ffn2_b": jnp.zeros((N_LAYERS, 1, EMBED_DIM), jnp.float32),
            "ln2_g": jnp.ones((N_LAYERS, 1, EMBED_DIM), jnp.float32),
            "ln2_b": jnp.zeros((N_LAYERS, 1, EMBED_DIM), jnp.float32),
        },
    }
    return params


# ------------------------------------ main --------------------------------------
if __name__ == "__main__":
    key = jax.random.PRNGKey(0)
    kx, kt, ky, kdrop, kparams = jax.random.split(key, 5)

    B = 2
    x = jax.random.normal(kx, (B, 3, IMAGE_SIZE, IMAGE_SIZE), jnp.float32)   # NCHW
    t = jax.random.uniform(kt, (B,), jnp.float32)                            # timesteps
    y = (jax.random.uniform(ky, (B, ATTR_DIM)) < 0.5).astype(jnp.int32)      # attributes

    params = init_params(kparams)

    # TODO(synk): PyTorch's in-layer dropout (p=0.1) is stochastic; eval-mode
    # semantics (dropout disabled) are implemented here.  The class-drop mask
    # (torch.rand < 0.1) is reproduced deterministically with a JAX PRNG key
    # and, like PyTorch, zeroes the whole attr_emb row (Wy + b).
    fwd = jax.jit(flow_transformer_forward)
    out = fwd(params, x, t, y, kdrop)
    jax.block_until_ready(out)

    assert out.shape == (B, 3, IMAGE_SIZE, IMAGE_SIZE), out.shape
    assert out.dtype == jnp.float32
    print("KERNEL_OK")
</pallas_src>

<mosaic_0001>
module attributes {stable_mosaic.version = 11 : i64} {
  func.func @_fused_kernel(%arg0: i32, %arg1: i32, %arg2: memref<16x192xf32, #tpu.memory_space<vmem>>, %arg3: memref<192x128xbf16, #tpu.memory_space<vmem>>, %arg4: memref<1x128xf32, #tpu.memory_space<vmem>>, %arg5: memref<1x1x40xf32, #tpu.memory_space<vmem>>, %arg6: memref<40x128xbf16, #tpu.memory_space<vmem>>, %arg7: memref<1x128xf32, #tpu.memory_space<vmem>>, %arg8: memref<1x1x1xf32, #tpu.memory_space<vmem>>, %arg9: memref<1x1x1xf32, #tpu.memory_space<vmem>>, %arg10: memref<1x128xf32, #tpu.memory_space<vmem>>, %arg11: memref<256x128xf32, #tpu.memory_space<vmem>>, %arg12: memref<1x128xf32, #tpu.memory_space<vmem>>, %arg13: memref<128x128xf32, #tpu.memory_space<vmem>>, %arg14: memref<1x128xf32, #tpu.memory_space<vmem>>, %arg15: memref<16x128xf32, #tpu.memory_space<vmem>>, %arg16: memref<1x128x384xbf16, #tpu.memory_space<vmem>>, %arg17: memref<1x1x384xf32, #tpu.memory_space<vmem>>, %arg18: memref<1x128x128xbf16, #tpu.memory_space<vmem>>, %arg19: memref<1x1x128xf32, #tpu.memory_space<vmem>>, %arg20: memref<1x1x128xf32, #tpu.memory_space<vmem>>, %arg21: memref<1x1x128xf32, #tpu.memory_space<vmem>>, %arg22: memref<1x128x512xbf16, #tpu.memory_space<vmem>>, %arg23: memref<1x1x512xf32, #tpu.memory_space<vmem>>, %arg24: memref<1x512x128xbf16, #tpu.memory_space<vmem>>, %arg25: memref<1x1x128xf32, #tpu.memory_space<vmem>>, %arg26: memref<1x1x128xf32, #tpu.memory_space<vmem>>, %arg27: memref<1x1x128xf32, #tpu.memory_space<vmem>>, %arg28: memref<128x256xbf16, #tpu.memory_space<vmem>>, %arg29: memref<1x256xf32, #tpu.memory_space<vmem>>, %arg30: memref<16x256xf32, #tpu.memory_space<vmem>>, %arg31: memref<16x128xf32, #tpu.memory_space<vmem>>) attributes {dimension_semantics = [#tpu.dimension_semantics<parallel>, #tpu.dimension_semantics<arbitrary>], iteration_bounds = array<i64: 2, 2>, scalar_prefetch = 0 : i64, scratch_operands = 1 : i64, tpu.core_type = #tpu.core_type<tc>, window_params = [{transform_indices = @transform_0, window_bounds = array<i64: 16, 192>}, {pipeline_mode = #tpu.pipeline_mode<synchronous>, transform_indices = @transform_1, window_bounds = array<i64: 192, 128>}, {pipeline_mode = #tpu.pipeline_mode<synchronous>, transform_indices = @transform_2, window_bounds = array<i64: 1, 128>}, {transform_indices = @transform_3, window_bounds = array<i64: 1, 1, 40>}, {pipeline_mode = #tpu.pipeline_mode<synchronous>, transform_indices = @transform_4, window_bounds = array<i64: 40, 128>}, {pipeline_mode = #tpu.pipeline_mode<synchronous>, transform_indices = @transform_5, window_bounds = array<i64: 1, 128>}, {transform_indices = @transform_6, window_bounds = array<i64: 1, 1, 1>}, {transform_indices = @transform_7, window_bounds = array<i64: 1, 1, 1>}, {pipeline_mode = #tpu.pipeline_mode<synchronous>, transform_indices = @transform_8, window_bounds = array<i64: 1, 128>}, {pipeline_mode = #tpu.pipeline_mode<synchronous>, transform_indices = @transform_9, window_bounds = array<i64: 256, 128>}, {pipeline_mode = #tpu.pipeline_mode<synchronous>, transform_indices = @transform_10, window_bounds = array<i64: 1, 128>}, {pipeline_mode = #tpu.pipeline_mode<synchronous>, transform_indices = @transform_11, window_bounds = array<i64: 128, 128>}, {pipeline_mode = #tpu.pipeline_mode<synchronous>, transform_indices = @transform_12, window_bounds = array<i64: 1, 128>}, {pipeline_mode = #tpu.pipeline_mode<synchronous>, transform_indices = @transform_13, window_bounds = array<i64: 16, 128>}, {transform_indices = @transform_14, window_bounds = array<i64: 1, 128, 384>}, {transform_indices = @transform_15, window_bounds = array<i64: 1, 1, 384>}, {transform_indices = @transform_16, window_bounds = array<i64: 1, 128, 128>}, {transform_indices = @transform_17, window_bounds = array<i64: 1, 1, 128>}, {transform_indices = @transform_18, window_bounds = array<i64: 1, 1, 128>}, {transform_indices = @transform_19, window_bounds = array<i64: 1, 1, 128>}, {transform_indices = @transform_20, window_bounds = array<i64: 1, 128, 512>}, {transform_indices = @transform_21, window_bounds = array<i64: 1, 1, 512>}, {transform_indices = @transform_22, window_bounds = array<i64: 1, 512, 128>}, {transform_indices = @transform_23, window_bounds = array<i64: 1, 1, 128>}, {transform_indices = @transform_24, window_bounds = array<i64: 1, 1, 128>}, {transform_indices = @transform_25, window_bounds = array<i64: 1, 1, 128>}, {pipeline_mode = #tpu.pipeline_mode<synchronous>, transform_indices = @transform_26, window_bounds = array<i64: 128, 256>}, {pipeline_mode = #tpu.pipeline_mode<synchronous>, transform_indices = @transform_27, window_bounds = array<i64: 1, 256>}, {transform_indices = @transform_28, window_bounds = array<i64: 16, 256>}]} {
    %c0_i32 = arith.constant 0 : i32
    %0 = arith.cmpi eq, %arg1, %c0_i32 : i32
    %1 = arith.extui %0 : i1 to i32
    %c0_i32_0 = arith.constant 0 : i32
    %2 = arith.cmpi ne, %1, %c0_i32_0 : i32
    scf.if %2 {
      %c0_77 = arith.constant 0 : index
      %c0_78 = arith.constant 0 : index
      %170 = vector.load %arg2[%c0_77, %c0_78] : memref<16x192xf32, #tpu.memory_space<vmem>>, vector<16x192xf32>
      %171 = arith.truncf %170 : vector<16x192xf32> to vector<16x192xbf16>
      %c0_79 = arith.constant 0 : index
      %c0_80 = arith.constant 0 : index
      %172 = vector.load %arg3[%c0_79, %c0_80] : memref<192x128xbf16, #tpu.memory_space<vmem>>, vector<192x128xbf16>
      %cst_81 = arith.constant dense<0.000000e+00> : vector<16x128xf32>
      %173 = tpu.matmul %171, %172, %cst_81 {dimension_numbers = #tpu.dot_dimension_numbers<[1], [0], [0], [1], [0, 0, 1, 1], [], []>} : vector<16x192xbf16>, vector<192x128xbf16>, vector<16x128xf32> -> vector<16x128xf32>
      %c0_82 = arith.constant 0 : index
      %c0_83 = arith.constant 0 : index
      %174 = vector.load %arg4[%c0_82, %c0_83] : memref<1x128xf32, #tpu.memory_space<vmem>>, vector<1x128xf32>
      %175 = vector.broadcast %174 : vector<1x128xf32> to vector<16x128xf32>
      %176 = arith.addf %173, %175 : vector<16x128xf32>
      %c0_84 = arith.constant 0 : index
      %c0_85 = arith.constant 0 : index
      %c0_86 = arith.constant 0 : index
      %177 = vector.load %arg5[%c0_84, %c0_85, %c0_86] : memref<1x1x40xf32, #tpu.memory_space<vmem>>, vector<1x1x40xf32>
      %178 = vector.shape_cast %177 : vector<1x1x40xf32> to vector<1x40xf32>
      %179 = arith.truncf %178 : vector<1x40xf32> to vector<1x40xbf16>
      %c0_87 = arith.constant 0 : index
      %c0_88 = arith.constant 0 : index
      %180 = vector.load %arg6[%c0_87, %c0_88] : memref<40x128xbf16, #tpu.memory_space<vmem>>, vector<40x128xbf16>
      %cst_89 = arith.constant dense<0.000000e+00> : vector<1x128xf32>
      %181 = tpu.matmul %179, %180, %cst_89 {dimension_numbers = #tpu.dot_dimension_numbers<[1], [0], [0], [1], [0, 0, 1, 1], [], []>} : vector<1x40xbf16>, vector<40x128xbf16>, vector<1x128xf32> -> vector<1x128xf32>
      %c0_90 = arith.constant 0 : index
      %c0_91 = arith.constant 0 : index
      %182 = vector.load %arg7[%c0_90, %c0_91] : memref<1x128xf32, #tpu.memory_space<vmem>>, vector<1x128xf32>
      %183 = arith.addf %181, %182 : vector<1x128xf32>
      %c0_92 = arith.constant 0 : index
      %c0_93 = arith.constant 0 : index
      %c0_94 = arith.constant 0 : index
      %184 = vector.load %arg8[%c0_92, %c0_93, %c0_94] : memref<1x1x1xf32, #tpu.memory_space<vmem>>, vector<1x1x1xf32>
      %185 = vector.shape_cast %184 : vector<1x1x1xf32> to vector<1x1xf32>
      %186 = vector.broadcast %185 : vector<1x1xf32> to vector<1x128xf32>
      %187 = arith.mulf %183, %186 : vector<1x128xf32>
      %c0_95 = arith.constant 0 : index
      %c0_96 = arith.constant 0 : index
      %c0_97 = arith.constant 0 : index
      %188 = vector.load %arg9[%c0_95, %c0_96, %c0_97] : memref<1x1x1xf32, #tpu.memory_space<vmem>>, vector<1x1x1xf32>
      %189 = vector.shape_cast %188 : vector<1x1x1xf32> to vector<1x1xf32>
      %c0_98 = arith.constant 0 : index
      %c0_99 = arith.constant 0 : index
      %190 = vector.load %arg10[%c0_98, %c0_99] : memref<1x128xf32, #tpu.memory_space<vmem>>, vector<1x128xf32>
      %191 = vector.broadcast %189 : vector<1x1xf32> to vector<1x128xf32>
      %192 = arith.mulf %191, %190 : vector<1x128xf32>
      %cst_100 = arith.constant 6.28318548 : f32
      %193 = vector.broadcast %cst_100 : f32 to vector<1x128xf32>
      %194 = arith.mulf %192, %193 : vector<1x128xf32>
      %195 = math.sin %194 : vector<1x128xf32>
      %196 = math.cos %194 : vector<1x128xf32>
      %c0_101 = arith.constant 0 : index
      %c0_102 = arith.constant 0 : index
      %197 = vector.load %arg11[%c0_101, %c0_102] : memref<256x128xf32, #tpu.memory_space<vmem>>, vector<128x128xf32>
      %cst_103 = arith.constant dense<0.000000e+00> : vector<1x128xf32>
      %198 = tpu.matmul %195, %197, %cst_103 {dimension_numbers = #tpu.dot_dimension_numbers<[1], [0], [0], [1], [0, 0, 1, 1], [], []>} : vector<1x128xf32>, vector<128x128xf32>, vector<1x128xf32> -> vector<1x128xf32>
      %c128 = arith.constant 128 : index
      %c0_104 = arith.constant 0 : index
      %199 = vector.load %arg11[%c128, %c0_104] : memref<256x128xf32, #tpu.memory_space<vmem>>, vector<128x128xf32>
      %cst_105 = arith.constant dense<0.000000e+00> : vector<1x128xf32>
      %200 = tpu.matmul %196, %199, %cst_105 {dimension_numbers = #tpu.dot_dimension_numbers<[1], [0], [0], [1], [0, 0, 1, 1], [], []>} : vector<1x128xf32>, vector<128x128xf32>, vector<1x128xf32> -> vector<1x128xf32>
      %201 = arith.addf %198, %200 : vector<1x128xf32>
      %c0_106 = arith.constant 0 : index
      %c0_107 = arith.constant 0 : index
      %202 = vector.load %arg12[%c0_106, %c0_107] : memref<1x128xf32, #tpu.memory_space<vmem>>, vector<1x128xf32>
      %203 = arith.addf %201, %202 : vector<1x128xf32>
      %204 = arith.negf %203 : vector<1x128xf32>
      %205 = math.exp %204 : vector<1x128xf32>
      %cst_108 = arith.constant 1.000000e+00 : f32
      %206 = vector.broadcast %cst_108 : f32 to vector<1x128xf32>
      %207 = arith.addf %206, %205 : vector<1x128xf32>
      %208 = arith.divf %206, %207 : vector<1x128xf32>
      %209 = arith.mulf %203, %208 : vector<1x128xf32>
      %c0_109 = arith.constant 0 : index
      %c0_110 = arith.constant 0 : index
      %210 = vector.load %arg13[%c0_109, %c0_110] : memref<128x128xf32, #tpu.memory_space<vmem>>, vector<128x128xf32>
      %cst_111 = arith.constant dense<0.000000e+00> : vector<1x128xf32>
      %211 = tpu.matmul %209, %210, %cst_111 {dimension_numbers = #tpu.dot_dimension_numbers<[1], [0], [0], [1], [0, 0, 1, 1], [], []>} : vector<1x128xf32>, vector<128x128xf32>, vector<1x128xf32> -> vector<1x128xf32>
      %c0_112 = arith.constant 0 : index
      %c0_113 = arith.constant 0 : index
      %212 = vector.load %arg14[%c0_112, %c0_113] : memref<1x128xf32, #tpu.memory_space<vmem>>, vector<1x128xf32>
      %213 = arith.addf %211, %212 : vector<1x128xf32>
      %c0_114 = arith.constant 0 : index
      %c0_115 = arith.constant 0 : index
      %214 = vector.load %arg15[%c0_114, %c0_115] : memref<16x128xf32, #tpu.memory_space<vmem>>, vector<16x128xf32>
      %215 = arith.addf %176, %214 : vector<16x128xf32>
      %216 = vector.broadcast %187 : vector<1x128xf32> to vector<16x128xf32>
      %217 = arith.addf %215, %216 : vector<16x128xf32>
      %218 = vector.broadcast %213 : vector<1x128xf32> to vector<16x128xf32>
      %219 = arith.addf %217, %218 : vector<16x128xf32>
      %c0_116 = arith.constant 0 : index
      %c0_117 = arith.constant 0 : index
      %220 = vector.load %arg31[%c0_116, %c0_117] : memref<16x128xf32, #tpu.memory_space<vmem>>, vector<16x128xf32>
      tpu.vector_store %arg31[%c0_116, %c0_117], %219 {strides = array<i32>} : memref<16x128xf32, #tpu.memory_space<vmem>>, vector<16x128xf32>,
    } else {
    }
    %c0 = arith.constant 0 : index
    %c0_1 = arith.constant 0 : index
    %3 = vector.load %arg31[%c0, %c0_1] : memref<16x128xf32, #tpu.memory_space<vmem>>, vector<16x128xf32>
    %4 = arith.truncf %3 : vector<16x128xf32> to vector<16x128xbf16>
    %c0_2 = arith.constant 0 : index
    %c0_3 = arith.constant 0 : index
    %c0_4 = arith.constant 0 : index
    %5 = vector.load %arg16[%c0_2, %c0_3, %c0_4] : memref<1x128x384xbf16, #tpu.memory_space<vmem>>, vector<1x128x384xbf16>
    %6 = vector.shape_cast %5 : vector<1x128x384xbf16> to vector<128x384xbf16>
    %cst = arith.constant dense<0.000000e+00> : vector<16x384xf32>
    %7 = tpu.matmul %4, %6, %cst {dimension_numbers = #tpu.dot_dimension_numbers<[1], [0], [0], [1], [0, 0, 1, 1], [], []>} : vector<16x128xbf16>, vector<128x384xbf16>, vector<16x384xf32> -> vector<16x384xf32>
    %c0_5 = arith.constant 0 : index
    %c0_6 = arith.constant 0 : index
    %c0_7 = arith.constant 0 : index
    %8 = vector.load %arg17[%c0_5, %c0_6, %c0_7] : memref<1x1x384xf32, #tpu.memory_space<vmem>>, vector<1x1x384xf32>
    %9 = vector.shape_cast %8 : vector<1x1x384xf32> to vector<1x384xf32>
    %10 = vector.broadcast %9 : vector<1x384xf32> to vector<16x384xf32>
    %11 = arith.addf %7, %10 : vector<16x384xf32>
    %12 = vector.extract_strided_slice %11 {offsets = [0, 0], sizes = [16, 128], strides = [1, 1]} : vector<16x384xf32> to vector<16x128xf32>
    %13 = vector.extract_strided_slice %11 {offsets = [0, 128], sizes = [16, 128], strides = [1, 1]} : vector<16x384xf32> to vector<16x128xf32>
    %14 = vector.extract_strided_slice %11 {offsets = [0, 256], sizes = [16, 128], strides = [1, 1]} : vector<16x384xf32> to vector<16x128xf32>
    %15 = vector.extract_strided_slice %12 {offsets = [0, 0], sizes = [16, 32], strides = [1, 1]} : vector<16x128xf32> to vector<16x32xf32>
    %16 = vector.extract_strided_slice %13 {offsets = [0, 0], sizes = [16, 32], strides = [1, 1]} : vector<16x128xf32> to vector<16x32xf32>
    %17 = vector.extract_strided_slice %14 {offsets = [0, 0], sizes = [16, 32], strides = [1, 1]} : vector<16x128xf32> to vector<16x32xf32>
    %cst_8 = arith.constant dense<0.000000e+00> : vector<16x16xf32>
    %18 = tpu.matmul %15, %16, %cst_8 {dimension_numbers = #tpu.dot_dimension_numbers<[1], [1], [0], [0], [0, 0, 1, 0], [], []>} : vector<16x32xf32>, vector<16x32xf32>, vector<16x16xf32> -> vector<16x16xf32>
    %cst_9 = arith.constant 0.176776692 : f32
    %19 = vector.broadcast %cst_9 : f32 to vector<16x16xf32>
    %20 = arith.mulf %18, %19 : vector<16x16xf32>
    %cst_10 = arith.constant dense<0xFF800000> : vector<16xf32>
    %21 = vector.multi_reduction <maximumf>, %20, %cst_10 [1] : vector<16x16xf32> to vector<16xf32>
    %22 = vector.shape_cast %21 : vector<16xf32> to vector<16x1xf32>
    %23 = vector.broadcast %22 : vector<16x1xf32> to vector<16x16xf32>
    %24 = arith.subf %20, %23 : vector<16x16xf32>
    %25 = math.exp %24 : vector<16x16xf32>
    %cst_11 = arith.constant dense<0.000000e+00> : vector<16xf32>
    %26 = vector.multi_reduction <add>, %25, %cst_11 [1] : vector<16x16xf32> to vector<16xf32>
    %27 = vector.shape_cast %26 : vector<16xf32> to vector<16x1xf32>
    %28 = tpu.reciprocal %27 {approx = true} : vector<16x1xf32> -> vector<16x1xf32>
    %29 = vector.broadcast %28 : vector<16x1xf32> to vector<16x16xf32>
    %30 = arith.mulf %25, %29 : vector<16x16xf32>
    %cst_12 = arith.constant dense<0.000000e+00> : vector<16x32xf32>
    %31 = tpu.matmul %30, %17, %cst_12 {dimension_numbers = #tpu.dot_dimension_numbers<[1], [0], [0], [1], [0, 0, 1, 1], [], []>} : vector<16x16xf32>, vector<16x32xf32>, vector<16x32xf32> -> vector<16x32xf32>
    %32 = vector.extract_strided_slice %12 {offsets = [0, 32], sizes = [16, 32], strides = [1, 1]} : vector<16x128xf32> to vector<16x32xf32>
    %33 = vector.extract_strided_slice %13 {offsets = [0, 32], sizes = [16, 32], strides = [1, 1]} : vector<16x128xf32> to vector<16x32xf32>
    %34 = vector.extract_strided_slice %14 {offsets = [0, 32], sizes = [16, 32], strides = [1, 1]} : vector<16x128xf32> to vector<16x32xf32>
    %cst_13 = arith.constant dense<0.000000e+00> : vector<16x16xf32>
    %35 = tpu.matmul %32, %33, %cst_13 {dimension_numbers = #tpu.dot_dimension_numbers<[1], [1], [0], [0], [0, 0, 1, 0], [], []>} : vector<16x32xf32>, vector<16x32xf32>, vector<16x16xf32> -> vector<16x16xf32>
    %cst_14 = arith.constant 0.176776692 : f32
    %36 = vector.broadcast %cst_14 : f32 to vector<16x16xf32>
    %37 = arith.mulf %35, %36 : vector<16x16xf32>
    %cst_15 = arith.constant dense<0xFF800000> : vector<16xf32>
    %38 = vector.multi_reduction <maximumf>, %37, %cst_15 [1] : vector<16x16xf32> to vector<16xf32>
    %39 = vector.shape_cast %38 : vector<16xf32> to vector<16x1xf32>
    %40 = vector.broadcast %39 : vector<16x1xf32> to vector<16x16xf32>
    %41 = arith.subf %37, %40 : vector<16x16xf32>
    %42 = math.exp %41 : vector<16x16xf32>
    %cst_16 = arith.constant dense<0.000000e+00> : vector<16xf32>
    %43 = vector.multi_reduction <add>, %42, %cst_16 [1] : vector<16x16xf32> to vector<16xf32>
    %44 = vector.shape_cast %43 : vector<16xf32> to vector<16x1xf32>
    %45 = tpu.reciprocal %44 {approx = true} : vector<16x1xf32> -> vector<16x1xf32>
    %46 = vector.broadcast %45 : vector<16x1xf32> to vector<16x16xf32>
    %47 = arith.mulf %42, %46 : vector<16x16xf32>
    %cst_17 = arith.constant dense<0.000000e+00> : vector<16x32xf32>
    %48 = tpu.matmul %47, %34, %cst_17 {dimension_numbers = #tpu.dot_dimension_numbers<[1], [0], [0], [1], [0, 0, 1, 1], [], []>} : vector<16x16xf32>, vector<16x32xf32>, vector<16x32xf32> -> vector<16x32xf32>
    %49 = vector.extract_strided_slice %12 {offsets = [0, 64], sizes = [16, 32], strides = [1, 1]} : vector<16x128xf32> to vector<16x32xf32>
    %50 = vector.extract_strided_slice %13 {offsets = [0, 64], sizes = [16, 32], strides = [1, 1]} : vector<16x128xf32> to vector<16x32xf32>
    %51 = vector.extract_strided_slice %14 {offsets = [0, 64], sizes = [16, 32], strides = [1, 1]} : vector<16x128xf32> to vector<16x32xf32>
    %cst_18 = arith.constant dense<0.000000e+00> : vector<16x16xf32>
    %52 = tpu.matmul %49, %50, %cst_18 {dimension_numbers = #tpu.dot_dimension_numbers<[1], [1], [0], [0], [0, 0, 1, 0], [], []>} : vector<16x32xf32>, vector<16x32xf32>, vector<16x16xf32> -> vector<16x16xf32>
    %cst_19 = arith.constant 0.176776692 : f32
    %53 = vector.broadcast %cst_19 : f32 to vector<16x16xf32>
    %54 = arith.mulf %52, %53 : vector<16x16xf32>
    %cst_20 = arith.constant dense<0xFF800000> : vector<16xf32>
    %55 = vector.multi_reduction <maximumf>, %54, %cst_20 [1] : vector<16x16xf32> to vector<16xf32>
    %56 = vector.shape_cast %55 : vector<16xf32> to vector<16x1xf32>
    %57 = vector.broadcast %56 : vector<16x1xf32> to vector<16x16xf32>
    %58 = arith.subf %54, %57 : vector<16x16xf32>
    %59 = math.exp %58 : vector<16x16xf32>
    %cst_21 = arith.constant dense<0.000000e+00> : vector<16xf32>
    %60 = vector.multi_reduction <add>, %59, %cst_21 [1] : vector<16x16xf32> to vector<16xf32>
    %61 = vector.shape_cast %60 : vector<16xf32> to vector<16x1xf32>
    %62 = tpu.reciprocal %61 {approx = true} : vector<16x1xf32> -> vector<16x1xf32>
    %63 = vector.broadcast %62 : vector<16x1xf32> to vector<16x16xf32>
    %64 = arith.mulf %59, %63 : vector<16x16xf32>
    %cst_22 = arith.constant dense<0.000000e+00> : vector<16x32xf32>
    %65 = tpu.matmul %64, %51, %cst_22 {dimension_numbers = #tpu.dot_dimension_numbers<[1], [0], [0], [1], [0, 0, 1, 1], [], []>} : vector<16x16xf32>, vector<16x32xf32>, vector<16x32xf32> -> vector<16x32xf32>
    %66 = vector.extract_strided_slice %12 {offsets = [0, 96], sizes = [16, 32], strides = [1, 1]} : vector<16x128xf32> to vector<16x32xf32>
    %67 = vector.extract_strided_slice %13 {offsets = [0, 96], sizes = [16, 32], strides = [1, 1]} : vector<16x128xf32> to vector<16x32xf32>
    %68 = vector.extract_strided_slice %14 {offsets = [0, 96], sizes = [16, 32], strides = [1, 1]} : vector<16x128xf32> to vector<16x32xf32>
    %cst_23 = arith.constant dense<0.000000e+00> : vector<16x16xf32>
    %69 = tpu.matmul %66, %67, %cst_23 {dimension_numbers = #tpu.dot_dimension_numbers<[1], [1], [0], [0], [0, 0, 1, 0], [], []>} : vector<16x32xf32>, vector<16x32xf32>, vector<16x16xf32> -> vector<16x16xf32>
    %cst_24 = arith.constant 0.176776692 : f32
    %70 = vector.broadcast %cst_24 : f32 to vector<16x16xf32>
    %71 = arith.mulf %69, %70 : vector<16x16xf32>
    %cst_25 = arith.constant dense<0xFF800000> : vector<16xf32>
    %72 = vector.multi_reduction <maximumf>, %71, %cst_25 [1] : vector<16x16xf32> to vector<16xf32>
    %73 = vector.shape_cast %72 : vector<16xf32> to vector<16x1xf32>
    %74 = vector.broadcast %73 : vector<16x1xf32> to vector<16x16xf32>
    %75 = arith.subf %71, %74 : vector<16x16xf32>
    %76 = math.exp %75 : vector<16x16xf32>
    %cst_26 = arith.constant dense<0.000000e+00> : vector<16xf32>
    %77 = vector.multi_reduction <add>, %76, %cst_26 [1] : vector<16x16xf32> to vector<16xf32>
    %78 = vector.shape_cast %77 : vector<16xf32> to vector<16x1xf32>
    %79 = tpu.reciprocal %78 {approx = true} : vector<16x1xf32> -> vector<16x1xf32>
    %80 = vector.broadcast %79 : vector<16x1xf32> to vector<16x16xf32>
    %81 = arith.mulf %76, %80 : vector<16x16xf32>
    %cst_27 = arith.constant dense<0.000000e+00> : vector<16x32xf32>
    %82 = tpu.matmul %81, %68, %cst_27 {dimension_numbers = #tpu.dot_dimension_numbers<[1], [0], [0], [1], [0, 0, 1, 1], [], []>} : vector<16x16xf32>, vector<16x32xf32>, vector<16x32xf32> -> vector<16x32xf32>
    %83 = tpu.concatenate %31, %48, %65, %82 in 1 : vector<16x32xf32>, vector<16x32xf32>, vector<16x32xf32>, vector<16x32xf32> -> vector<16x128xf32>
    %84 = arith.truncf %83 : vector<16x128xf32> to vector<16x128xbf16>
    %c0_28 = arith.constant 0 : index
    %c0_29 = arith.constant 0 : index
    %c0_30 = arith.constant 0 : index
    %85 = vector.load %arg18[%c0_28, %c0_29, %c0_30] : memref<1x128x128xbf16, #tpu.memory_space<vmem>>, vector<1x128x128xbf16>
    %86 = vector.shape_cast %85 : vector<1x128x128xbf16> to vector<128x128xbf16>
    %cst_31 = arith.constant dense<0.000000e+00> : vector<16x128xf32>
    %87 = tpu.matmul %84, %86, %cst_31 {dimension_numbers = #tpu.dot_dimension_numbers<[1], [0], [0], [1], [0, 0, 1, 1], [], []>} : vector<16x128xbf16>, vector<128x128xbf16>, vector<16x128xf32> -> vector<16x128xf32>
    %c0_32 = arith.constant 0 : index
    %c0_33 = arith.constant 0 : index
    %c0_34 = arith.constant 0 : index
    %88 = vector.load %arg19[%c0_32, %c0_33, %c0_34] : memref<1x1x128xf32, #tpu.memory_space<vmem>>, vector<1x1x128xf32>
    %89 = vector.shape_cast %88 : vector<1x1x128xf32> to vector<1x128xf32>
    %90 = vector.broadcast %89 : vector<1x128xf32> to vector<16x128xf32>
    %91 = arith.addf %87, %90 : vector<16x128xf32>
    %92 = arith.addf %3, %91 : vector<16x128xf32>
    %c0_35 = arith.constant 0 : index
    %c0_36 = arith.constant 0 : index
    %c0_37 = arith.constant 0 : index
    %93 = vector.load %arg20[%c0_35, %c0_36, %c0_37] : memref<1x1x128xf32, #tpu.memory_space<vmem>>, vector<1x1x128xf32>
    %94 = vector.shape_cast %93 : vector<1x1x128xf32> to vector<1x128xf32>
    %c0_38 = arith.constant 0 : index
    %c0_39 = arith.constant 0 : index
    %c0_40 = arith.constant 0 : index
    %95 = vector.load %arg21[%c0_38, %c0_39, %c0_40] : memref<1x1x128xf32, #tpu.memory_space<vmem>>, vector<1x1x128xf32>
    %96 = vector.shape_cast %95 : vector<1x1x128xf32> to vector<1x128xf32>
    %cst_41 = arith.constant dense<0.000000e+00> : vector<16xf32>
    %97 = vector.multi_reduction <add>, %92, %cst_41 [1] : vector<16x128xf32> to vector<16xf32>
    %98 = vector.shape_cast %97 : vector<16xf32> to vector<16x1xf32>
    %cst_42 = arith.constant 1.280000e+02 : f32
    %99 = vector.broadcast %cst_42 : f32 to vector<16x1xf32>
    %100 = arith.divf %98, %99 : vector<16x1xf32>
    %101 = vector.broadcast %100 : vector<16x1xf32> to vector<16x128xf32>
    %102 = arith.subf %92, %101 : vector<16x128xf32>
    %103 = arith.mulf %102, %102 : vector<16x128xf32>
    %cst_43 = arith.constant dense<0.000000e+00> : vector<16xf32>
    %104 = vector.multi_reduction <add>, %103, %cst_43 [1] : vector<16x128xf32> to vector<16xf32>
    %105 = vector.shape_cast %104 : vector<16xf32> to vector<16x1xf32>
    %cst_44 = arith.constant 1.280000e+02 : f32
    %106 = vector.broadcast %cst_44 : f32 to vector<16x1xf32>
    %107 = arith.divf %105, %106 : vector<16x1xf32>
    %cst_45 = arith.constant 9.99999974E-6 : f32
    %108 = vector.broadcast %cst_45 : f32 to vector<16x1xf32>
    %109 = arith.addf %107, %108 : vector<16x1xf32>
    %110 = math.rsqrt %109 : vector<16x1xf32>
    %111 = vector.broadcast %110 : vector<16x1xf32> to vector<16x128xf32>
    %112 = arith.mulf %102, %111 : vector<16x128xf32>
    %113 = vector.broadcast %94 : vector<1x128xf32> to vector<16x128xf32>
    %114 = arith.mulf %112, %113 : vector<16x128xf32>
    %115 = vector.broadcast %96 : vector<1x128xf32> to vector<16x128xf32>
    %116 = arith.addf %114, %115 : vector<16x128xf32>
    %117 = arith.truncf %116 : vector<16x128xf32> to vector<16x128xbf16>
    %c0_46 = arith.constant 0 : index
    %c0_47 = arith.constant 0 : index
    %c0_48 = arith.constant 0 : index
    %118 = vector.load %arg22[%c0_46, %c0_47, %c0_48] : memref<1x128x512xbf16, #tpu.memory_space<vmem>>, vector<1x128x512xbf16>
    %119 = vector.shape_cast %118 : vector<1x128x512xbf16> to vector<128x512xbf16>
    %cst_49 = arith.constant dense<0.000000e+00> : vector<16x512xf32>
    %120 = tpu.matmul %117, %119, %cst_49 {dimension_numbers = #tpu.dot_dimension_numbers<[1], [0], [0], [1], [0, 0, 1, 1], [], []>} : vector<16x128xbf16>, vector<128x512xbf16>, vector<16x512xf32> -> vector<16x512xf32>
    %c0_50 = arith.constant 0 : index
    %c0_51 = arith.constant 0 : index
    %c0_52 = arith.constant 0 : index
    %121 = vector.load %arg23[%c0_50, %c0_51, %c0_52] : memref<1x1x512xf32, #tpu.memory_space<vmem>>, vector<1x1x512xf32>
    %122 = vector.shape_cast %121 : vector<1x1x512xf32> to vector<1x512xf32>
    %123 = vector.broadcast %122 : vector<1x512xf32> to vector<16x512xf32>
    %124 = arith.addf %120, %123 : vector<16x512xf32>
    %cst_53 = arith.constant 5.000000e-01 : f32
    %125 = vector.broadcast %cst_53 : f32 to vector<16x512xf32>
    %126 = arith.mulf %125, %124 : vector<16x512xf32>
    %cst_54 = arith.constant 0.707106769 : f32
    %127 = vector.broadcast %cst_54 : f32 to vector<16x512xf32>
    %128 = arith.mulf %124, %127 : vector<16x512xf32>
    %129 = math.erf %128 : vector<16x512xf32>
    %cst_55 = arith.constant 1.000000e+00 : f32
    %130 = vector.broadcast %cst_55 : f32 to vector<16x512xf32>
    %131 = arith.addf %130, %129 : vector<16x512xf32>
    %132 = arith.mulf %126, %131 : vector<16x512xf32>
    %133 = arith.truncf %132 : vector<16x512xf32> to vector<16x512xbf16>
    %c0_56 = arith.constant 0 : index
    %c0_57 = arith.constant 0 : index
    %c0_58 = arith.constant 0 : index
    %134 = vector.load %arg24[%c0_56, %c0_57, %c0_58] : memref<1x512x128xbf16, #tpu.memory_space<vmem>>, vector<1x512x128xbf16>
    %135 = vector.shape_cast %134 : vector<1x512x128xbf16> to vector<512x128xbf16>
    %cst_59 = arith.constant dense<0.000000e+00> : vector<16x128xf32>
    %136 = tpu.matmul %133, %135, %cst_59 {dimension_numbers = #tpu.dot_dimension_numbers<[1], [0], [0], [1], [0, 0, 1, 1], [], []>} : vector<16x512xbf16>, vector<512x128xbf16>, vector<16x128xf32> -> vector<16x128xf32>
    %c0_60 = arith.constant 0 : index
    %c0_61 = arith.constant 0 : index
    %c0_62 = arith.constant 0 : index
    %137 = vector.load %arg25[%c0_60, %c0_61, %c0_62] : memref<1x1x128xf32, #tpu.memory_space<vmem>>, vector<1x1x128xf32>
    %138 = vector.shape_cast %137 : vector<1x1x128xf32> to vector<1x128xf32>
    %139 = vector.broadcast %138 : vector<1x128xf32> to vector<16x128xf32>
    %140 = arith.addf %136, %139 : vector<16x128xf32>
    %141 = arith.addf %116, %140 : vector<16x128xf32>
    %c0_63 = arith.constant 0 : index
    %c0_64 = arith.constant 0 : index
    %c0_65 = arith.constant 0 : index
    %142 = vector.load %arg26[%c0_63, %c0_64, %c0_65] : memref<1x1x128xf32, #tpu.memory_space<vmem>>, vector<1x1x128xf32>
    %143 = vector.shape_cast %142 : vector<1x1x128xf32> to vector<1x128xf32>
    %c0_66 = arith.constant 0 : index
    %c0_67 = arith.constant 0 : index
    %c0_68 = arith.constant 0 : index
    %144 = vector.load %arg27[%c0_66, %c0_67, %c0_68] : memref<1x1x128xf32, #tpu.memory_space<vmem>>, vector<1x1x128xf32>
    %145 = vector.shape_cast %144 : vector<1x1x128xf32> to vector<1x128xf32>
    %cst_69 = arith.constant dense<0.000000e+00> : vector<16xf32>
    %146 = vector.multi_reduction <add>, %141, %cst_69 [1] : vector<16x128xf32> to vector<16xf32>
    %147 = vector.shape_cast %146 : vector<16xf32> to vector<16x1xf32>
    %cst_70 = arith.constant 1.280000e+02 : f32
    %148 = vector.broadcast %cst_70 : f32 to vector<16x1xf32>
    %149 = arith.divf %147, %148 : vector<16x1xf32>
    %150 = vector.broadcast %149 : vector<16x1xf32> to vector<16x128xf32>
    %151 = arith.subf %141, %150 : vector<16x128xf32>
    %152 = arith.mulf %151, %151 : vector<16x128xf32>
    %cst_71 = arith.constant dense<0.000000e+00> : vector<16xf32>
    %153 = vector.multi_reduction <add>, %152, %cst_71 [1] : vector<16x128xf32> to vector<16xf32>
    %154 = vector.shape_cast %153 : vector<16xf32> to vector<16x1xf32>
    %cst_72 = arith.constant 1.280000e+02 : f32
    %155 = vector.broadcast %cst_72 : f32 to vector<16x1xf32>
    %156 = arith.divf %154, %155 : vector<16x1xf32>
    %cst_73 = arith.constant 9.99999974E-6 : f32
    %157 = vector.broadcast %cst_73 : f32 to vector<16x1xf32>
    %158 = arith.addf %156, %157 : vector<16x1xf32>
    %159 = math.rsqrt %158 : vector<16x1xf32>
    %160 = vector.broadcast %159 : vector<16x1xf32> to vector<16x128xf32>
    %161 = arith.mulf %151, %160 : vector<16x128xf32>
    %162 = vector.broadcast %143 : vector<1x128xf32> to vector<16x128xf32>
    %163 = arith.mulf %161, %162 : vector<16x128xf32>
    %164 = vector.broadcast %145 : vector<1x128xf32> to vector<16x128xf32>
    %165 = arith.addf %163, %164 : vector<16x128xf32>
    %c0_74 = arith.constant 0 : index
    %c0_75 = arith.constant 0 : index
    %166 = vector.load %arg31[%c0_74, %c0_75] : memref<16x128xf32, #tpu.memory_space<vmem>>, vector<16x128xf32>
    tpu.vector_store %arg31[%c0_74, %c0_75], %165 {strides = array<i32>} : memref<16x128xf32, #tpu.memory_space<vmem>>, vector<16x128xf32>,
    %c1_i32 = arith.constant 1 : i32
    %167 = arith.cmpi eq, %arg1, %c1_i32 : i32
    %168 = arith.extui %167 : i1 to i32
    %c0_i32_76 = arith.constant 0 : i32
    %169 = arith.cmpi ne, %168, %c0_i32_76 : i32
    scf.if %169 {
      %170 = arith.truncf %165 : vector<16x128xf32> to vector<16x128xbf16>
      %c0_77 = arith.constant 0 : index
      %c0_78 = arith.constant 0 : index
      %171 = vector.load %arg28[%c0_77, %c0_78] : memref<128x256xbf16, #tpu.memory_space<vmem>>, vector<128x256xbf16>
      %cst_79 = arith.constant dense<0.000000e+00> : vector<16x256xf32>
      %172 = tpu.matmul %170, %171, %cst_79 {dimension_numbers = #tpu.dot_dimension_numbers<[1], [0], [0], [1], [0, 0, 1, 1], [], []>} : vector<16x128xbf16>, vector<128x256xbf16>, vector<16x256xf32> -> vector<16x256xf32>
      %c0_80 = arith.constant 0 : index
      %c0_81 = arith.constant 0 : index
      %173 = vector.load %arg29[%c0_80, %c0_81] : memref<1x256xf32, #tpu.memory_space<vmem>>, vector<1x256xf32>
      %174 = vector.broadcast %173 : vector<1x256xf32> to vector<16x256xf32>
      %175 = arith.addf %172, %174 : vector<16x256xf32>
      %c0_82 = arith.constant 0 : index
      %c0_83 = arith.constant 0 : index
      %176 = vector.load %arg30[%c0_82, %c0_83] : memref<16x256xf32, #tpu.memory_space<vmem>>, vector<16x256xf32>
      tpu.vector_store %arg30[%c0_82, %c0_83], %175 {strides = array<i32>} : memref<16x256xf32, #tpu.memory_space<vmem>>, vector<16x256xf32>,
    } else {
    }
    return
  }
  func.func @transform_0(%arg0: i32, %arg1: i32) -> (i32, i32) {
    %c0_i32 = arith.constant 0 : i32
    %c0_i32_0 = arith.constant 0 : i32
    return %arg0, %c0_i32 : i32, i32
  }
  func.func @transform_1(%arg0: i32, %arg1: i32) -> (i32, i32) {
    %c0_i32 = arith.constant 0 : i32
    %c0_i32_0 = arith.constant 0 : i32
    %c0_i32_1 = arith.constant 0 : i32
    return %c0_i32, %c0_i32_0 : i32, i32
  }
  func.func @transform_2(%arg0: i32, %arg1: i32) -> (i32, i32) {
    %c0_i32 = arith.constant 0 : i32
    %c0_i32_0 = arith.constant 0 : i32
    %c0_i32_1 = arith.constant 0 : i32
    return %c0_i32, %c0_i32_0 : i32, i32
  }
  func.func @transform_3(%arg0: i32, %arg1: i32) -> (i32, i32, i32) {
    %c0_i32 = arith.constant 0 : i32
    %c0_i32_0 = arith.constant 0 : i32
    %c0_i32_1 = arith.constant 0 : i32
    return %arg0, %c0_i32, %c0_i32_0 : i32, i32, i32
  }
  func.func @transform_4(%arg0: i32, %arg1: i32) -> (i32, i32) {
    %c0_i32 = arith.constant 0 : i32
    %c0_i32_0 = arith.constant 0 : i32
    %c0_i32_1 = arith.constant 0 : i32
    return %c0_i32, %c0_i32_0 : i32, i32
  }
  func.func @transform_5(%arg0: i32, %arg1: i32) -> (i32, i32) {
    %c0_i32 = arith.constant 0 : i32
    %c0_i32_0 = arith.constant 0 : i32
    %c0_i32_1 = arith.constant 0 : i32
    return %c0_i32, %c0_i32_0 : i32, i32
  }
  func.func @transform_6(%arg0: i32, %arg1: i32) -> (i32, i32, i32) {
    %c0_i32 = arith.constant 0 : i32
    %c0_i32_0 = arith.constant 0 : i32
    %c0_i32_1 = arith.constant 0 : i32
    return %arg0, %c0_i32, %c0_i32_0 : i32, i32, i32
  }
  func.func @transform_7(%arg0: i32, %arg1: i32) -> (i32, i32, i32) {
    %c0_i32 = arith.constant 0 : i32
    %c0_i32_0 = arith.constant 0 : i32
    %c0_i32_1 = arith.constant 0 : i32
    return %arg0, %c0_i32, %c0_i32_0 : i32, i32, i32
  }
  func.func @transform_8(%arg0: i32, %arg1: i32) -> (i32, i32) {
    %c0_i32 = arith.constant 0 : i32
    %c0_i32_0 = arith.constant 0 : i32
    %c0_i32_1 = arith.constant 0 : i32
    return %c0_i32, %c0_i32_0 : i32, i32
  }
  func.func @transform_9(%arg0: i32, %arg1: i32) -> (i32, i32) {
    %c0_i32 = arith.constant 0 : i32
    %c0_i32_0 = arith.constant 0 : i32
    %c0_i32_1 = arith.constant 0 : i32
    return %c0_i32, %c0_i32_0 : i32, i32
  }
  func.func @transform_10(%arg0: i32, %arg1: i32) -> (i32, i32) {
    %c0_i32 = arith.constant 0 : i32
    %c0_i32_0 = arith.constant 0 : i32
    %c0_i32_1 = arith.constant 0 : i32
    return %c0_i32, %c0_i32_0 : i32, i32
  }
  func.func @transform_11(%arg0: i32, %arg1: i32) -> (i32, i32) {
    %c0_i32 = arith.constant 0 : i32
    %c0_i32_0 = arith.constant 0 : i32
    %c0_i32_1 = arith.constant 0 : i32
    return %c0_i32, %c0_i32_0 : i32, i32
  }
  func.func @transform_12(%arg0: i32, %arg1: i32) -> (i32, i32) {
    %c0_i32 = arith.constant 0 : i32
    %c0_i32_0 = arith.constant 0 : i32
    %c0_i32_1 = arith.constant 0 : i32
    return %c0_i32, %c0_i32_0 : i32, i32
  }
  func.func @transform_13(%arg0: i32, %arg1: i32) -> (i32, i32) {
    %c0_i32 = arith.constant 0 : i32
    %c0_i32_0 = arith.constant 0 : i32
    %c0_i32_1 = arith.constant 0 : i32
    return %c0_i32, %c0_i32_0 : i32, i32
  }
  func.func @transform_14(%arg0: i32, %arg1: i32) -> (i32, i32, i32) {
    %c0_i32 = arith.constant 0 : i32
    %c0_i32_0 = arith.constant 0 : i32
    %c0_i32_1 = arith.constant 0 : i32
    return %arg1, %c0_i32, %c0_i32_0 : i32, i32, i32
  }
  func.func @transform_15(%arg0: i32, %arg1: i32) -> (i32, i32, i32) {
    %c0_i32 = arith.constant 0 : i32
    %c0_i32_0 = arith.constant 0 : i32
    %c0_i32_1 = arith.constant 0 : i32
    return %arg1, %c0_i32, %c0_i32_0 : i32, i32, i32
  }
  func.func @transform_16(%arg0: i32, %arg1: i32) -> (i32, i32, i32) {
    %c0_i32 = arith.constant 0 : i32
    %c0_i32_0 = arith.constant 0 : i32
    %c0_i32_1 = arith.constant 0 : i32
    return %arg1, %c0_i32, %c0_i32_0 : i32, i32, i32
  }
  func.func @transform_17(%arg0: i32, %arg1: i32) -> (i32, i32, i32) {
    %c0_i32 = arith.constant 0 : i32
    %c0_i32_0 = arith.constant 0 : i32
    %c0_i32_1 = arith.constant 0 : i32
    return %arg1, %c0_i32, %c0_i32_0 : i32, i32, i32
  }
  func.func @transform_18(%arg0: i32, %arg1: i32) -> (i32, i32, i32) {
    %c0_i32 = arith.constant 0 : i32
    %c0_i32_0 = arith.constant 0 : i32
    %c0_i32_1 = arith.constant 0 : i32
    return %arg1, %c0_i32, %c0_i32_0 : i32, i32, i32
  }
  func.func @transform_19(%arg0: i32, %arg1: i32) -> (i32, i32, i32) {
    %c0_i32 = arith.constant 0 : i32
    %c0_i32_0 = arith.constant 0 : i32
    %c0_i32_1 = arith.constant 0 : i32
    return %arg1, %c0_i32, %c0_i32_0 : i32, i32, i32
  }
  func.func @transform_20(%arg0: i32, %arg1: i32) -> (i32, i32, i32) {
    %c0_i32 = arith.constant 0 : i32
    %c0_i32_0 = arith.constant 0 : i32
    %c0_i32_1 = arith.constant 0 : i32
    return %arg1, %c0_i32, %c0_i32_0 : i32, i32, i32
  }
  func.func @transform_21(%arg0: i32, %arg1: i32) -> (i32, i32, i32) {
    %c0_i32 = arith.constant 0 : i32
    %c0_i32_0 = arith.constant 0 : i32
    %c0_i32_1 = arith.constant 0 : i32
    return %arg1, %c0_i32, %c0_i32_0 : i32, i32, i32
  }
  func.func @transform_22(%arg0: i32, %arg1: i32) -> (i32, i32, i32) {
    %c0_i32 = arith.constant 0 : i32
    %c0_i32_0 = arith.constant 0 : i32
    %c0_i32_1 = arith.constant 0 : i32
    return %arg1, %c0_i32, %c0_i32_0 : i32, i32, i32
  }
  func.func @transform_23(%arg0: i32, %arg1: i32) -> (i32, i32, i32) {
    %c0_i32 = arith.constant 0 : i32
    %c0_i32_0 = arith.constant 0 : i32
    %c0_i32_1 = arith.constant 0 : i32
    return %arg1, %c0_i32, %c0_i32_0 : i32, i32, i32
  }
  func.func @transform_24(%arg0: i32, %arg1: i32) -> (i32, i32, i32) {
    %c0_i32 = arith.constant 0 : i32
    %c0_i32_0 = arith.constant 0 : i32
    %c0_i32_1 = arith.constant 0 : i32
    return %arg1, %c0_i32, %c0_i32_0 : i32, i32, i32
  }
  func.func @transform_25(%arg0: i32, %arg1: i32) -> (i32, i32, i32) {
    %c0_i32 = arith.constant 0 : i32
    %c0_i32_0 = arith.constant 0 : i32
    %c0_i32_1 = arith.constant 0 : i32
    return %arg1, %c0_i32, %c0_i32_0 : i32, i32, i32
  }
  func.func @transform_26(%arg0: i32, %arg1: i32) -> (i32, i32) {
    %c0_i32 = arith.constant 0 : i32
    %c0_i32_0 = arith.constant 0 : i32
    %c0_i32_1 = arith.constant 0 : i32
    return %c0_i32, %c0_i32_0 : i32, i32
  }
  func.func @transform_27(%arg0: i32, %arg1: i32) -> (i32, i32) {
    %c0_i32 = arith.constant 0 : i32
    %c0_i32_0 = arith.constant 0 : i32
    %c0_i32_1 = arith.constant 0 : i32
    return %c0_i32, %c0_i32_0 : i32, i32
  }
  func.func @transform_28(%arg0: i32, %arg1: i32) -> (i32, i32) {
    %c0_i32 = arith.constant 0 : i32
    %c0_i32_0 = arith.constant 0 : i32
    return %arg0, %c0_i32 : i32, i32
  }
}

</mosaic_0001>

<bundles_post_ra>
// kernel: flow_transformer_forward.1
= control target key start
LH: loop header
LB: loop body
LE: loop exit
PB: predicated region body
PF: predicated region fallthrough
CT: control target
= control target key end

     0   :  { %s4941_s30 = smov 0   ;;  %s6155_s0 = inlined_call_operand.vmem [shape: f32[32,192], index: 0, kind: input, shape index: {}]   ;;  %s6156_s1 = inlined_call_operand.vmem [shape: bf16[192,128], index: 1, kind: input, shape index: {}]   ;;  %s6157_s2 = inlined_call_operand.vmem [shape: f32[1,128], index: 2, kind: input, shape index: {}]   ;;  %s6158_s3 = inlined_call_operand.vmem [shape: f32[2,1,40], index: 3, kind: input, shape index: {}]   ;;  %s6159_s4 = inlined_call_operand.vmem [shape: bf16[40,128], index: 4, kind: input, shape index: {}]   ;;  %s6160_s5 = inlined_call_operand.vmem [shape: f32[1,128], index: 5, kind: input, shape index: {}]   ;;  %s6161_s6 = inlined_call_operand.vmem [shape: f32[2,1,1], index: 6, kind: input, shape index: {}]   ;;  %s6162_s7 = inlined_call_operand.vmem [shape: f32[2,1,1], index: 7, kind: input, shape index: {}]   ;;  %s6163_s8 = inlined_call_operand.vmem [shape: f32[1,128], index: 8, kind: input, shape index: {}]   ;;  %s6164_s9 = inlined_call_operand.vmem [shape: f32[256,128], index: 9, kind: input, shape index: {}]   ;;  %s6165_s10 = inlined_call_operand.vmem [shape: f32[1,128], index: 10, kind: input, shape index: {}]   ;;  %s6166_s11 = inlined_call_operand.vmem [shape: f32[128,128], index: 11, kind: input, shape index: {}]   ;;  %s6167_s12 = inlined_call_operand.vmem [shape: f32[1,128], index: 12, kind: input, shape index: {}]   ;;  %s6168_s13 = inlined_call_operand.vmem [shape: f32[16,128], index: 13, kind: input, shape index: {}]   ;;  %s6169_s14 = inlined_call_operand.vmem [shape: bf16[2,128,384], index: 14, kind: input, shape index: {}]   ;;  %s6170_s15 = inlined_call_operand.vmem [shape: f32[2,1,384], index: 15, kind: input, shape index: {}]   ;;  %s6171_s16 = inlined_call_operand.vmem [shape: bf16[2,128,128], index: 16, kind: input, shape index: {}]   ;;  %s6172_s17 = inlined_call_operand.vmem [shape: f32[2,1,128], index: 17, kind: input, shape index: {}]   ;;  %s6173_s18 = inlined_call_operand.vmem [shape: f32[2,1,128], index: 18, kind: input, shape index: {}]   ;;  %s6174_s19 = inlined_call_operand.vmem [shape: f32[2,1,128], index: 19, kind: input, shape index: {}]   ;;  %s6175_s20 = inlined_call_operand.vmem [shape: bf16[2,128,512], index: 20, kind: input, shape index: {}]   ;;  %s6176_s21 = inlined_call_operand.vmem [shape: f32[2,1,512], index: 21, kind: input, shape index: {}]   ;;  %s6177_s22 = inlined_call_operand.vmem [shape: bf16[2,512,128], index: 22, kind: input, shape index: {}]   ;;  %s6178_s23 = inlined_call_operand.vmem [shape: f32[2,1,128], index: 23, kind: input, shape index: {}]   ;;  %s6179_s24 = inlined_call_operand.vmem [shape: f32[2,1,128], index: 24, kind: input, shape index: {}]   ;;  %s6180_s25 = inlined_call_operand.vmem [shape: f32[2,1,128], index: 25, kind: input, shape index: {}]   ;;  %s6181_s26 = inlined_call_operand.vmem [shape: bf16[128,256], index: 26, kind: input, shape index: {}]   ;;  %s6182_s27 = inlined_call_operand.vmem [shape: f32[1,256], index: 27, kind: input, shape index: {}]   ;;  %s6183_s28 = inlined_call_operand.vmem [shape: f32[32,256], index: 28, kind: output, shape index: {}]  }
   0x1   :  { %6195 = sst [smem:[#allocation10_spill]] %s6155_s0 }
   0x2   :  { %6196 = sst [smem:[#allocation11_spill]] %s6156_s1 }
   0x3   :  { %6197 = sst [smem:[#allocation12_spill]] %s6157_s2 }
   0x4   :  { %6198 = sst [smem:[#allocation13_spill]] %s6158_s3  ;;  %s4943_s3 = smov 0  }
   0x5   :  { %6199 = sst [smem:[#allocation14_spill]] %s6159_s4 }
   0x6   :  { %6200 = sst [smem:[#allocation15_spill]] %s6160_s5  ;;  %s4937_s5 = smov 0  }
   0x7   :  { %6201 = sst [smem:[#allocation16_spill]] %s6161_s6 }
   0x8   :  { %6202 = sst [smem:[#allocation17_spill]] %s6162_s7 }
   0x9   :  { %6203 = sst [smem:[#allocation18_spill]] %s6163_s8  ;;  %s4935_s8 = smov 0  }
   0xa   :  { %6204 = sst [smem:[#allocation19_spill]] %s6164_s9  ;;  %s4939_s9 = smov 0  }
   0xb   :  { %6205 = sst [smem:[#allocation20_spill]] %s6165_s10 }
   0xc   :  { %6206 = sst [smem:[#allocation21_spill]] %s6166_s11 }
   0xd   :  { %6207 = sst [smem:[#allocation22_spill]] %s6167_s12 }
   0xe   :  { %6208 = sst [smem:[#allocation23_spill]] %s6168_s13 }
   0xf   :  { %6209 = sst [smem:[#allocation24_spill]] %s6169_s14 }
  0x10   :  { %6210 = sst [smem:[#allocation25_spill]] %s6170_s15 }
  0x11   :  { %6211 = sst [smem:[#allocation26_spill]] %s6171_s16 }
  0x12   :  { %6212 = sst [smem:[#allocation27_spill]] %s6173_s18 }
  0x13   :  { %6213 = sst [smem:[#allocation28_spill]] %s6174_s19 }
  0x14   :  { %6214 = sst [smem:[#allocation29_spill]] %s6175_s20 }
  0x15   :  { %6215 = sst [smem:[#allocation30_spill]] %s6176_s21 }
  0x16   :  { %6216 = sst [smem:[#allocation31_spill]] %s6177_s22 }
  0x17   :  { %6217 = sst [smem:[#allocation32_spill]] %s6178_s23 }
  0x18   :  { %6218 = sst [smem:[#allocation33_spill]] %s6179_s24 }
  0x19   :  { %6219 = sst [smem:[#allocation34_spill]] %s6180_s25 }
  0x1a   :  { %6220 = sst [smem:[#allocation35_spill]] %s6181_s26 }
  0x1b   :  { %6221 = sst [smem:[#allocation36_spill]] %s6182_s27 }
  0x1c   :  { %6222 = sst [smem:[#allocation37_spill]] %s6183_s28 }
  0x1d LB: > { %6223 = sst [smem:[#allocation3_spill]] %s4769_s9  ;;  %s47_s6 = sadd.s32 1, %s4769_s9  ;;  %s4777_s3 = sphi %s4943_s3, %s38_s3   ;;  %s4773_s30 = sphi %s4941_s30, %s6291_s30   ;;  %s4769_s9 = sphi %s4939_s9, %s6290_s9   ;;  %s4765_s5 = sphi %s4937_s5, %s6289_s5   ;;  %s4761_s8 = sphi %s4935_s8, %s6288_s8  }
  0x1e   : > { %6224 = sst [smem:[#allocation4_spill]] %s4773_s30  ;;  %s50_s10 = sadd.s32 1, %s4773_s30 }
  0x1f   : > { %6225 = sst [smem:[#allocation5_spill]] %s4777_s3  ;;  %p48_p0 = scmp.ge.s32.totalorder %s47_s6, 2 }
  0x20   : > { %p3891_p1 = scmp.ge.s32.totalorder %s4777_s3, 1  ;;  %p906_p2 = scmp.lt.s32.totalorder %s4777_s3, 5 }
  0x21   : > { %s6293_s6 = smov (%p48_p0, %s47_s6), 0  ;;  %s6295_s10 = smov (!%p48_p0, %s50_s10), %s4773_s30 }
  0x22   : > { %6226 = sst [smem:[#allocation6_spill]] %s6293_s6  ;;  %p907_p3 = pnand %p3891_p1, %p906_p2 }
  0x23   : > { %p52_p4 = scmp.ge.s32.totalorder %s6295_s10, 2 }
  0x24   : > { %910 = sbr.rel (%p907_p3) target bundleno = 3104 (0xc20), region = 132 }
  0x25   : > { %s6297_s10 = smov (%p52_p4, %s6295_s10), 0 }
  0x26   : > { %6227 = sst [smem:[#allocation7_spill]] %s6297_s10 }
  0x29   : > { %s3892_s0 = sshll.u32 %s4765_s5, 1  ;;  %p1044_p5 = scmp.lt.s32.totalorder %s4765_s5, 1 }
  0x2a   : > { %p1038_p6 = scmp.lt.s32.totalorder %s3892_s0, 3  ;;  %p1053_p7 = scmp.lt.s32.totalorder %s4761_s8, 1 }
  0x2b   : > { %s6299_s5 = smov (!%p1044_p5, %s4765_s5), 1  ;;  %s6230_s3 = sld [smem:[#allocation17_spill]] }
  0x2c   : > { %s6301_s0 = smov (!%p1038_p6, %s3892_s0), 3  ;;  %s6231_s25 = sld [smem:[#allocation10_spill]] }
  0x2d   : > { %s4455_s6 = sshll.u32 %s6301_s0, 4  ;;  %s6232_s28 = sld [smem:[#allocation37_spill]] }
  0x2e   : > { %s4993_s11 = scalar_select %p1053_p7, %s4761_s8, 1 }
  0x2f   : > { %s6234_s16 = sld [smem:[#allocation26_spill]]  ;;  %p3906_p8 = scmp.ne.s32.totalorder %s4761_s8, 0 }
  0x30   : > { %s4586_s13 = smul.u32 192, %s4993_s11  ;;  %s6235_s14 = sld [smem:[#allocation24_spill]] }
  0x31   : > { %s1052_s27 = scalar_lea.vmem %s6230_s3, %s6299_s5  ;;  %s4587_s26 = smul.u32 3, %s4993_s11 }
  0x32   : > { %s4985_s24 = scalar_lea.vmem %s6231_s25, %s4455_s6  ;;  %s4456_s25 = sshll.u32 %s4993_s11, 6 }
  0x33   : > { %s4990_s21 = scalar_lea.vmem %s6232_s28, %s4455_s6  ;;  %s6236_s15 = sld [smem:[#allocation25_spill]] }
  0x34   : > { %6233 = sst [smem:[#allocation8_spill]] %s4990_s21  ;;  %s4457_s30 = sshll.u32 %s4993_s11, 8 }
  0x35   : > { %s5001_s23 = scalar_lea.vmem %s6234_s16, %s4456_s25  ;;  %s6239_s20 = sld [smem:[#allocation29_spill]] }
  0x36   : > { %s5006_s6 = scalar_lea.vmem %s6235_s14, %s4586_s13  ;;  %s3900_s0 = sshll.u32 %s4993_s11, 2 }
  0x37   : > { %s6241_s12 = sld [smem:[#allocation30_spill]] }
  0x38   : > { %s6242_s10 = sld [smem:[#allocation31_spill]] }
  0x39   : > { %s5015_s4 = scalar_lea.vmem %s6236_s15, %s4587_s26  ;;  %s6243_s22 = sld [smem:[#allocation32_spill]] }
  0x3a   : > { %s6244_s13 = sld [smem:[#allocation33_spill]] }
  0x3b   : > { %s5029_s14 = scalar_lea.vmem %s6239_s20, %s4457_s30  ;;  %s6245_s18 = sld [smem:[#allocation34_spill]] }
  0x3c   : > { %6240 = sst [smem:[#allocation9_spill]] %s5029_s14 }
  0x3d   : > { %s5035_s26 = scalar_lea.vmem %s6241_s12, %s3900_s0  ;;  %1110 = sbr.rel (%p3906_p8) target bundleno = 585 (0x249), region = 136 }
  0x3e   : > { %s5040_s7 = scalar_lea.vmem %s6242_s10, %s4457_s30  ;;  %s6246_s30 = sld [smem:[#allocation11_spill]] (!%p3906_p8) }
  0x3f   : > { %s1092_s16 = scalar_lea.vmem %s6243_s22, %s4993_s11  ;;  %s6248_s9 = sld [smem:[#allocation14_spill]] (!%p3906_p8) }
  0x40   : > { %s1095_s3 = scalar_lea.vmem %s6244_s13, %s4993_s11  ;;  %s6250_s2 = sld [smem:[#allocation16_spill]] (!%p3906_p8) }
  0x41   : > { %s1098_s14 = scalar_lea.vmem %s6245_s18, %s4993_s11  ;;  %s6254_s21 = sld [smem:[#allocation18_spill]] (!%p3906_p8) }
  0x42   : > { %v1301_v0 = vld [vmem:[%s1052_s27] sm:$0x1]  ;;  %v4779_v3 = vmov 0   ;;  %vm1276_vm0 = vcmask 1043456   ;;  %s6252_s27 = sld [smem:[#allocation13_spill]]  ;;  %v1112_v19 = vld [vmem:[%s4985_s24 + $0x8] sm:$0xff] }
  0x43   : > { %4639 = vset.pattern.permute.xlu0 %v4779_v3  ;;  %v1114_v20 = vld [vmem:[%s4985_s24 + $0x18] sm:$0xff]  ;;  %vm1272_vm1 = vcmask 326656   ;;  %vm1217_vm2 = vcmask 523264   ;;  %v1111_v26 = vld [vmem:[%s4985_s24] sm:$0xff]  ;;  %v1113_v27 = vld [vmem:[%s4985_s24 + $0x10] sm:$0xff]  ;;  %s6256_s20 = sld [smem:[#allocation21_spill]] }
  0x44   : > { %s6247_s0 = smov %s6246_s30  ;;  %v4467_v1 = vld [vmem:[%s6246_s30 + $0x38] sm:$0xff]  ;;  %1305 = vperm.xlu0 %4639, %v1301_v0   ;;  %v1116_v22 = vpack.c.bf16 %v1114_v20, %v1112_v19  ;;  %v1115_v28 = vpack.c.bf16 %v1113_v27, %v1111_v26  ;;  %v4780_v45 = vmov 683565275   ;;  %v4781_v47 = vmov 2475754826   ;;  %s6257_s18 = sld [smem:[#allocation20_spill]] }
  0x45   : > { %s6249_s1 = smov %s6248_s9  ;;  %v1255_v2 = vld [vmem:[%s6248_s9 + $0x10] sm:$0xf]  ;;  %1221 = vmatpush.bf16.msra.mxu0 %v4467_v1  ;;  %v4471_v7 = vld [vmem:[%s6247_s0 + $0x58] sm:$0xff]  ;;  %v4465_v12 = vld [vmem:[%s6247_s0 + $0x28] sm:$0xff]  ;;  %v4782_v50 = vmov 2131351028  }
  0x46   : > { %v1266_v4 = vunpack.c.l.b16 %v1255_v2  ;;  %v4466_v5 = vld [vmem:[%s6247_s0 + $0x30] sm:$0xff]  ;;  %1239 = vmatpush.bf16.msra.mxu1 %v4471_v7  ;;  %v4473_v10 = vld [vmem:[%s6249_s1 + $0x8] sm:$0xff]  ;;  %s6251_s15 = scalar_lea.vmem %s6250_s2, %s6299_s5  ;;  %v4472_v14 = vld [vmem:[%s6249_s1] sm:$0xff]  ;;  %v4783_v53 = vmov 2102212464   ;;  %s6258_s10 = sld [smem:[#allocation12_spill]] }
  0x47   : > { %v4470_v9 = vld [vmem:[%s6247_s0 + $0x50] sm:$0xff]  ;;  %v1293_v11 = vld [vmem:[%s6251_s15] sm:$0x1]  ;;  %v4469_v13 = vld [vmem:[%s6247_s0 + $0x48] sm:$0xff]  ;;  %v4784_v56 = vmov 920167782  }
  0x48   : > { %v1269_v6 = vpack.c.b16 %v1266_v4, %v1266_v4  ;;  %s6253_s28 = scalar_lea.vmem %s6252_s27, %s6299_s5  ;;  %v4464_v16 = vld [vmem:[%s6247_s0 + $0x20] sm:$0xff]  ;;  %v4463_v21 = vld [vmem:[%s6247_s0 + $0x18] sm:$0xff]  ;;  %v4462_v23 = vld [vmem:[%s6247_s0 + $0x10] sm:$0xff]  ;;  %v4785_v59 = vmov 1326507024   ;;  %s6259_s13 = sld [smem:[#allocation15_spill]] }
  0x49   : > { %1222 = vmatpush.bf16.msra.mxu0 %v4466_v5  ;;  %v1249_v15 = vld [vmem:[%s6253_s28] sm:$0x1]  ;;  %v4461_v24 = vld [vmem:[%s6247_s0 + $0x8] sm:$0xff]  ;;  %s6255_s28 = sld [smem:[#allocation19_spill]] }
  0x4a   : > { %v1278_v8 = vsel %vm1276_vm0, %v1269_v6, 0  ;;  %1240 = vmatpush.bf16.msra.mxu1 %v4470_v9  ;;  %v1250_v17 = vpack.c.bf16 %v1249_v15, %v1249_v15  ;;  %v4468_v18 = vld [vmem:[%s6247_s0 + $0x40] sm:$0xff]  ;;  %s6260_s15 = sld [smem:[#allocation23_spill]] }
  0x4b   : > { %1285 = vmatpush.bf16.msra.mxu2 %v1278_v8  ;;  %v4460_v25 = vld [vmem:[%s6247_s0] sm:$0xff] }
  0x4c   : > { %1296 = vperm.xlu0 %4639, %v1293_v11   ;;  %v1302_v29 = vld [vmem:[%s6254_s21] sm:$0x1] }
  0x4d   : > { %1223 = vmatpush.bf16.msra.mxu0 %v4465_v12 }
  0x4e   : > { %1241 = vmatpush.bf16.msra.mxu1 %v4469_v13 }
  0x4f   : > { %1286 = vmatpush.bf16.msra.mxu2 %v4473_v10  ;;  %v1651_v5 = vld [vmem:[%s6255_s28 + $0xf8] sm:$0xff]  ;;  %v1650_v7 = vld [vmem:[%s6255_s28 + $0xf0] sm:$0xff]  ;;  %v1649_v13 = vld [vmem:[%s6255_s28 + $0xe8] sm:$0xff] }
  0x50   : > { %v1635_v6 = vld [vmem:[%s6255_s28 + $0x78] sm:$0xff]  ;;  %1652 = vmatpush.msra.mxu3 %v1651_v5  ;;  %v1634_v10 = vld [vmem:[%s6255_s28 + $0x70] sm:$0xff] }
  0x51   : > { %1224 = vmatpush.bf16.msra.mxu0 %v4464_v16 }
  0x52   : > { %1242 = vmatpush.bf16.msra.mxu1 %v4468_v18  ;;  %1653 = vmatpush.msra.mxu3 %v1650_v7 }
  0x53   : > { %1287 = vmatpush.bf16.msra.mxu2 %v4472_v14  ;;  %v1633_v14 = vld [vmem:[%s6255_s28 + $0x68] sm:$0xff] }
  0x54   : > { %1654 = vmatpush.msra.mxu3 %v1649_v13 }
  0x55   : > { %1225 = vmatpush.bf16.msra.mxu0 %v4463_v21  ;;  %3955 = vmatmul.msk.bf16.vlgmr.msra.gmra.mxu1 %vm1217_vm2, %v1116_v22  ;;  %v1648_v22 = vld [vmem:[%s6255_s28 + $0xe0] sm:$0xff] }
  0x56   : > { %3964 = vmatmul.msk.bf16.vlgmr.msra.gmra.mxu2 %vm1272_vm1, %v1250_v17  ;;  %1655 = vmatpush.msra.mxu3 %v1648_v22  ;;  %v1623_v22 = vld [vmem:[%s6255_s28 + $0x18] sm:$0xff] }
  0x57   : > { %1672 = vmatpush.msrb.mxu2 %v1635_v6 }
  0x59   : > { %1226 = vmatpush.bf16.msra.mxu0 %v4462_v23  ;;  %1673 = vmatpush.msrb.mxu2 %v1634_v10  ;;  %v1632_v23 = vld [vmem:[%s6255_s28 + $0x60] sm:$0xff] }
  0x5b   : > { %1674 = vmatpush.msrb.mxu2 %v1633_v14 }
  0x5d   : > { %1227 = vmatpush.bf16.msra.mxu0 %v4461_v24  ;;  %1675 = vmatpush.msrb.mxu2 %v1632_v23 }
  0x61   : > { %1228 = vmatpush.bf16.msra.mxu0 %v4460_v25 }
  0x64   : > { %1229 = vmatmul.bf16.vlgmr.msra.gmra.mxu0 %v1115_v28 }
  0xb6   : > { %v1306_v30 = vpop.permute.xlu0 %1305 }
  0xb7   : > { %v1308_v31 = vperm.slane %v1306_v30, 0  ;;  %v1631_v30 = vld [vmem:[%s6255_s28 + $0x58] sm:$0xff] }
  0xb8   : > { %1676 = vmatpush.msrb.mxu2 %v1631_v30 }
  0xb9   : > { %v1309_v32 = vmul.f32 %v1308_v31, %v1302_v29  ;;  %v1647_v29 = vld [vmem:[%s6255_s28 + $0xd8] sm:$0xff] }
  0xba   : > { %1656 = vmatpush.msra.mxu3 %v1647_v29  ;;  %v1621_v29 = vld [vmem:[%s6255_s28 + $0x8] sm:$0xff] }
  0xbb   : > { %v5118_v33 = vmul.f32 6.2831855, %v1309_v32 }
  0xbd   : > { %v1314_v34 = vand.u32 2139095040, %v5118_v33  ;;  %v1311_v37 = vand.u32 2147483647, %v5118_v33  ;;  %vm1313_vm15 = vcmp.lt.s32.totalorder %v5118_v33, 0 }
  0xbf   : > { %v1315_v35 = vshrl.u32 %v1314_v34, 23  ;;  %v1318_v40 = vand.u32 8388607, %v1311_v37  ;;  %vm1312_vm0 = vcmp.le.f32.partialorder %v1311_v37, 0.7853982 }
  0xc1   : > { %v3965_v36 = vadd.s32 4294967169, %v1315_v35  ;;  %v1319_v44 = vor.u32 8388608, %v1318_v40  ;;  %v1646_v35 = vld [vmem:[%s6255_s28 + $0xd0] sm:$0xff] }
  0xc2   : > { %1657 = vmatpush.msra.mxu3 %v1646_v35 }
  0xc3   : > { %v1321_v38 = vadd.s32 1, %v3965_v36  ;;  %v5141_v2 = vshll.u32 %v1319_v44, 8  ;;  %v1630_v36 = vld [vmem:[%s6255_s28 + $0x50] sm:$0xff] }
  0xc4   : > { %1677 = vmatpush.msrb.mxu2 %v1630_v36 }
  0xc5   : > { %vm1322_vm3 = vcmp.gt.s32.totalorder %v1321_v38, 0  ;;  %v1360_v17 = vand.u32 65535, %v5141_v2  ;;  %v1361_v19 = vshrl.u32 %v5141_v2, 16 }
  0xc6   : > { %v1323_v39 = vsel %vm1322_vm3, %v1321_v38, 0 }
  0xc7   : > { %v1325_v41 = vand.u32 31, %v1323_v39  ;;  %v5126_v43 = vshrl.u32 %v1323_v39, 5 }
  0xc9   : > { %v5124_v42 = vsub.s32 32, %v1325_v41  ;;  %v1328_v46 = vshll.u32 %v4780_v45, %v1325_v41  ;;  %v1331_v48 = vshll.u32 %v4781_v47, %v1325_v41  ;;  %v1334_v52 = vshll.u32 %v4782_v50, %v1325_v41 }
  0xca   : > { %v1337_v55 = vshll.u32 %v4783_v53, %v1325_v41  ;;  %v1340_v58 = vshll.u32 %v4784_v56, %v1325_v41  ;;  %vm1343_vm4 = vcmp.lt.s32.totalorder %v5126_v43, 1  ;;  %vm1346_vm5 = vcmp.lt.s32.totalorder %v5126_v43, 4 }
  0xcb   : > { %v1329_v49 = vshrl.u32 %v4781_v47, %v5124_v42  ;;  %v1332_v51 = vshrl.u32 %v4782_v50, %v5124_v42  ;;  %v1335_v54 = vshrl.u32 %v4783_v53, %v5124_v42  ;;  %v1338_v57 = vshrl.u32 %v4784_v56, %v5124_v42  ;;  %v1628_v56 = vld [vmem:[%s6255_s28 + $0x40] sm:$0xff] }
  0xcc   : > { %v1341_v60 = vshrl.u32 %v4785_v59, %v5124_v42  ;;  %vm1345_vm6 = vcmp.lt.s32.totalorder %v5126_v43, 3  ;;  %vm1344_vm7 = vcmp.lt.s32.totalorder %v5126_v43, 2  ;;  %v1327_v59 = vshrl.u32 %v4780_v45, %v5124_v42  ;;  %v1642_v45 = vld [vmem:[%s6255_s28 + $0xb0] sm:$0xff] }
  0xcd   : > { %v5134_v61 = vor.u32 %v1329_v49, %v1328_v46  ;;  %v5136_v62 = vor.u32 %v1332_v51, %v1331_v48  ;;  %v5138_v63 = vor.u32 %v1335_v54, %v1334_v52  ;;  %v1339_v0 = vor.u32 %v1338_v57, %v1337_v55  ;;  %v1645_v48 = vld [vmem:[%s6255_s28 + $0xc8] sm:$0xff]  ;;  %v1644_v55 = vld [vmem:[%s6255_s28 + $0xc0] sm:$0xff] }
  0xce   : > { %v1342_v1 = vor.u32 %v1341_v60, %v1340_v58  ;;  %v1629_v49 = vld [vmem:[%s6255_s28 + $0x48] sm:$0xff]  ;;  %1658 = vmatpush.msra.mxu3 %v1645_v48 }
  0xcf   : > { %v1351_v4 = vsel %vm1343_vm4, %v5134_v61, %v5136_v62  ;;  %v1352_v8 = vsel %vm1346_vm5, %v1339_v0, 920167782  ;;  %v1355_v9 = vsel %vm1343_vm4, %v5136_v62, %v5138_v63  ;;  %v1348_v52 = vsel %vm1346_vm5, %v5138_v63, 2102212464  ;;  %1678 = vmatpush.msrb.mxu2 %v1629_v49 }
  0xd0   : > { %v1353_v11 = vsel %vm1345_vm6, %v5138_v63, %v1352_v8  ;;  %v1356_v12 = vsel %vm1346_vm5, %v1342_v1, 1326507024  ;;  %v1627_v1 = vld [vmem:[%s6255_s28 + $0x38] sm:$0xff]  ;;  %1659 = vmatpush.msra.mxu3 %v1644_v55  ;;  %v1347_v42 = vsel %vm1343_vm4, %v1327_v59, %v5134_v61  ;;  %v1641_v61 = vld [vmem:[%s6255_s28 + $0xa8] sm:$0xff] }
  0xd1   : > { %v1354_v15 = vsel %vm1344_vm7, %v1351_v4, %v1353_v11  ;;  %v1357_v16 = vsel %vm1345_vm6, %v1339_v0, %v1356_v12  ;;  %v1643_v0 = vld [vmem:[%s6255_s28 + $0xb8] sm:$0xff]  ;;  %1679 = vmatpush.msrb.mxu2 %v1628_v56 }
  0xd2   : > { %v1358_v18 = vsel %vm1344_vm7, %v1355_v9, %v1357_v16  ;;  %v1384_v20 = vand.u32 65535, %v1354_v15  ;;  %v1385_v21 = vshrl.u32 %v1354_v15, 16  ;;  %v1626_v9 = vld [vmem:[%s6255_s28 + $0x30] sm:$0xff]  ;;  %1660 = vmatpush.msra.mxu3 %v1643_v0 }
  0xd3   : > { %v1362_v24 = vand.u32 65535, %v1358_v18  ;;  %v1363_v25 = vshrl.u32 %v1358_v18, 16  ;;  %1680 = vmatpush.msrb.mxu2 %v1627_v1  ;;  %v1640_v18 = vld [vmem:[%s6255_s28 + $0xa0] sm:$0xff] }
  0xd4   : > { %v1387_v26 = vmul.u32 %v1385_v21, %v1360_v17  ;;  %v5193_v27 = vmul.u32 %v1384_v20, %v1361_v19  ;;  %v1386_v40 = vmul.u32 %v1384_v20, %v1360_v17  ;;  %v1389_v46 = vmul.u32 %v1385_v21, %v1361_v19  ;;  %1661 = vmatpush.msra.mxu3 %v1642_v45  ;;  %v1639_v21 = vld [vmem:[%s6255_s28 + $0x98] sm:$0xff] }
  0xd5   : > { %v1365_v31 = vmul.u32 %v1363_v25, %v1360_v17  ;;  %v1366_v32 = vmul.u32 %v1362_v24, %v1361_v19  ;;  %v1364_v38 = vmul.u32 %v1362_v24, %v1360_v17  ;;  %v1367_v41 = vmul.u32 %v1363_v25, %v1361_v19  ;;  %1681 = vmatpush.msrb.mxu2 %v1626_v9  ;;  %v1624_v19 = vld [vmem:[%s6255_s28 + $0x20] sm:$0xff]  ;;  %v1638_v25 = vld [vmem:[%s6255_s28 + $0x90] sm:$0xff] }
  0xd6   : > { %v1390_v34 = vshll.u32 %v1387_v26, 16  ;;  %v1392_v47 = vshll.u32 %v5193_v27, 16  ;;  %v1391_v6 = vshrl.u32 %v1387_v26, 16  ;;  %v1393_v12 = vshrl.u32 %v5193_v27, 16  ;;  %1662 = vmatpush.msra.mxu3 %v1641_v61  ;;  %v1637_v27 = vld [vmem:[%s6255_s28 + $0x88] sm:$0xff] }
  0xd7   : > { %v1368_v39 = vshll.u32 %v1365_v31, 16  ;;  %v1370_v44 = vshll.u32 %v1366_v32, 16  ;;  %v1369_v4 = vshrl.u32 %v1365_v31, 16  ;;  %v1371_v10 = vshrl.u32 %v1366_v32, 16  ;;  %v1636_v31 = vld [vmem:[%s6255_s28 + $0x80] sm:$0xff] }
  0xd8   : > { %vm1394_vm9 = vc.u32 %v1386_v40, %v1390_v34  ;;  %v1396_v51 = vadd.s32 %v1390_v34, %v1386_v40  ;;  %1663 = vmatpush.msra.mxu3 %v1640_v18  ;;  %v1620_v32 = vld [vmem:[%s6255_s28] sm:$0xff] }
  0xd9   : > { %v5195_v28 = vpop.f32.mrf.mxu2  ;;  %vm1372_vm8 = vc.u32 %v1364_v38, %v1368_v39  ;;  %v1374_v50 = vadd.s32 %v1368_v39, %v1364_v38  ;;  %v1395_v54 = vsel %vm1394_vm9, 1, %v4779_v3 }
  0xda   : > { %v1373_v53 = vsel %vm1372_vm8, 1, %v4779_v3  ;;  %v1397_v58 = vadd.s32 %v1395_v54, %v1389_v46  ;;  %vm1398_vm11 = vc.u32 %v1396_v51, %v1392_v47  ;;  %v1400_v16 = vadd.s32 %v1396_v51, %v1392_v47  ;;  %1664 = vmatpush.msra.mxu3 %v1639_v21 }
  0xdb   : > { %v1375_v57 = vadd.s32 %v1373_v53, %v1367_v41  ;;  %vm1376_vm10 = vc.u32 %v1374_v50, %v1370_v44  ;;  %v1399_v63 = vsel %vm1398_vm11, 1, %v4779_v3 }
  0xdc   : > { %v1377_v60 = vsel %vm1376_vm10, 1, %v4779_v3  ;;  %v1401_v7 = vadd.s32 %v1399_v63, %v1397_v58  ;;  %v1349_v3 = vsel %vm1345_vm6, %v5136_v62, %v1348_v52  ;;  %v1625_v62 = vld [vmem:[%s6255_s28 + $0x28] sm:$0xff]  ;;  %1665 = vmatpush.msra.mxu3 %v1638_v25  ;;  %v1726_v25 = vld [vmem:[%s6256_s20 + $0x60] sm:$0xff] }
  0xdd   : > { %v1379_v5 = vadd.s32 %v1377_v60, %v1375_v57  ;;  %v1350_v14 = vsel %vm1344_vm7, %v1347_v42, %v1349_v3  ;;  %1682 = vmatpush.msrb.mxu2 %v1625_v62  ;;  %vm1454_vm7 = vweird.f32 %v5118_v33 }
  0xde   : > { %v1402_v13 = vadd.s32 %v1401_v7, %v1391_v6  ;;  %v1404_v43 = vmul.u32 %v5141_v2, %v1350_v14  ;;  %v1622_v2 = vld [vmem:[%s6255_s28 + $0x10] sm:$0xff]  ;;  %1666 = vmatpush.msra.mxu3 %v1637_v27  ;;  %v1723_v27 = vld [vmem:[%s6256_s20 + $0x48] sm:$0xff] }
  0xdf   : > { %v1380_v11 = vadd.s32 %v1379_v5, %v1369_v4  ;;  %1683 = vmatpush.msrb.mxu2 %v1624_v19 }
  0xe0   : > { %v1403_v17 = vadd.s32 %v1402_v13, %v1393_v12  ;;  %1667 = vmatpush.msra.mxu3 %v1636_v31  ;;  %v1720_v31 = vld [vmem:[%s6256_s20 + $0x30] sm:$0xff] }
  0xe1   : > { %v1291_v8 = vpop.f32.mrf.mxu2  ;;  %v1381_v15 = vadd.s32 %v1380_v11, %v1371_v10  ;;  %1684 = vmatpush.msrb.mxu2 %v1623_v22 }
  0xe2   : > { %v1407_v20 = vadd.s32 1, %v1403_v17 }
  0xe3   : > { %vm1406_vm12 = vc.u32 %v1381_v15, %v1400_v16  ;;  %1685 = vmatpush.msrb.mxu2 %v1622_v2  ;;  %v1405_v44 = vadd.s32 %v1400_v16, %v1381_v15  ;;  %v1725_v2 = vld [vmem:[%s6256_s20 + $0x58] sm:$0xff] }
  0xe4   : > { %v1408_v23 = vsel %vm1406_vm12, %v1407_v20, %v1403_v17 }
  0xe5   : > { %v1409_v24 = vadd.s32 %v1408_v23, %v1404_v43  ;;  %1686 = vmatpush.msrb.mxu2 %v1621_v29  ;;  %v1729_v23 = vld [vmem:[%s6256_s20 + $0x78] sm:$0xff]  ;;  %v1722_v29 = vld [vmem:[%s6256_s20 + $0x40] sm:$0xff] }
  0xe6   : > { %1731 = vmatpush.msrb.mxu1 %v1729_v23 }
  0xe7   : > { %v1410_v26 = vadd.s32 536870912, %v1409_v24  ;;  %1687 = vmatpush.msrb.mxu2 %v1620_v32  ;;  %v1719_v32 = vld [vmem:[%s6256_s20 + $0x28] sm:$0xff] }
  0xe9   : > { %v1411_v30 = vshrl.u32 %v1410_v26, 30  ;;  %v1724_v26 = vld [vmem:[%s6256_s20 + $0x50] sm:$0xff] }
  0xeb   : > { %v1412_v34 = vshll.u32 %v1411_v30, 30  ;;  %v1435_v59 = vsub.s32 4, %v1411_v30 }
  0xed   : > { %v1413_v35 = vsub.s32 %v1409_v24, %v1412_v34  ;;  %v1436_v4 = vsel %vm1313_vm15, %v1435_v59, %v1411_v30  ;;  %v1728_v24 = vld [vmem:[%s6256_s20 + $0x70] sm:$0xff]  ;;  %v1721_v30 = vld [vmem:[%s6256_s20 + $0x38] sm:$0xff]  ;;  %v1718_v34 = vld [vmem:[%s6256_s20 + $0x20] sm:$0xff] }
  0xee   : > { %v1438_v7 = vsel %vm1312_vm0, 0, %v1436_v4  ;;  %1732 = vmatpush.msrb.mxu1 %v1728_v24  ;;  %v4640_v4 = vld [vmem:[%s6258_s10] ss:$0 sm:$0xff] }
  0xef   : > { %vm1414_vm13 = vcmp.lt.s32.totalorder %v1413_v35, 0  ;;  %v1415_v36 = vsub.s32 0, %v1413_v35  ;;  %v1455_v9 = vadd.s32 3, %v1438_v7  ;;  %v1610_v13 = vand.u32 3, %v1438_v7 }
  0xf1   : > { %v1416_v38 = vsel %vm1414_vm13, %v1415_v36, %v1413_v35  ;;  %v1456_v61 = vand.u32 3, %v1455_v9  ;;  %vm1611_vm1 = vcmp.lt.s32.totalorder %v1610_v13, 2  ;;  %vm1612_vm2 = vcmp.eq.s32.totalorder %v1610_v13, 0  ;;  %v1716_v36 = vld [vmem:[%s6256_s20 + $0x10] sm:$0xff] }
  0xf2   : > { %v1417_v39 = vclz %v1416_v38  ;;  %vm1615_vm3 = vcmp.eq.s32.totalorder %v1610_v13, 2  ;;  %v1715_v38 = vld [vmem:[%s6256_s20 + $0x8] sm:$0xff] }
  0xf3   : > { %vm1457_vm4 = vcmp.lt.s32.totalorder %v1456_v61, 2  ;;  %vm1458_vm5 = vcmp.eq.s32.totalorder %v1456_v61, 0  ;;  %vm1461_vm6 = vcmp.eq.s32.totalorder %v1456_v61, 2 }
  0xf4   : > { %v3966_v40 = vadd.s32 4294967294, %v1417_v39 }
  0xf6   : > { %vm3967_vm14 = vcmp.lt.s32.totalorder %v3966_v40, 0 }
  0xf7   : > { %v1420_v41 = vsel %vm3967_vm14, 0, %v3966_v40 }
  0xf8   : > { %v1421_v46 = vsub.s32 32, %v1420_v41  ;;  %v1425_v47 = vsub.s32 4294967266, %v1420_v41  ;;  %v1422_v48 = vshll.u32 %v1413_v35, %v1420_v41  ;;  %v1717_v35 = vld [vmem:[%s6256_s20 + $0x18] sm:$0xff]  ;;  %v1692_v41 = vld [vmem:[%s6257_s18] sm:$0x1]  ;;  %s6261_s18 = sld [smem:[#allocation22_spill]] }
  0xfa   : > { %v1423_v49 = vshrl.u32 %v1405_v44, %v1421_v46  ;;  %v1426_v50 = vadd.s32 127, %v1425_v47  ;;  %v1714_v44 = vld [vmem:[%s6256_s20] sm:$0xff] }
  0xfc   : > { %v1424_v51 = vor.u32 %v1423_v49, %v1422_v48  ;;  %v1427_v52 = vshll.u32 %v1426_v50, 23 }
  0xfe   : > { %v1428_v53 = vor.u32 4788187, %v1427_v52  ;;  %v1431_v55 = vcvt.s32.f32 %v1424_v51  ;;  %v1730_v61 = vld [vmem:[%s6261_s18] sm:$0x1] }
 0x100   : > { %v1429_v54 = vand.u32 2147483647, %v1428_v53 }
 0x102   : > { %v1432_v56 = vmul.f32 %v1431_v55, %v1429_v54 }
 0x104   : > { %v1433_v57 = vxor.u32 2147483648, %v1432_v56 }
 0x106   : > { %v1434_v58 = vsel %vm1313_vm15, %v1433_v57, %v1432_v56 }
 0x107   : > { %v1437_v60 = vsel %vm1312_vm0, %v5118_v33, %v1434_v58  ;;  %v1727_v33 = vld [vmem:[%s6256_s20 + $0x68] sm:$0xff] }
 0x108   : > { %v1439_v63 = vmul.f32 %v1437_v60, %v1437_v60  ;;  %1733 = vmatpush.msrb.mxu1 %v1727_v33 }
 0x10a   : > { %v1440_v0 = vmul.f32 -0.001358992, %v1439_v63  ;;  %v1447_v1 = vmul.f32 -0.00019511016, %v1439_v63  ;;  %1734 = vmatpush.msrb.mxu1 %v1726_v25 }
 0x10c   : > { %v1441_v5 = vadd.f32 0.041655596, %v1440_v0  ;;  %v1448_v6 = vadd.f32 0.008332121, %v1447_v1  ;;  %1735 = vmatpush.msrb.mxu1 %v1725_v2  ;;  %v1230_v0 = vpop.f32.mrf.mxu0  ;;  %v1244_v1 = vpop.f32.mrf.mxu1 }
 0x10d   : > { %v1231_v7 = vadd.f32 %v4640_v4, %v1230_v0 }
 0x10e   : > { %v1442_v8 = vmul.f32 %v1441_v5, %v1439_v63  ;;  %v1449_v42 = vmul.f32 %v1448_v6, %v1439_v63  ;;  %1736 = vmatpush.msrb.mxu1 %v1724_v26  ;;  %v1256_v6 = vld [vmem:[%s6259_s13] sm:$0x1] }
 0x110   : > { %v1443_v3 = vadd.f32 -0.4999988, %v1442_v8  ;;  %v1450_v45 = vadd.f32 -0.16666654, %v1449_v42  ;;  %1737 = vmatpush.msrb.mxu1 %v1723_v27  ;;  %v1297_v42 = vpop.permute.xlu0 %1296 }
 0x111   : > { %v1299_v9 = vperm.slane %v1297_v42, 0 }
 0x112   : > { %v1444_v10 = vmul.f32 %v1443_v3, %v1439_v63  ;;  %v1451_v11 = vmul.f32 %v1450_v45, %v1439_v63  ;;  %1738 = vmatpush.msrb.mxu1 %v1722_v29  ;;  %v1290_v45 = vadd.f32 %v5195_v28, %v1256_v6 }
 0x114   : > { %v1445_v12 = vadd.f32 1.0, %v1444_v10  ;;  %v1452_v37 = vadd.f32 1.0, %v1451_v11  ;;  %1739 = vmatpush.msrb.mxu1 %v1721_v30  ;;  %v1232_v5 = vpop.f32.mrf.mxu0  ;;  %v1246_v3 = vpop.f32.mrf.mxu1  ;;  %v1245_v10 = vadd.f32 %v1244_v1, %v1231_v7  ;;  %v1300_v13 = vmul.f32 %v1299_v9, %v1290_v45 }
 0x115   : > { %v1233_v8 = vadd.f32 %v4640_v4, %v1232_v5 }
 0x116   : > { %v1453_v62 = vmul.f32 %v1452_v37, %v1437_v60  ;;  %v1462_v14 = vxor.u32 2147483648, %v1445_v12  ;;  %1740 = vmatpush.msrb.mxu1 %v1720_v31  ;;  %v1752_v37 = vld [vmem:[%s6260_s15 + $0x8] sm:$0xff]  ;;  %v1755_v28 = vperm.slane %v1300_v13, 0 }
 0x117   : > { %v1247_v11 = vadd.f32 %v1246_v3, %v1233_v8 }
 0x118   : > { %v1459_v15 = vxor.u32 2147483648, %v1453_v62  ;;  %v1617_v17 = vsel %vm1615_vm3, %v1462_v14, %v1453_v62  ;;  %v1463_v19 = vsel %vm1461_vm6, %v1462_v14, %v1453_v62  ;;  %1741 = vmatpush.msrb.mxu1 %v1719_v32 }
 0x119   : > { %v1754_v14 = vadd.f32 %v1752_v37, %v1247_v11 }
 0x11a   : > { %v1614_v16 = vsel %vm1612_vm2, %v1445_v12, %v1459_v15  ;;  %v1460_v18 = vsel %vm1458_vm5, %v1445_v12, %v1459_v15  ;;  %1742 = vmatpush.msrb.mxu1 %v1718_v34  ;;  %v1751_v12 = vld [vmem:[%s6260_s15] sm:$0xff] }
 0x11b   : > { %v1618_v20 = vsel %vm1611_vm1, %v1614_v16, %v1617_v17  ;;  %v1464_v43 = vsel %vm1457_vm4, %v1460_v18, %v1463_v19  ;;  %v1753_v62 = vadd.f32 %v1751_v12, %v1245_v10  ;;  %v1757_v18 = vadd.f32 %v1755_v28, %v1754_v14 }
 0x11c   : > { %v1619_v21 = vsel %vm1454_vm7, nan, %v1618_v20  ;;  %v1465_v22 = vsel %vm1454_vm7, nan, %v1464_v43  ;;  %1743 = vmatpush.msrb.mxu1 %v1717_v35 }
 0x11d   : > { %1668 = vmatmul.f32.vlgmr.msra.gmra.mxu3 %v1619_v21  ;;  %1688 = vmatmul.f32.vlgmr.msrb.gmra.mxu2 %v1465_v22  ;;  %v1756_v17 = vadd.f32 %v1755_v28, %v1753_v62 }
 0x11e   : > { %1744 = vmatpush.msrb.mxu1 %v1716_v36 }
 0x120   : > { %1745 = vmatpush.msrb.mxu1 %v1715_v38 }
 0x122   : > { %1746 = vmatpush.msrb.mxu1 %v1714_v44 }
 0x1a0   : > { %v1669_v39 = vpop.f32.mrf.mxu3  ;;  %v1689_v40 = vpop.f32.mrf.mxu2 }
 0x1a1   : > { %v1690_v46 = vadd.f32 %v1689_v40, %v1669_v39 }
 0x1a3   : > { %v1693_v47 = vadd.f32 %v1692_v41, %v1690_v46 }
 0x1a5   : > { %v3971_v48 = vmul.f32 -1.442695, %v1693_v47 }
 0x1a7   : > { %4641 = vpow2.f32 %v3971_v48 }
 0x1ad   : > { %v4642_v49 = vpop.eup %4641 }
 0x1ae   : > { %v1697_v50 = vadd.f32 1.0, %v4642_v49 }
 0x1b0   : > { %4643 = vrcp.f32 %v1697_v50  ;;  %v1709_v54 = vand.u32 2147483648, %v1697_v50  ;;  %v1707_v56 = vand.u32 2147483647, %v1697_v50  ;;  %vm1703_vm9 = vweird.f32 %v1697_v50 }
 0x1b2   : > { %v1710_v58 = vor.u32 1.1754944e-38, %v1709_v54  ;;  %vm1708_vm11 = vcmp.eq.f32.partialorder %v1707_v56, 8.507059e+37 }
 0x1b6   : > { %v4644_v51 = vpop.eup %4643 }
 0x1b7   : > { %v1699_v52 = vmul.f32 %v4644_v51, %v1697_v50  ;;  %vm1704_vm8 = vweird.f32 %v4644_v51 }
 0x1b8   : > { %vm1705_vm10 = vmor %vm1703_vm9, %vm1704_vm8 }
 0x1b9   : > { %v1700_v53 = vsub.f32 1.0, %v1699_v52 }
 0x1bb   : > { %v1701_v55 = vmul.f32 %v4644_v51, %v1700_v53 }
 0x1bd   : > { %v1702_v57 = vadd.f32 %v4644_v51, %v1701_v55 }
 0x1bf   : > { %v1706_v59 = vsel %vm1705_vm10, %v4644_v51, %v1702_v57 }
 0x1c0   : > { %v1711_v60 = vsel %vm1708_vm11, %v1710_v58, %v1706_v59 }
 0x1c1   : > { %v1713_v63 = vmul.f32 %v1711_v60, %v1693_v47 }
 0x1c3   : > { %1747 = vmatmul.f32.vlgmr.msrb.gmra.mxu1 %v1713_v63 }
 0x240   : > { %v1748_v15 = vpop.f32.mrf.mxu1 }
 0x241   : > { %v1749_v16 = vadd.f32 %v1748_v15, %v1730_v61 }
 0x243   : > { %v1758_v19 = vperm.slane %v1749_v16, 0 }
 0x245   : > { %v1759_v20 = vadd.f32 %v1758_v19, %v1756_v17  ;;  %v1760_v43 = vadd.f32 %v1758_v19, %v1757_v18 }
 0x247   : > { %1761 = vst [vmem:[#allocation2] sm:$0xff] %v1759_v20 }
 0x248   : > { %1762 = vst [vmem:[#allocation2 + $0x8] sm:$0xff] %v1760_v43 }
 0x249 PF: > { %v4495_v21 = vld [vmem:[%s5006_s6 + $0xac] sm:$0xf]  ;;  %v4060_v22 = vld [vmem:[%s5006_s6 + $0xb4] sm:$0xf0]  ;;  %v4492_v23 = vld [vmem:[%s5006_s6 + $0x94] sm:$0xf]  ;;  %s6262_s24 = scalar_lea.vmem %s6172_s17, %s4993_s11 }
 0x24a   : > { %v4063_v24 = vor.u32 %v4495_v21, %v4060_v22  ;;  %v4048_v33 = vld [vmem:[%s5006_s6 + $0x9c] sm:$0xf0]  ;;  %v4058_v25 = vld [vmem:[%s5006_s6 + $0xa8] sm:$0xf]  ;;  %v4496_v2 = vld [vmem:[%s5006_s6 + $0xb0] sm:$0xf0] }
 0x24b   : > { %v4059_v26 = vor.u32 %v4496_v2, %v4058_v25  ;;  %v4046_v27 = vld [vmem:[%s5006_s6 + $0x90] sm:$0xf]  ;;  %v4051_v29 = vor.u32 %v4492_v23, %v4048_v33  ;;  %v4493_v30 = vld [vmem:[%s5006_s6 + $0x98] sm:$0xf0]  ;;  %v4036_v32 = vld [vmem:[%s5006_s6 + $0x84] sm:$0xf0] }
 0x24c   : > { %1948 = vmatpush.bf16.msra.mxu1 %v4063_v24  ;;  %v4489_v31 = vld [vmem:[%s5006_s6 + $0x7c] sm:$0xf]  ;;  %v4047_v34 = vor.u32 %v4493_v30, %v4046_v27  ;;  %v4034_v35 = vld [vmem:[%s5006_s6 + $0x78] sm:$0xf]  ;;  %v4490_v36 = vld [vmem:[%s5006_s6 + $0x80] sm:$0xf0] }
 0x24d   : > { %1934 = vmatpush.bf16.msra.mxu0 %v4059_v26  ;;  %v4039_v38 = vor.u32 %v4489_v31, %v4036_v32  ;;  %v4486_v39 = vld [vmem:[%s5006_s6 + $0x64] sm:$0xf]  ;;  %v4024_v40 = vld [vmem:[%s5006_s6 + $0x6c] sm:$0xf0]  ;;  %v4035_v41 = vor.u32 %v4490_v36, %v4034_v35  ;;  %v4022_v44 = vld [vmem:[%s5006_s6 + $0x60] sm:$0xf] }
 0x24e   : > { %v4487_v46 = vld [vmem:[%s5006_s6 + $0x68] sm:$0xf0]  ;;  %v4027_v47 = vor.u32 %v4486_v39, %v4024_v40  ;;  %v4066_v49 = vld [vmem:[%s5006_s6 + $0xb0] sm:$0xf]  ;;  %v4497_v50 = vld [vmem:[%s5006_s6 + $0xb8] sm:$0xf0] }
 0x24f   : > { %v4483_v48 = vld [vmem:[%s5006_s6 + $0x4c] sm:$0xf]  ;;  %v4012_v51 = vld [vmem:[%s5006_s6 + $0x54] sm:$0xf0]  ;;  %v4023_v52 = vor.u32 %v4487_v46, %v4022_v44  ;;  %v4067_v53 = vor.u32 %v4497_v50, %v4066_v49  ;;  %v4494_v55 = vld [vmem:[%s5006_s6 + $0xa0] sm:$0xf0] }
 0x250   : > { %1949 = vmatpush.bf16.msra.mxu1 %v4051_v29  ;;  %v4054_v54 = vld [vmem:[%s5006_s6 + $0x98] sm:$0xf]  ;;  %v4010_v56 = vld [vmem:[%s5006_s6 + $0x48] sm:$0xf]  ;;  %v4484_v57 = vld [vmem:[%s5006_s6 + $0x50] sm:$0xf0]  ;;  %v4015_v59 = vor.u32 %v4483_v48, %v4012_v51 }
 0x251   : > { %1935 = vmatpush.bf16.msra.mxu0 %v4047_v34  ;;  %1962 = vmatpush.bf16.msra.mxu2 %v4067_v53  ;;  %v4055_v58 = vor.u32 %v4494_v55, %v4054_v54  ;;  %v4042_v60 = vld [vmem:[%s5006_s6 + $0x80] sm:$0xf]  ;;  %v4491_v63 = vld [vmem:[%s5006_s6 + $0x88] sm:$0xf0]  ;;  %v4480_v0 = vld [vmem:[%s5006_s6 + $0x34] sm:$0xf]  ;;  %v4011_v4 = vor.u32 %v4484_v57, %v4010_v56 }
 0x252   : > { %v4000_v1 = vld [vmem:[%s5006_s6 + $0x3c] sm:$0xf0]  ;;  %v3998_v5 = vld [vmem:[%s5006_s6 + $0x30] sm:$0xf]  ;;  %v4481_v6 = vld [vmem:[%s5006_s6 + $0x38] sm:$0xf0]  ;;  %v4043_v7 = vor.u32 %v4491_v63, %v4042_v60 }
 0x253   : > { %v4003_v8 = vor.u32 %v4480_v0, %v4000_v1  ;;  %v4030_v42 = vld [vmem:[%s5006_s6 + $0x68] sm:$0xf]  ;;  %v4488_v3 = vld [vmem:[%s5006_s6 + $0x70] sm:$0xf0]  ;;  %v4477_v45 = vld [vmem:[%s5006_s6 + $0x1c] sm:$0xf]  ;;  %v3999_v10 = vor.u32 %v4481_v6, %v3998_v5 }
 0x254   : > { %1950 = vmatpush.bf16.msra.mxu1 %v4039_v38  ;;  %v3988_v9 = vld [vmem:[%s5006_s6 + $0x24] sm:$0xf0]  ;;  %v3986_v11 = vld [vmem:[%s5006_s6 + $0x18] sm:$0xf]  ;;  %v4478_v12 = vld [vmem:[%s5006_s6 + $0x20] sm:$0xf0]  ;;  %v4031_v37 = vor.u32 %v4488_v3, %v4030_v42 }
 0x255   : > { %1936 = vmatpush.bf16.msra.mxu0 %v4035_v41  ;;  %1963 = vmatpush.bf16.msra.mxu2 %v4055_v58  ;;  %v3991_v13 = vor.u32 %v4477_v45, %v3988_v9  ;;  %v4018_v61 = vld [vmem:[%s5006_s6 + $0x50] sm:$0xf]  ;;  %v4485_v62 = vld [vmem:[%s5006_s6 + $0x58] sm:$0xf0]  ;;  %v4474_v14 = vld [vmem:[%s5006_s6 + $0x4] sm:$0xf]  ;;  %v3987_v28 = vor.u32 %v4478_v12, %v3986_v11 }
 0x256   : > { %v3976_v15 = vld [vmem:[%s5006_s6 + $0xc] sm:$0xf0]  ;;  %v3974_v16 = vld [vmem:[%s5006_s6] sm:$0xf]  ;;  %v4475_v17 = vld [vmem:[%s5006_s6 + $0x8] sm:$0xf0]  ;;  %v4019_v19 = vor.u32 %v4485_v62, %v4018_v61 }
 0x257   : > { %v5403_v18 = vld [vmem:[#allocation2] sm:$0xff]  ;;  %v3979_v20 = vor.u32 %v4474_v14, %v3976_v15  ;;  %v5405_v43 = vld [vmem:[#allocation2 + $0x8] sm:$0xff]  ;;  %v4006_v21 = vld [vmem:[%s5006_s6 + $0x38] sm:$0xf]  ;;  %v3975_v23 = vor.u32 %v4475_v17, %v3974_v16  ;;  %vm1976_vm12 = vcmask 261120   ;;  %s4786_s19 = smov 64  }
 0x258   : > { %1951 = vmatpush.bf16.msra.mxu1 %v4027_v47  ;;  %v4482_v22 = vld [vmem:[%s5006_s6 + $0x40] sm:$0xf0]  ;;  %v1765_v24 = vpack.c.bf16 %v5405_v43, %v5403_v18  ;;  %v3994_v25 = vld [vmem:[%s5006_s6 + $0x20] sm:$0xf]  ;;  %v4479_v2 = vld [vmem:[%s5006_s6 + $0x28] sm:$0xf0] }
 0x259   : > { %1937 = vmatpush.bf16.msra.mxu0 %v4023_v52  ;;  %1964 = vmatpush.bf16.msra.mxu2 %v4043_v7  ;;  %v4007_v33 = vor.u32 %v4482_v22, %v4006_v21  ;;  %v3995_v26 = vor.u32 %v4479_v2, %v3994_v25  ;;  %v3982_v27 = vld [vmem:[%s5006_s6 + $0x8] sm:$0xf]  ;;  %v4476_v29 = vld [vmem:[%s5006_s6 + $0x10] sm:$0xf0]  ;;  %v1798_v32 = vld [vmem:[%s5015_s4] sm:$0x7] }
 0x25a   : > { %v3983_v30 = vor.u32 %v4476_v29, %v3982_v27  ;;  %v1801_v34 = vperm.slane %v1798_v32, 1  ;;  %v1800_v38 = vperm.slane %v1798_v32, 0  ;;  %s4787_s21 = smov 96   ;;  %v1802_v48 = vperm.slane %v1798_v32, 2  ;;  %s4788_s6 = smov 32  }
 0x25b   : > { %vm2014_vm13 = vcmask 130048   ;;  %vm2388_vm14 = vcmask 523264   ;;  %vm2391_vm15 = vcmask 785408   ;;  %s6263_s27 = sld [smem:[#allocation9_spill]]  ;;  %p4388_p9 = scmp.ne.s32.totalorder %s4761_s8, 1 }
 0x25c   : > { %1952 = vmatpush.bf16.msra.mxu1 %v4015_v59  ;;  %s6264_s22 = sld [smem:[#allocation27_spill]] }
 0x25d   : > { %1938 = vmatpush.bf16.msra.mxu0 %v4011_v4  ;;  %1965 = vmatpush.bf16.msra.mxu2 %v4031_v37  ;;  %s6266_s30 = sld [smem:[#allocation28_spill]] }
 0x25e   : > { %s6285_s12 = sld [smem:[#allocation8_spill]] (!%p4388_p9) }
 0x25f   : > { %s6286_s18 = sld [smem:[#allocation36_spill]] (!%p4388_p9) }
 0x260   : > { %1953 = vmatpush.bf16.msra.mxu1 %v4003_v8 }
 0x261   : > { %1939 = vmatpush.bf16.msra.mxu0 %v3999_v10  ;;  %1966 = vmatpush.bf16.msra.mxu2 %v4019_v19 }
 0x262   : > { %s6265_s13 = scalar_lea.vmem %s6264_s22, %s4993_s11 }
 0x263   : > { %s6267_s29 = scalar_lea.vmem %s6266_s30, %s4993_s11 }
 0x264   : > { %1954 = vmatpush.bf16.msra.mxu1 %v3991_v13 }
 0x265   : > { %1940 = vmatpush.bf16.msra.mxu0 %v3987_v28  ;;  %1967 = vmatpush.bf16.msra.mxu2 %v4007_v33 }
 0x268   : > { %1955 = vmatpush.bf16.msra.mxu1 %v3979_v20 }
 0x269   : > { %1941 = vmatpush.bf16.msra.mxu0 %v3975_v23  ;;  %1968 = vmatpush.bf16.msra.mxu2 %v3995_v26 }
 0x26b   : > { %1956 = vmatmul.bf16.vlgmr.msra.gmra.mxu1 %v1765_v24 }
 0x26c   : > { %1942 = vmatmul.bf16.vlgmr.msra.gmra.mxu0 %v1765_v24 }
 0x26d   : > { %1969 = vmatpush.bf16.msra.mxu2 %v3983_v30 }
 0x270   : > { %1970 = vmatmul.bf16.vlgmr.msra.gmra.mxu2 %v1765_v24 }
 0x2e8   : > { %v1957_v31 = vpop.f32.mrf.mxu1 }
 0x2e9   : > { %v1943_v39 = vpop.f32.mrf.mxu0  ;;  %v1958_v40 = vadd.f32 %v1957_v31, %v1801_v34 }
 0x2ea   : > { %v5419_v41 = vadd.f32 %v1943_v39, %v1800_v38 }
 0x2f0   : > { %v1959_v35 = vpop.f32.mrf.mxu1 }
 0x2f1   : > { %v1960_v36 = vadd.f32 %v1959_v35, %v1801_v34  ;;  %v1945_v44 = vpop.f32.mrf.mxu0 }
 0x2f2   : > { %v1946_v46 = vadd.f32 %v1945_v44, %v1800_v38 }
 0x2f3   : > { %2172 = vrot.lane.b32.xlu1 %v1960_v36, %s4786_s19  ;;  %2072 = vrot.lane.b32.xlu2 %v1960_v36, %s4787_s21  ;;  %v1971_v47 = vpop.f32.mrf.mxu2 }
 0x2f4   : > { %4068 = vmatpush.xpose.msk.msra.mxu3 %vm1976_vm12, %v1960_v36  ;;  %v5428_v50 = vadd.f32 %v1971_v47, %v1802_v48 }
 0x2f8   : > { %4069 = vmatpush.xpose.msk.msra.mxu3 %vm1976_vm12, %v1958_v40 }
 0x2fb   : > { %4070 = vmatmul.msk.f32.vlgmr.msra.gmra.mxu3 %vm1976_vm12, %v5419_v41  ;;  %2070 = vrot.lane.b32.xlu2 %v1958_v40, %s4787_s21  ;;  %v1973_v49 = vpop.f32.mrf.mxu2 }
 0x2fc   : > { %v5430_v51 = vadd.f32 %v1973_v49, %v1802_v48 }
 0x2fe   : > { %2057 = vmatpush.msrb.mxu3 %v5430_v51  ;;  %v4645_v49 = vpack.i.bf16 %v5428_v50, %v5430_v51 }
 0x300   : > { %2058 = vmatpush.msrb.mxu3 %v5428_v50 }
 0x303   : > { %4071 = vmatmul.msk.f32.gmra.mxu3 %vm1976_vm12, %v1946_v46  ;;  %2170 = vrot.lane.b32.xlu2 %v1958_v40, %s4786_s19 }
 0x30b   : > { %2068 = vrot.lane.b32.xlu2 %v1946_v46, %s4787_s21 }
 0x313   : > { %2166 = vrot.lane.b32.xlu2 %v5419_v41, %s4786_s19 }
 0x31b   : > { %2268 = vrot.lane.b32.xlu2 %v1958_v40, %s4788_s6 }
 0x323   : > { %2266 = vrot.lane.b32.xlu2 %v1946_v46, %s4788_s6 }
 0x34d   : > { %v2073_v52 = vpop.permute.xlu2 %2072 }
 0x34e   : > { %4074 = vmatpush.xpose.msk.msra.mxu3 %vm1976_vm12, %v2073_v52 }
 0x355   : > { %v2071_v53 = vpop.permute.xlu2 %2070 }
 0x356   : > { %4075 = vmatpush.xpose.msk.msra.mxu3 %vm1976_vm12, %v2071_v53 }
 0x35d   : > { %v2171_v54 = vpop.permute.xlu2 %2170 }
 0x365   : > { %v2173_v55 = vpop.permute.xlu1 %2172  ;;  %v2069_v56 = vpop.permute.xlu2 %2068 }
 0x366   : > { %4080 = vmatpush.xpose.msk.msrb.mxu2 %vm1976_vm12, %v2173_v55 }
 0x36a   : > { %4081 = vmatpush.xpose.msk.msrb.mxu2 %vm1976_vm12, %v2171_v54 }
 0x36d   : > { %v2167_v57 = vpop.permute.xlu2 %2166 }
 0x36e   : > { %4082 = vmatmul.msk.f32.vlgmr.msrb.gmra.mxu2 %vm1976_vm12, %v2167_v57 }
 0x375   : > { %v2269_v17 = vpop.permute.xlu2 %2268 }
 0x37d   : > { %v2267_v24 = vpop.permute.xlu2 %2266 }
 0x37e   : > { %v2006_v58 = vpop.f32.mrf.mxu3 }
 0x37f   : > { %v2012_v59 = vmul.f32 0.17677669, %v2006_v58 }
 0x381   : > { %v2015_v60 = vsel %vm2014_vm13, %v2012_v59, -inf }
 0x382   : > { %2016 = vmax.xlane.f32.xlu0 %v2015_v60 }
 0x386   : > { %v2009_v63 = vpop.f32.mrf.mxu3 }
 0x387   : > { %v2013_v0 = vmul.f32 0.17677669, %v2009_v63 }
 0x389   : > { %v2018_v1 = vsel %vm2014_vm13, %v2013_v0, -inf }
 0x38a   : > { %2019 = vmax.xlane.f32.xlu0 %v2018_v1 }
 0x39e   : > { %2066 = vrot.lane.b32.xlu0 %v5419_v41, %s4787_s21 }
 0x3a6   : > { %2270 = vrot.lane.b32.xlu0 %v1960_v36, %s4788_s6 }
 0x3ae   : > { %2168 = vrot.lane.b32.xlu0 %v1946_v46, %s4786_s19 }
 0x3f1   : > { %v2199_v4 = vpop.f32.mrf.mxu2 }
 0x3f2   : > { %v2205_v5 = vmul.f32 0.17677669, %v2199_v4 }
 0x3f4   : > { %v2207_v6 = vsel %vm2014_vm13, %v2205_v5, -inf }
 0x3f5   : > { %v2017_v7 = vpop.xlane.xlu0 %2016  ;;  %2208 = vmax.xlane.f32.xlu2 %v2207_v6 }
 0x3f6   : > { %v2021_v8 = vsub.f32 %v2012_v59, %v2017_v7 }
 0x3f8   : > { %v2023_v42 = vmul.f32 1.442695, %v2021_v8 }
 0x3fa   : > { %4681 = vpow2.f32 %v2023_v42 }
 0x3fd   : > { %v2020_v3 = vpop.xlane.xlu0 %2019 }
 0x3fe   : > { %v2022_v45 = vsub.f32 %v2013_v0, %v2020_v3 }
 0x400   : > { %v4682_v9 = vpop.eup %4681  ;;  %v2025_v10 = vmul.f32 1.442695, %v2022_v45 }
 0x401   : > { %v2027_v11 = vsel %vm2014_vm13, %v4682_v9, 0.0 }
 0x402   : > { %4683 = vpow2.f32 %v2025_v10  ;;  %2028 = vadd.xlane.f32.xlu1 %v2027_v11 }
 0x408   : > { %v4684_v12 = vpop.eup %4683 }
 0x409   : > { %v2030_v37 = vsel %vm2014_vm13, %v4684_v12, 0.0 }
 0x40a   : > { %2031 = vadd.xlane.f32.xlu1 %v2030_v37 }
 0x410   : > { %v2067_v13 = vpop.permute.xlu0 %2066 }
 0x418   : > { %v2271_v61 = vpop.permute.xlu0 %2270 }
 0x420   : > { %v2169_v62 = vpop.permute.xlu0 %2168 }
 0x421   : > { %4083 = vmatmul.msk.f32.gmra.mxu2 %vm1976_vm12, %v2169_v62 }
 0x423   : > { %2264 = vrot.lane.b32.xlu1 %v5419_v41, %s4788_s6 }
 0x468   : > { %v2209_v30 = vpop.xlane.xlu2 %2208 }
 0x469   : > { %v2213_v34 = vsub.f32 %v2205_v5, %v2209_v30 }
 0x46b   : > { %v2215_v36 = vmul.f32 1.442695, %v2213_v34 }
 0x475   : > { %v2029_v14 = vpop.xlane.xlu1 %2028 }
 0x476   : > { %4685 = vrcp.f32 %v2029_v14 }
 0x47c   : > { %v4686_v15 = vpop.eup %4685 }
 0x47d   : > { %v2032_v28 = vpop.xlane.xlu1 %2031  ;;  %v2035_v16 = vmul.f32 %v4686_v15, %v4682_v9 }
 0x47e   : > { %4687 = vrcp.f32 %v2032_v28 }
 0x47f   : > { %4072 = vmatmul.msk.f32.vlgmr.msrb.gmra.mxu3 %vm2014_vm13, %v2035_v16  ;;  %4689 = vpow2.f32 %v2215_v36 }
 0x480   : > { %4086 = vmatpush.xpose.msk.msrb.mxu3 %vm1976_vm12, %v2271_v61 }
 0x484   : > { %v4688_v19 = vpop.eup %4687  ;;  %4087 = vmatpush.xpose.msk.msrb.mxu3 %vm1976_vm12, %v2269_v17 }
 0x485   : > { %v2036_v20 = vmul.f32 %v4688_v19, %v4684_v12  ;;  %v5471_v41 = vpop.eup %4689 }
 0x486   : > { %v2219_v47 = vsel %vm2014_vm13, %v5471_v41, 0.0 }
 0x487   : > { %4073 = vmatmul.msk.f32.gmra.mxu3 %vm2014_vm13, %v2036_v20 }
 0x48f   : > { %4076 = vmatmul.msk.f32.vlgmr.msra.gmra.mxu3 %vm1976_vm12, %v2067_v13 }
 0x495   : > { %v2265_v21 = vpop.permute.xlu1 %2264 }
 0x497   : > { %4077 = vmatmul.msk.f32.gmra.mxu3 %vm1976_vm12, %v2069_v56 }
 0x49f   : > { %4088 = vmatmul.msk.f32.vlgmr.msrb.gmra.mxu3 %vm1976_vm12, %v2265_v21 }
 0x4a4   : > { %v2202_v22 = vpop.f32.mrf.mxu2 }
 0x4a5   : > { %v2206_v23 = vmul.f32 0.17677669, %v2202_v22 }
 0x4a7   : > { %4089 = vmatmul.msk.f32.gmra.mxu3 %vm1976_vm12, %v2267_v24  ;;  %v2210_v33 = vsel %vm2014_vm13, %v2206_v23, -inf }
 0x4a8   : > { %2211 = vmax.xlane.f32.xlu0 %v2210_v33 }
 0x502   : > { %v5464_v25 = vpop.f32.mrf.mxu3 }
 0x50a   : > { %v5466_v2 = vpop.f32.mrf.mxu3 }
 0x512   : > { %v2099_v26 = vpop.f32.mrf.mxu3 }
 0x513   : > { %v2105_v27 = vmul.f32 0.17677669, %v2099_v26 }
 0x515   : > { %v2107_v29 = vsel %vm2014_vm13, %v2105_v27, -inf }
 0x516   : > { %2108 = vmax.xlane.f32.xlu1 %v2107_v29 }
 0x51a   : > { %v2102_v31 = vpop.f32.mrf.mxu3 }
 0x51b   : > { %v2106_v32 = vmul.f32 0.17677669, %v2102_v31  ;;  %v2212_v52 = vpop.xlane.xlu0 %2211 }
 0x51c   : > { %v2214_v53 = vsub.f32 %v2206_v23, %v2212_v52 }
 0x51d   : > { %v2110_v35 = vsel %vm2014_vm13, %v2106_v32, -inf }
 0x51e   : > { %2111 = vmax.xlane.f32.xlu0 %v2110_v35  ;;  %v2217_v54 = vmul.f32 1.442695, %v2214_v53  ;;  %v4505_v53 = vld [vmem:[%s5001_s23 + $0x38] sm:$0xff] }
 0x51f   : > { %2463 = vmatpush.bf16.msrb.mxu1 %v4505_v53  ;;  %v4533_v53 = vld [vmem:[%s6263_s27 + $0xd4] sm:$0xf0] }
 0x520   : > { %4691 = vpow2.f32 %v2217_v54  ;;  %v4504_v54 = vld [vmem:[%s5001_s23 + $0x30] sm:$0xff] }
 0x522   : > { %v2297_v38 = vpop.f32.mrf.mxu3 }
 0x523   : > { %v2303_v39 = vmul.f32 0.17677669, %v2297_v38  ;;  %2464 = vmatpush.bf16.msrb.mxu1 %v4504_v54 }
 0x525   : > { %v2305_v40 = vsel %vm2014_vm13, %v2303_v39, -inf }
 0x526   : > { %2306 = vmax.xlane.f32.xlu1 %v2305_v40  ;;  %v4692_v55 = vpop.eup %4691 }
 0x527   : > { %v2222_v56 = vsel %vm2014_vm13, %v4692_v55, 0.0 }
 0x52a   : > { %v2300_v44 = vpop.f32.mrf.mxu3 }
 0x52b   : > { %v2304_v46 = vmul.f32 0.17677669, %v2300_v44 }
 0x52d   : > { %v2308_v48 = vsel %vm2014_vm13, %v2304_v46, -inf }
 0x52e   : > { %2220 = vadd.xlane.f32.xlu1 %v2219_v47  ;;  %2309 = vmax.xlane.f32.xlu2 %v2308_v48 }
 0x532   : > { %4646 = vrot.lane.b32.xlu0 %v4645_v49, %s4787_s21 }
 0x55c   : > { %2223 = vadd.xlane.f32.xlu0 %v2222_v56  ;;  %v4502_v56 = vld [vmem:[%s5001_s23 + $0x20] sm:$0xff] }
 0x589   : > { %v2109_v57 = vpop.xlane.xlu1 %2108 }
 0x58a   : > { %v2113_v58 = vsub.f32 %v2105_v27, %v2109_v57  ;;  %v4501_v57 = vld [vmem:[%s5001_s23 + $0x18] sm:$0xff] }
 0x58c   : > { %v2115_v59 = vmul.f32 1.442695, %v2113_v58  ;;  %v4500_v58 = vld [vmem:[%s5001_s23 + $0x10] sm:$0xff] }
 0x58e   : > { %4693 = vpow2.f32 %v2115_v59  ;;  %v4499_v59 = vld [vmem:[%s5001_s23 + $0x8] sm:$0xff] }
 0x591   : > { %v2112_v60 = vpop.xlane.xlu0 %2111 }
 0x592   : > { %v2114_v63 = vsub.f32 %v2106_v32, %v2112_v60  ;;  %v4498_v60 = vld [vmem:[%s5001_s23] sm:$0xff] }
 0x594   : > { %v4694_v0 = vpop.eup %4693  ;;  %v2117_v1 = vmul.f32 1.442695, %v2114_v63 }
 0x595   : > { %v2119_v50 = vsel %vm2014_vm13, %v4694_v0, 0.0 }
 0x596   : > { %4695 = vpow2.f32 %v2117_v1  ;;  %2120 = vadd.xlane.f32.xlu1 %v2119_v50 }
 0x599   : > { %v2307_v51 = vpop.xlane.xlu1 %2306 }
 0x59a   : > { %v2311_v4 = vsub.f32 %v2303_v39, %v2307_v51 }
 0x59c   : > { %v4696_v5 = vpop.eup %4695  ;;  %v2313_v6 = vmul.f32 1.442695, %v2311_v4 }
 0x59d   : > { %v2122_v7 = vsel %vm2014_vm13, %v4696_v5, 0.0 }
 0x59e   : > { %4697 = vpow2.f32 %v2313_v6  ;;  %2123 = vadd.xlane.f32.xlu2 %v2122_v7 }
 0x5a1   : > { %v2310_v10 = vpop.xlane.xlu2 %2309  ;;  %v2221_v61 = vpop.xlane.xlu1 %2220 }
 0x5a2   : > { %v2312_v11 = vsub.f32 %v2304_v46, %v2310_v10 }
 0x5a4   : > { %v4698_v8 = vpop.eup %4697  ;;  %v4647_v42 = vpop.permute.xlu0 %4646  ;;  %v2315_v12 = vmul.f32 1.442695, %v2312_v11 }
 0x5a5   : > { %v2317_v3 = vsel %vm2014_vm13, %v4698_v8, 0.0  ;;  %v4648_v45 = vunpack.i.l.bf16 %v4647_v42  ;;  %v4649_v9 = vunpack.i.h.bf16 %v4647_v42 }
 0x5a6   : > { %2318 = vadd.xlane.f32.xlu1 %v2317_v3  ;;  %4699 = vpow2.f32 %v2315_v12  ;;  %v4675_v12 = vld [vmem:[%s6262_s24] ss:$0 sm:$0xff] }
 0x5a7   : > { %2157 = vmatpush.msrb.mxu0 %v4648_v45 }
 0x5a9   : > { %2158 = vmatpush.msrb.mxu0 %v4649_v9 }
 0x5ac   : > { %v4700_v37 = vpop.eup %4699 }
 0x5ad   : > { %v2320_v13 = vsel %vm2014_vm13, %v4700_v37, 0.0 }
 0x5b6   : > { %4651 = vrot.lane.b32.xlu2 %v4645_v49, %s4786_s19 }
 0x5bf   : > { %4656 = vrot.lane.b32.xlu1 %v4645_v49, %s4788_s6 }
 0x5cf   : > { %v2224_v17 = vpop.xlane.xlu0 %2223 }
 0x5df   : > { %2321 = vadd.xlane.f32.xlu2 %v2320_v13 }
 0x609   : > { %v2121_v62 = vpop.xlane.xlu1 %2120 }
 0x60a   : > { %4701 = vrcp.f32 %v2121_v62 }
 0x610   : > { %v4702_v14 = vpop.eup %4701 }
 0x611   : > { %v2124_v15 = vpop.xlane.xlu2 %2123  ;;  %v2127_v28 = vmul.f32 %v4702_v14, %v4694_v0  ;;  %v4789_v14 = vmov 128.0  }
 0x612   : > { %4703 = vrcp.f32 %v2124_v15 }
 0x613   : > { %4078 = vmatmul.msk.f32.vlgmr.msrb.gmra.mxu0 %vm2014_vm13, %v2127_v28  ;;  %4705 = vrcp.f32 %v2221_v61 }
 0x614   : > { %4707 = vrcp.f32 %v2224_v17 }
 0x618   : > { %v4704_v16 = vpop.eup %4703 }
 0x619   : > { %v4652_v19 = vpop.permute.xlu2 %4651  ;;  %v2128_v20 = vmul.f32 %v4704_v16, %v4696_v5  ;;  %v4706_v21 = vpop.eup %4705 }
 0x61a   : > { %v4653_v22 = vunpack.i.l.bf16 %v4652_v19  ;;  %v4654_v23 = vunpack.i.h.bf16 %v4652_v19  ;;  %v2227_v24 = vmul.f32 %v4706_v21, %v5471_v41  ;;  %v4708_v33 = vpop.eup %4707  ;;  %v2319_v27 = vpop.xlane.xlu1 %2318 }
 0x61b   : > { %4079 = vmatmul.msk.f32.gmra.mxu0 %vm2014_vm13, %v2128_v20  ;;  %v2228_v26 = vmul.f32 %v4708_v33, %v4692_v55  ;;  %4709 = vrcp.f32 %v2319_v27  ;;  %v4503_v55 = vld [vmem:[%s5001_s23 + $0x28] sm:$0xff]  ;;  %v4238_v27 = vld [vmem:[%s6263_s27 + $0xe0] sm:$0xf] }
 0x61c   : > { %2255 = vmatpush.msra.mxu2 %v4653_v22  ;;  %2465 = vmatpush.bf16.msrb.mxu1 %v4503_v55 }
 0x61e   : > { %2256 = vmatpush.msra.mxu2 %v4654_v23 }
 0x61f   : > { %4084 = vmatmul.msk.f32.vlgmr.msra.gmra.mxu2 %vm2014_vm13, %v2227_v24 }
 0x620   : > { %2466 = vmatpush.bf16.msrb.mxu1 %v4502_v56  ;;  %v4531_v56 = vld [vmem:[%s6263_s27 + $0xcc] sm:$0xf] }
 0x621   : > { %v4710_v30 = vpop.eup %4709 }
 0x622   : > { %v2325_v34 = vmul.f32 %v4710_v30, %v4698_v8  ;;  %v4534_v30 = vld [vmem:[%s6263_s27 + $0xe4] sm:$0xf] }
 0x624   : > { %2467 = vmatpush.bf16.msrb.mxu1 %v4501_v57  ;;  %v4232_v57 = vld [vmem:[%s6263_s27 + $0xd8] sm:$0xf0] }
 0x627   : > { %4085 = vmatmul.msk.f32.gmra.mxu2 %vm2014_vm13, %v2228_v26 }
 0x628   : > { %2468 = vmatpush.bf16.msrb.mxu1 %v4500_v58  ;;  %v4235_v58 = vor.u32 %v4531_v56, %v4232_v57  ;;  %v4511_v56 = vld [vmem:[%s6263_s27 + $0x2c] sm:$0xf]  ;;  %v4152_v57 = vld [vmem:[%s6263_s27 + $0x38] sm:$0xf0] }
 0x62c   : > { %2469 = vmatpush.bf16.msrb.mxu1 %v4499_v59  ;;  %v4206_v59 = vld [vmem:[%s6263_s27 + $0xa0] sm:$0xf] }
 0x630   : > { %2470 = vmatpush.bf16.msrb.mxu1 %v4498_v60  ;;  %v4528_v60 = vld [vmem:[%s6263_s27 + $0xac] sm:$0xf0] }
 0x631   : > { %v4657_v29 = vpop.permute.xlu1 %4656 }
 0x632   : > { %v4658_v31 = vunpack.i.l.bf16 %v4657_v29  ;;  %v4659_v32 = vunpack.i.h.bf16 %v4657_v29  ;;  %v4536_v29 = vld [vmem:[%s6263_s27 + $0xec] sm:$0xf0] }
 0x634   : > { %2353 = vmatpush.msra.mxu0 %v4658_v31  ;;  %v4239_v31 = vor.u32 %v4536_v29, %v4238_v27  ;;  %v4516_v27 = vld [vmem:[%s6263_s27 + $0x4c] sm:$0xf0]  ;;  %v4514_v29 = vld [vmem:[%s6263_s27 + $0x44] sm:$0xf] }
 0x636   : > { %2354 = vmatpush.msra.mxu0 %v4659_v32  ;;  %v4240_v32 = vld [vmem:[%s6263_s27 + $0xf0] sm:$0xf0]  ;;  %2741 = vmatpush.bf16.msrb.mxu2 %v4239_v31 }
 0x637   : > { %4090 = vmatmul.msk.f32.vlgmr.msra.gmra.mxu0 %vm2014_vm13, %v2325_v34  ;;  %v4246_v34 = vld [vmem:[%s6263_s27 + $0xe8] sm:$0xf]  ;;  %v4160_v31 = vld [vmem:[%s6263_s27 + $0x50] sm:$0xf0] }
 0x652   : > { %v2322_v35 = vpop.xlane.xlu2 %2321 }
 0x653   : > { %4711 = vrcp.f32 %v2322_v35  ;;  %v4537_v35 = vld [vmem:[%s6263_s27 + $0xf4] sm:$0xf0] }
 0x654   : > { %4713 = vrcp.f32 %v4789_v14  ;;  %v4520_v14 = vld [vmem:[%s6263_s27 + $0x6c] sm:$0xf0] }
 0x659   : > { %v4712_v36 = vpop.eup %4711 }
 0x65a   : > { %v2326_v38 = vmul.f32 %v4712_v36, %v4700_v37  ;;  %v4714_v15 = vpop.eup %4713  ;;  %v4243_v36 = vor.u32 %v4534_v30, %v4240_v32  ;;  %v4166_v32 = vld [vmem:[%s6263_s27 + $0x48] sm:$0xf] }
 0x65b   : > { %v2486_v28 = vmul.f32 128.0, %v4714_v15  ;;  %vm2490_vm0 = vweird.f32 %v4714_v15 }
 0x65c   : > { %4091 = vmatmul.msk.f32.gmra.mxu0 %vm2014_vm13, %v2326_v38  ;;  %v4247_v38 = vor.u32 %v4537_v35, %v4246_v34  ;;  %2755 = vmatpush.bf16.msra.mxu3 %v4243_v36  ;;  %v4517_v34 = vld [vmem:[%s6263_s27 + $0x54] sm:$0xf0]  ;;  %v4163_v35 = vor.u32 %v4514_v29, %v4160_v31 }
 0x65d   : > { %v2487_v16 = vsub.f32 1.0, %v2486_v28  ;;  %v4167_v36 = vor.u32 %v4517_v34, %v4166_v32 }
 0x65e   : > { %2769 = vmatpush.bf16.msrb.mxu0 %v4247_v38  ;;  %v4515_v38 = vld [vmem:[%s6263_s27 + $0x4c] sm:$0xf] }
 0x65f   : > { %v2488_v17 = vmul.f32 %v4714_v15, %v2487_v16  ;;  %v4176_v16 = vld [vmem:[%s6263_s27 + $0x70] sm:$0xf0] }
 0x661   : > { %v2489_v19 = vadd.f32 %v4714_v15, %v2488_v17  ;;  %v4182_v17 = vld [vmem:[%s6263_s27 + $0x68] sm:$0xf] }
 0x663   : > { %v5515_v20 = vsel %vm2490_vm0, %v4714_v15, %v2489_v19  ;;  %v4518_v15 = vld [vmem:[%s6263_s27 + $0x64] sm:$0xf]  ;;  %v4521_v19 = vld [vmem:[%s6263_s27 + $0x74] sm:$0xf0] }
 0x690   : > { %v2160_v39 = vpop.f32.mrf.mxu0 }
 0x698   : > { %v2163_v40 = vpop.f32.mrf.mxu0 }
 0x699   : > { %v4660_v41 = vpack.i.bf16 %v2163_v40, %v2160_v39  ;;  %v4535_v39 = vld [vmem:[%s6263_s27 + $0xec] sm:$0xf]  ;;  %v4248_v40 = vld [vmem:[%s6263_s27 + $0xf8] sm:$0xf0] }
 0x69b   : > { %4661 = vrot.lane.b32.xlu1 %v4660_v41, %s4788_s6  ;;  %v4251_v41 = vor.u32 %v4535_v39, %v4248_v40  ;;  %v4168_v39 = vld [vmem:[%s6263_s27 + $0x58] sm:$0xf0] }
 0x69c   : > { %v4171_v40 = vor.u32 %v4515_v38, %v4168_v39 }
 0x69d   : > { %2783 = vmatpush.bf16.msra.mxu1 %v4251_v41  ;;  %v4142_v41 = vld [vmem:[%s6263_s27 + $0x20] sm:$0xf] }
 0x6a1   : > { %2784 = vmatpush.bf16.msra.mxu1 %v4235_v58  ;;  %v4126_v58 = vld [vmem:[%s6263_s27] sm:$0xf] }
 0x6a2   : > { %v2258_v44 = vpop.f32.mrf.mxu2 }
 0x6aa   : > { %v2261_v46 = vpop.f32.mrf.mxu2 }
 0x6ab   : > { %v4665_v47 = vpack.i.bf16 %v2261_v46, %v2258_v44  ;;  %v4222_v44 = vld [vmem:[%s6263_s27 + $0xc0] sm:$0xf]  ;;  %v4532_v46 = vld [vmem:[%s6263_s27 + $0xcc] sm:$0xf0] }
 0x6ad   : > { %4666 = vrot.lane.b32.xlu1 %v4665_v47, %s4786_s19  ;;  %v4530_v47 = vld [vmem:[%s6263_s27 + $0xc4] sm:$0xf] }
 0x6b4   : > { %v2356_v48 = vpop.f32.mrf.mxu0 }
 0x6d9   : > { %v2359_v49 = vpop.f32.mrf.mxu0 }
 0x6da   : > { %v4670_v52 = vpack.i.bf16 %v2359_v49, %v2356_v48  ;;  %v4223_v48 = vor.u32 %v4532_v46, %v4222_v44  ;;  %v4224_v49 = vld [vmem:[%s6263_s27 + $0xd0] sm:$0xf0]  ;;  %v4512_v44 = vld [vmem:[%s6263_s27 + $0x2c] sm:$0xf0]  ;;  %v4510_v46 = vld [vmem:[%s6263_s27 + $0x24] sm:$0xf] }
 0x6db   : > { %v4227_v54 = vor.u32 %v4530_v47, %v4224_v49  ;;  %v4143_v47 = vor.u32 %v4512_v44, %v4142_v41  ;;  %v4150_v49 = vld [vmem:[%s6263_s27 + $0x28] sm:$0xf] }
 0x6dc   : > { %4671 = vrot.lane.b32.xlu0 %v4670_v52, %s4787_s21  ;;  %v4230_v52 = vld [vmem:[%s6263_s27 + $0xc8] sm:$0xf]  ;;  %2742 = vmatpush.bf16.msrb.mxu2 %v4223_v48  ;;  %v4144_v48 = vld [vmem:[%s6263_s27 + $0x30] sm:$0xf0] }
 0x6dd   : > { %v4231_v55 = vor.u32 %v4533_v53, %v4230_v52  ;;  %2756 = vmatpush.bf16.msra.mxu3 %v4227_v54  ;;  %v4513_v52 = vld [vmem:[%s6263_s27 + $0x34] sm:$0xf0]  ;;  %v4147_v54 = vor.u32 %v4510_v46, %v4144_v48 }
 0x6df   : > { %2770 = vmatpush.bf16.msrb.mxu0 %v4231_v55  ;;  %v4151_v55 = vor.u32 %v4513_v52, %v4150_v49 }
 0x70d   : > { %v4662_v63 = vpop.permute.xlu1 %4661 }
 0x70e   : > { %v4664_v1 = vunpack.i.h.bf16 %v4662_v63  ;;  %v4663_v50 = vunpack.i.l.bf16 %v4662_v63  ;;  %v4526_v63 = vld [vmem:[%s6263_s27 + $0xa4] sm:$0xf] }
 0x710   : > { %v2387_v6 = vsel %vm1976_vm12, %v5466_v2, %v4664_v1  ;;  %v2386_v7 = vsel %vm1976_vm12, %v5464_v25, %v4663_v50  ;;  %v4208_v1 = vld [vmem:[%s6263_s27 + $0xb0] sm:$0xf0]  ;;  %v4214_v50 = vld [vmem:[%s6263_s27 + $0xa8] sm:$0xf] }
 0x71f   : > { %v4667_v0 = vpop.permute.xlu1 %4666 }
 0x720   : > { %v4669_v51 = vunpack.i.h.bf16 %v4667_v0  ;;  %v4668_v4 = vunpack.i.l.bf16 %v4667_v0  ;;  %v4207_v0 = vor.u32 %v4528_v60, %v4206_v59  ;;  %v4155_v60 = vor.u32 %v4511_v56, %v4152_v57 }
 0x722   : > { %v2389_v3 = vsel %vm2388_vm14, %v2386_v7, %v4668_v4  ;;  %v2390_v45 = vsel %vm2388_vm14, %v2387_v6, %v4669_v51  ;;  %v4529_v51 = vld [vmem:[%s6263_s27 + $0xb4] sm:$0xf0]  ;;  %v4211_v4 = vor.u32 %v4526_v63, %v4208_v1  ;;  %v4527_v6 = vld [vmem:[%s6263_s27 + $0xac] sm:$0xf]  ;;  %v4216_v7 = vld [vmem:[%s6263_s27 + $0xb8] sm:$0xf0]  ;;  %2743 = vmatpush.bf16.msrb.mxu2 %v4207_v0 }
 0x723   : > { %v4508_v63 = vld [vmem:[%s6263_s27 + $0xc] sm:$0xf0]  ;;  %v4506_v0 = vld [vmem:[%s6263_s27 + $0x4] sm:$0xf]  ;;  %v4128_v1 = vld [vmem:[%s6263_s27 + $0x10] sm:$0xf0] }
 0x724   : > { %2757 = vmatpush.bf16.msra.mxu3 %v4211_v4  ;;  %v4134_v4 = vld [vmem:[%s6263_s27 + $0x8] sm:$0xf] }
 0x74e   : > { %v4672_v5 = vpop.permute.xlu0 %4671 }
 0x74f   : > { %v4674_v8 = vunpack.i.h.bf16 %v4672_v5  ;;  %v4673_v42 = vunpack.i.l.bf16 %v4672_v5  ;;  %v4215_v5 = vor.u32 %v4529_v51, %v4214_v50  ;;  %v4127_v50 = vor.u32 %v4508_v63, %v4126_v58 }
 0x750   : > { %v4131_v51 = vor.u32 %v4506_v0, %v4128_v1 }
 0x751   : > { %v2392_v9 = vsel %vm2391_vm15, %v2389_v3, %v4673_v42  ;;  %v2393_v10 = vsel %vm2391_vm15, %v2390_v45, %v4674_v8  ;;  %v4219_v8 = vor.u32 %v4527_v6, %v4216_v7  ;;  %2771 = vmatpush.bf16.msrb.mxu0 %v4215_v5  ;;  %v4190_v42 = vld [vmem:[%s6263_s27 + $0x80] sm:$0xf]  ;;  %v4524_v3 = vld [vmem:[%s6263_s27 + $0x8c] sm:$0xf0]  ;;  %v4522_v45 = vld [vmem:[%s6263_s27 + $0x84] sm:$0xf] }
 0x752   : > { %v2394_v11 = vpack.c.bf16 %v2393_v10, %v2392_v9  ;;  %v4191_v9 = vor.u32 %v4524_v3, %v4190_v42  ;;  %v4192_v10 = vld [vmem:[%s6263_s27 + $0x90] sm:$0xf0]  ;;  %v4509_v5 = vld [vmem:[%s6263_s27 + $0x14] sm:$0xf0]  ;;  %v4507_v6 = vld [vmem:[%s6263_s27 + $0xc] sm:$0xf] }
 0x753   : > { %2785 = vmatpush.bf16.msra.mxu1 %v4219_v8  ;;  %v4135_v8 = vor.u32 %v4509_v5, %v4134_v4  ;;  %v4136_v42 = vld [vmem:[%s6263_s27 + $0x18] sm:$0xf0] }
 0x754   : > { %2471 = vmatmul.bf16.vlgmr.msrb.gmra.mxu1 %v2394_v11  ;;  %v4198_v11 = vld [vmem:[%s6263_s27 + $0x88] sm:$0xf]  ;;  %2744 = vmatpush.bf16.msrb.mxu2 %v4191_v9  ;;  %v4139_v3 = vor.u32 %v4507_v6, %v4136_v42 }
 0x7d1   : > { %v2472_v37 = vpop.f32.mrf.mxu1 }
 0x7d2   : > { %v2473_v13 = vadd.f32 %v4675_v12, %v2472_v37  ;;  %v4195_v37 = vor.u32 %v4522_v45, %v4192_v10 }
 0x7d4   : > { %v2477_v2 = vadd.f32 %v2473_v13, %v5403_v18  ;;  %2758 = vmatpush.bf16.msra.mxu3 %v4195_v37 }
 0x7d6   : > { %2481 = vadd.xlane.f32.xlu1 %v2477_v2 }
 0x7d9   : > { %v2474_v61 = vpop.f32.mrf.mxu1 }
 0x7da   : > { %v2475_v25 = vadd.f32 %v4675_v12, %v2474_v61  ;;  %v4525_v12 = vld [vmem:[%s6263_s27 + $0x94] sm:$0xf0]  ;;  %v4200_v61 = vld [vmem:[%s6263_s27 + $0x98] sm:$0xf0] }
 0x7db   : > { %v4199_v13 = vor.u32 %v4525_v12, %v4198_v11 }
 0x7dc   : > { %v2478_v62 = vadd.f32 %v2475_v25, %v5405_v43 }
 0x7dd   : > { %2772 = vmatpush.bf16.msrb.mxu0 %v4199_v13 }
 0x7de   : > { %2483 = vadd.xlane.f32.xlu2 %v2478_v62 }
 0x849   : > { %v2482_v18 = vpop.xlane.xlu1 %2481 }
 0x84a   : > { %v2492_v43 = vmul.f32 %v5515_v20, %v2482_v18  ;;  %v4179_v18 = vor.u32 %v4518_v15, %v4176_v16 }
 0x84c   : > { %v5518_v21 = vsub.f32 %v2477_v2, %v2492_v43  ;;  %v4523_v2 = vld [vmem:[%s6263_s27 + $0x8c] sm:$0xf]  ;;  %v4183_v43 = vor.u32 %v4521_v19, %v4182_v17  ;;  %2759 = vmatpush.bf16.msra.mxu3 %v4179_v18  ;;  %v4676_v19 = vld [vmem:[%s6265_s13] ss:$0 sm:$0xff] }
 0x84d   : > { %v4203_v25 = vor.u32 %v4523_v2, %v4200_v61 }
 0x84e   : > { %v2496_v22 = vmul.f32 %v5518_v21, %v5518_v21  ;;  %2773 = vmatpush.bf16.msrb.mxu0 %v4183_v43 }
 0x84f   : > { %2786 = vmatpush.bf16.msra.mxu1 %v4203_v25 }
 0x850   : > { %2498 = vadd.xlane.f32.xlu0 %v2496_v22  ;;  %v4519_v22 = vld [vmem:[%s6263_s27 + $0x6c] sm:$0xf]  ;;  %2760 = vmatpush.bf16.msra.mxu3 %v4163_v35 }
 0x851   : > { %v2484_v23 = vpop.xlane.xlu2 %2483 }
 0x852   : > { %v2493_v24 = vmul.f32 %v5515_v20, %v2484_v23  ;;  %v4184_v23 = vld [vmem:[%s6263_s27 + $0x78] sm:$0xf0]  ;;  %2774 = vmatpush.bf16.msrb.mxu0 %v4167_v36 }
 0x854   : > { %v5523_v33 = vsub.f32 %v2478_v62, %v2493_v24  ;;  %v4174_v62 = vld [vmem:[%s6263_s27 + $0x60] sm:$0xf]  ;;  %v4187_v24 = vor.u32 %v4519_v22, %v4184_v23  ;;  %2761 = vmatpush.bf16.msra.mxu3 %v4147_v54 }
 0x855   : > { %v4175_v28 = vor.u32 %v4520_v14, %v4174_v62 }
 0x856   : > { %v2497_v26 = vmul.f32 %v5523_v33, %v5523_v33  ;;  %2787 = vmatpush.bf16.msra.mxu1 %v4187_v24  ;;  %2775 = vmatpush.bf16.msrb.mxu0 %v4151_v55  ;;  %v4677_v24 = vld [vmem:[%s6267_s29] ss:$0 sm:$0xff] }
 0x857   : > { %2745 = vmatpush.bf16.msrb.mxu2 %v4175_v28 }
 0x858   : > { %2500 = vadd.xlane.f32.xlu2 %v2497_v26  ;;  %v4158_v26 = vld [vmem:[%s6263_s27 + $0x40] sm:$0xf]  ;;  %2762 = vmatpush.bf16.msra.mxu3 %v4131_v51 }
 0x859   : > { %v4159_v30 = vor.u32 %v4516_v27, %v4158_v26 }
 0x85a   : > { %2788 = vmatpush.bf16.msra.mxu1 %v4171_v40  ;;  %2776 = vmatpush.bf16.msrb.mxu0 %v4135_v8 }
 0x85b   : > { %2746 = vmatpush.bf16.msrb.mxu2 %v4159_v30  ;;  %v5612_v30 = vld [vmem:[%s5035_s26] sm:$0xf] }
 0x85c   : > { %v2576_v31 = vperm.slane %v5612_v30, 3  ;;  %v2573_v38 = vperm.slane %v5612_v30, 0  ;;  %v2574_v41 = vperm.slane %v5612_v30, 1 }
 0x85e   : > { %2789 = vmatpush.bf16.msra.mxu1 %v4155_v60 }
 0x85f   : > { %2747 = vmatpush.bf16.msrb.mxu2 %v4143_v47 }
 0x862   : > { %2790 = vmatpush.bf16.msra.mxu1 %v4139_v3 }
 0x863   : > { %2748 = vmatpush.bf16.msrb.mxu2 %v4127_v50 }
 0x8c3   : > { %v2499_v53 = vpop.xlane.xlu0 %2498 }
 0x8c4   : > { %v2502_v59 = vmul.f32 %v2499_v53, %v5515_v20 }
 0x8c6   : > { %v2504_v7 = vadd.f32 1e-05, %v2502_v59 }
 0x8c8   : > { %4715 = vrsqrt.f32 %v2504_v7  ;;  %vm2512_vm2 = vweird.f32 %v2504_v7 }
 0x8cb   : > { %v2501_v45 = vpop.xlane.xlu2 %2500 }
 0x8cc   : > { %v2503_v9 = vmul.f32 %v2501_v45, %v5515_v20 }
 0x8ce   : > { %v4716_v10 = vpop.eup %4715  ;;  %v2505_v11 = vadd.f32 1e-05, %v2503_v9 }
 0x8cf   : > { %v2507_v12 = vmul.f32 %v4716_v10, %v2504_v7  ;;  %vm2513_vm1 = vweird.f32 %v4716_v10 }
 0x8d0   : > { %4717 = vrsqrt.f32 %v2505_v11  ;;  %vm2514_vm3 = vmor %vm2512_vm2, %vm2513_vm1  ;;  %vm2522_vm5 = vweird.f32 %v2505_v11 }
 0x8d1   : > { %v2508_v37 = vmul.f32 %v4716_v10, %v2507_v12 }
 0x8d3   : > { %v2509_v13 = vmul.f32 0.5, %v2508_v37 }
 0x8d5   : > { %v2510_v2 = vsub.f32 1.5, %v2509_v13 }
 0x8d6   : > { %v4718_v61 = vpop.eup %4717 }
 0x8d7   : > { %v2511_v25 = vmul.f32 %v4716_v10, %v2510_v2  ;;  %v2517_v62 = vmul.f32 %v4718_v61, %v2505_v11  ;;  %vm2523_vm4 = vweird.f32 %v4718_v61 }
 0x8d8   : > { %vm2524_vm6 = vmor %vm2522_vm5, %vm2523_vm4 }
 0x8d9   : > { %v2518_v14 = vmul.f32 %v4718_v61, %v2517_v62  ;;  %v2515_v15 = vsel %vm2514_vm3, %v4716_v10, %v2511_v25 }
 0x8da   : > { %v2526_v17 = vmul.f32 %v2515_v15, %v5518_v21 }
 0x8db   : > { %v2519_v28 = vmul.f32 0.5, %v2518_v14 }
 0x8dc   : > { %v2531_v23 = vmul.f32 %v4676_v19, %v2526_v17 }
 0x8dd   : > { %v2520_v16 = vsub.f32 1.5, %v2519_v28 }
 0x8de   : > { %v5605_v21 = vadd.f32 %v4677_v24, %v2531_v23 }
 0x8df   : > { %v2521_v18 = vmul.f32 %v4718_v61, %v2520_v16 }
 0x8e1   : > { %v2525_v43 = vsel %vm2524_vm6, %v4718_v61, %v2521_v18 }
 0x8e2   : > { %v2527_v22 = vmul.f32 %v2525_v43, %v5523_v33  ;;  %v2575_v33 = vperm.slane %v5612_v30, 2 }
 0x8e4   : > { %v2532_v26 = vmul.f32 %v4676_v19, %v2527_v22 }
 0x8e6   : > { %v5607_v27 = vadd.f32 %v4677_v24, %v2532_v26 }
 0x8e8   : > { %v2538_v29 = vpack.c.bf16 %v5607_v27, %v5605_v21 }
 0x8ea   : > { %2749 = vmatmul.bf16.vlgmr.msrb.gmra.mxu2 %v2538_v29  ;;  %2763 = vmatmul.bf16.vlgmr.msra.gmra.mxu3 %v2538_v29 }
 0x8eb   : > { %2777 = vmatmul.bf16.vlgmr.msrb.gmra.mxu0 %v2538_v29  ;;  %2791 = vmatmul.bf16.vlgmr.msra.gmra.mxu1 %v2538_v29 }
 0x968   : > { %v2778_v32 = vpop.f32.mrf.mxu0  ;;  %v2792_v34 = vpop.f32.mrf.mxu1 }
 0x969   : > { %v5616_v35 = vadd.f32 %v2778_v32, %v2575_v33  ;;  %v5620_v36 = vadd.f32 %v2792_v34, %v2576_v31 }
 0x96b   : > { %v5624_v39 = vmul.f32 0.70710677, %v5616_v35  ;;  %v5627_v40 = vmul.f32 0.70710677, %v5620_v36 }
 0x96d   : > { %v2893_v44 = vmul.f32 %v5624_v39, %v5624_v39  ;;  %v2933_v46 = vmul.f32 %v5627_v40, %v5627_v40  ;;  %v2750_v47 = vpop.f32.mrf.mxu2  ;;  %v2764_v48 = vpop.f32.mrf.mxu3 }
 0x96e   : > { %v5636_v49 = vadd.f32 %v2750_v47, %v2573_v38  ;;  %v5644_v54 = vadd.f32 %v2764_v48, %v2574_v41 }
 0x96f   : > { %v5638_v52 = vmin.f32 %v2893_v44, 16.0  ;;  %v5640_v53 = vmin.f32 %v2933_v46, 16.0 }
 0x970   : > { %v5647_v55 = vmul.f32 0.70710677, %v5636_v49  ;;  %v5656_v0 = vmul.f32 0.70710677, %v5644_v54  ;;  %v2780_v13 = vpop.f32.mrf.mxu0 }
 0x971   : > { %v2906_v56 = vmul.f32 3.8918573e-05, %v5638_v52  ;;  %v2895_v57 = vmul.f32 2.1237322e-06, %v5638_v52  ;;  %v2935_v58 = vmul.f32 2.1237322e-06, %v5640_v53  ;;  %v5674_v28 = vadd.f32 %v2780_v13, %v2575_v33 }
 0x972   : > { %v2946_v59 = vmul.f32 3.8918573e-05, %v5640_v53  ;;  %v2813_v60 = vmul.f32 %v5647_v55, %v5647_v55  ;;  %v2853_v42 = vmul.f32 %v5656_v0, %v5656_v0 }
 0x973   : > { %v2907_v63 = vadd.f32 0.001143296, %v2906_v56  ;;  %v2896_v4 = vadd.f32 0.00028619796, %v2895_v57  ;;  %v2936_v5 = vadd.f32 0.00028619796, %v2935_v58  ;;  %v2794_v57 = vpop.f32.mrf.mxu1 }
 0x974   : > { %v2947_v1 = vadd.f32 0.001143296, %v2946_v59  ;;  %v5658_v50 = vmin.f32 %v2813_v60, 16.0  ;;  %v5670_v61 = vmin.f32 %v2853_v42, 16.0  ;;  %v5681_v26 = vmul.f32 0.70710677, %v5674_v28 }
 0x975   : > { %v2908_v51 = vmul.f32 %v2907_v63, %v5638_v52  ;;  %v2897_v10 = vmul.f32 %v2896_v4, %v5638_v52  ;;  %v2937_v11 = vmul.f32 %v2936_v5, %v5640_v53  ;;  %v5697_v4 = vadd.f32 %v2794_v57, %v2576_v31 }
 0x976   : > { %v2948_v6 = vmul.f32 %v2947_v1, %v5640_v53  ;;  %v2826_v7 = vmul.f32 3.8918573e-05, %v5658_v50  ;;  %v2815_v15 = vmul.f32 2.1237322e-06, %v5658_v50  ;;  %v2855_v43 = vmul.f32 2.1237322e-06, %v5670_v61 }
 0x977   : > { %v2909_v8 = vadd.f32 0.014752088, %v2908_v51  ;;  %v2898_v16 = vadd.f32 0.0036580483, %v2897_v10  ;;  %v2938_v17 = vadd.f32 0.0036580483, %v2937_v11  ;;  %v3053_v56 = vmul.f32 %v5681_v26, %v5681_v26  ;;  %v2752_v10 = vpop.f32.mrf.mxu2 }
 0x978   : > { %v2949_v3 = vadd.f32 0.014752088, %v2948_v6  ;;  %v2827_v45 = vadd.f32 0.001143296, %v2826_v7  ;;  %v2816_v24 = vadd.f32 0.00028619796, %v2815_v15 }
 0x979   : > { %v2910_v9 = vmul.f32 %v2909_v8, %v5638_v52  ;;  %v2899_v29 = vmul.f32 %v2898_v16, %v5638_v52  ;;  %v2939_v33 = vmul.f32 %v2938_v17, %v5640_v53  ;;  %v2856_v34 = vadd.f32 0.00028619796, %v2855_v43 }
 0x97a   : > { %v2950_v12 = vmul.f32 %v2949_v3, %v5640_v53  ;;  %v2828_v37 = vmul.f32 %v2827_v45, %v5658_v50  ;;  %v2866_v44 = vmul.f32 3.8918573e-05, %v5670_v61  ;;  %v2817_v48 = vmul.f32 %v2816_v24, %v5658_v50 }
 0x97b   : > { %v2911_v2 = vadd.f32 0.112945676, %v2910_v9  ;;  %v2900_v58 = vadd.f32 0.05243302, %v2899_v29  ;;  %v2940_v59 = vadd.f32 0.05243302, %v2939_v33  ;;  %v2857_v63 = vmul.f32 %v2856_v34, %v5670_v61 }
 0x97c   : > { %v2951_v25 = vadd.f32 0.112945676, %v2950_v12  ;;  %v2829_v62 = vadd.f32 0.014752088, %v2828_v37  ;;  %v2867_v1 = vadd.f32 0.001143296, %v2866_v44 }
 0x97d   : > { %v2912_v14 = vmul.f32 %v2911_v2, %v5638_v52  ;;  %v2818_v5 = vadd.f32 0.0036580483, %v2817_v48  ;;  %v5699_v6 = vmin.f32 %v3053_v56, 16.0  ;;  %v2901_v7 = vmul.f32 %v2900_v58, %v5638_v52 }
 0x97e   : > { %v2952_v18 = vmul.f32 %v2951_v25, %v5640_v53  ;;  %v2830_v22 = vmul.f32 %v2829_v62, %v5658_v50  ;;  %v2941_v8 = vmul.f32 %v2940_v59, %v5640_v53  ;;  %v2858_v3 = vadd.f32 0.0036580483, %v2857_v63 }
 0x97f   : > { %v2913_v19 = vadd.f32 0.4994258, %v2912_v14  ;;  %v2868_v45 = vmul.f32 %v2867_v1, %v5670_v61  ;;  %v3055_v9 = vmul.f32 2.1237322e-06, %v5699_v6  ;;  %v3066_v12 = vmul.f32 3.8918573e-05, %v5699_v6 }
 0x980   : > { %v2953_v32 = vadd.f32 0.4994258, %v2952_v18  ;;  %v2831_v47 = vadd.f32 0.112945676, %v2830_v22  ;;  %v5709_v31 = vmul.f32 0.70710677, %v5697_v4  ;;  %v2819_v37 = vmul.f32 %v2818_v5, %v5658_v50 }
 0x981   : > { %v2914_v23 = vmul.f32 %v2913_v19, %v5638_v52  ;;  %v2902_v2 = vadd.f32 0.18741608, %v2901_v7  ;;  %v5716_v25 = vadd.f32 %v2752_v10, %v2573_v38  ;;  %v2942_v62 = vadd.f32 0.18741608, %v2941_v8 }
 0x982   : > { %v2954_v60 = vmul.f32 %v2953_v32, %v5640_v53  ;;  %v2832_v51 = vmul.f32 %v2831_v47, %v5658_v50  ;;  %v2859_v14 = vmul.f32 %v2858_v3, %v5670_v61  ;;  %v2869_v15 = vadd.f32 0.014752088, %v2868_v45 }
 0x983   : > { %v5686_v46 = vadd.f32 1.0, %v2914_v23  ;;  %v3056_v16 = vadd.f32 0.00028619796, %v3055_v9  ;;  %v3067_v19 = vadd.f32 0.001143296, %v3066_v12  ;;  %v3093_v18 = vmul.f32 %v5709_v31, %v5709_v31 }
 0x984   : > { %v5703_v42 = vadd.f32 1.0, %v2954_v60  ;;  %v2833_v11 = vadd.f32 0.4994258, %v2832_v51  ;;  %v2820_v22 = vadd.f32 0.05243302, %v2819_v37  ;;  %v2903_v38 = vmul.f32 %v2902_v2, %v5638_v52 }
 0x985   : > { %4719 = vrcp.f32 %v5686_v46  ;;  %v3057_v23 = vmul.f32 %v3056_v16, %v5699_v6  ;;  %v2943_v24 = vmul.f32 %v2942_v62, %v5640_v53  ;;  %v2860_v29 = vadd.f32 0.05243302, %v2859_v14  ;;  %v4561_v14 = vld [vmem:[%s5040_s7 + $0xb8] sm:$0xff] }
 0x986   : > { %4721 = vrcp.f32 %v5703_v42  ;;  %v2834_v17 = vmul.f32 %v2833_v11, %v5658_v50  ;;  %v3068_v33 = vmul.f32 %v3067_v19, %v5699_v6  ;;  %v2870_v34 = vmul.f32 %v2869_v15, %v5670_v61  ;;  %v4569_v15 = vld [vmem:[%s5040_s7 + $0xf8] sm:$0xff]  ;;  %3441 = vmatpush.bf16.msra.mxu0 %v4561_v14 }
 0x987   : > { %v5732_v44 = vmin.f32 %v3093_v18, 16.0  ;;  %v5735_v47 = vmul.f32 0.70710677, %v5716_v25  ;;  %v5738_v48 = vmul.f32 0.5, %v5616_v35  ;;  %v2821_v56 = vmul.f32 %v2820_v22, %v5658_v50  ;;  %3455 = vmatpush.bf16.msrb.mxu1 %v4569_v15  ;;  %v2766_v15 = vpop.f32.mrf.mxu3 }
 0x988   : > { %v5729_v32 = vadd.f32 1.0, %v2834_v17  ;;  %v2904_v53 = vadd.f32 1.1283791, %v2903_v38  ;;  %v5744_v58 = vmul.f32 0.5, %v5620_v36  ;;  %v5747_v59 = vmul.f32 0.5, %v5674_v28 }
 0x989   : > { %v3058_v60 = vadd.f32 0.0036580483, %v3057_v23  ;;  %v2925_v63 = vand.u32 2147483647, %v5686_v46  ;;  %v2944_v1 = vadd.f32 1.1283791, %v2943_v24  ;;  %v5751_v51 = vmul.f32 %v2860_v29, %v5670_v61 }
 0x98a   : > { %v3069_v35 = vadd.f32 0.014752088, %v3068_v33  ;;  %4723 = vrcp.f32 %v5729_v32  ;;  %v2871_v5 = vadd.f32 0.112945676, %v2870_v34  ;;  %v3095_v7 = vmul.f32 2.1237322e-06, %v5732_v44 }
 0x98b   : > { %v5712_v13 = vpop.eup %4719  ;;  %v2973_v36 = vmul.f32 %v5735_v47, %v5735_v47  ;;  %v2822_v3 = vadd.f32 0.18741608, %v2821_v56  ;;  %v5762_v9 = vmul.f32 %v2904_v53, %v5624_v39  ;;  %v3059_v10 = vmul.f32 %v3058_v60, %v5699_v6  ;;  %v4560_v53 = vld [vmem:[%s5040_s7 + $0xb0] sm:$0xff] }
 0x98c   : > { %v2917_v43 = vmul.f32 %v5712_v13, %v5686_v46  ;;  %v5741_v57 = vpop.eup %4721  ;;  %v3070_v45 = vmul.f32 %v3069_v35, %v5699_v6  ;;  %v3106_v11 = vmul.f32 3.8918573e-05, %v5732_v44  ;;  %vm2921_vm7 = vweird.f32 %v5686_v46  ;;  %3442 = vmatpush.bf16.msra.mxu0 %v4560_v53  ;;  %v4552_v53 = vld [vmem:[%s5040_s7 + $0x70] sm:$0xff] }
 0x98d   : > { %v2957_v8 = vmul.f32 %v5741_v57, %v5703_v42  ;;  %v5766_v12 = vmin.f32 %v2973_v36, 16.0  ;;  %v2927_v37 = vand.u32 2147483648, %v5686_v46  ;;  %v5771_v2 = vmul.f32 %v2944_v1, %v5627_v40  ;;  %v4568_v46 = vld [vmem:[%s5040_s7 + $0xf0] sm:$0xff] }
 0x98e   : > { %v2918_v52 = vsub.f32 1.0, %v2917_v43  ;;  %v3096_v62 = vadd.f32 0.00028619796, %v3095_v7  ;;  %vm5775_vm8 = vcmp.eq.f32.partialorder %v2925_v63, 8.507059e+37  ;;  %v2965_v39 = vand.u32 2147483647, %v5703_v42  ;;  %3456 = vmatpush.bf16.msrb.mxu1 %v4568_v46 }
 0x98f   : > { %v2872_v17 = vmul.f32 %v2871_v5, %v5670_v61  ;;  %v3071_v19 = vadd.f32 0.112945676, %v3070_v45  ;;  %vm2922_vm9 = vweird.f32 %v5712_v13  ;;  %v2958_v43 = vsub.f32 1.0, %v2957_v8  ;;  %v4545_v8 = vld [vmem:[%s5040_s7 + $0x38] sm:$0xff] }
 0x990   : > { %v2919_v28 = vmul.f32 %v5712_v13, %v2918_v52  ;;  %v2967_v40 = vand.u32 2147483648, %v5703_v42  ;;  %v5784_v22 = vpop.eup %4723  ;;  %v3060_v38 = vadd.f32 0.05243302, %v3059_v10  ;;  %v3107_v24 = vadd.f32 0.001143296, %v3106_v11  ;;  %vm5797_vm11 = vmor %vm2921_vm7, %vm2922_vm9  ;;  %3413 = vmatpush.bf16.msra.mxu2 %v4545_v8 }
 0x991   : > { %v3072_v23 = vmul.f32 %v3071_v19, %v5699_v6  ;;  %v2975_v29 = vmul.f32 2.1237322e-06, %v5766_v12  ;;  %v2928_v33 = vor.u32 1.1754944e-38, %v2927_v37  ;;  %vm2961_vm10 = vweird.f32 %v5703_v42  ;;  %v4567_v19 = vld [vmem:[%s5040_s7 + $0xe8] sm:$0xff] }
 0x992   : > { %v2920_v18 = vadd.f32 %v5712_v13, %v2919_v28  ;;  %v2823_v34 = vmul.f32 %v2822_v3, %v5658_v50  ;;  %v3097_v52 = vmul.f32 %v3096_v62, %v5732_v44  ;;  %v2986_v56 = vmul.f32 3.8918573e-05, %v5766_v12  ;;  %v4553_v3 = vld [vmem:[%s5040_s7 + $0x78] sm:$0xff]  ;;  %3457 = vmatpush.bf16.msrb.mxu1 %v4567_v19 }
 0x993   : > { %v2873_v63 = vadd.f32 0.4994258, %v2872_v17  ;;  %v3073_v1 = vadd.f32 0.4994258, %v3072_v23  ;;  %v3108_v35 = vmul.f32 %v3107_v24, %v5732_v44  ;;  %v2976_v5 = vadd.f32 0.00028619796, %v2975_v29  ;;  %3427 = vmatpush.bf16.msrb.mxu3 %v4553_v3 }
 0x994   : > { %v2924_v50 = vsel %vm5797_vm11, %v5712_v13, %v2920_v18  ;;  %v2959_v7 = vmul.f32 %v5741_v57, %v2958_v43  ;;  %v2837_v36 = vmul.f32 %v5784_v22, %v5729_v32  ;;  %v2987_v28 = vadd.f32 0.001143296, %v2986_v56  ;;  %v4559_v17 = vld [vmem:[%s5040_s7 + $0xa8] sm:$0xff]  ;;  %v4544_v56 = vld [vmem:[%s5040_s7 + $0x30] sm:$0xff] }
 0x995   : > { %v3061_v45 = vmul.f32 %v3060_v38, %v5699_v6  ;;  %v3074_v10 = vmul.f32 %v3073_v1, %v5699_v6  ;;  %v3109_v11 = vadd.f32 0.014752088, %v3108_v35  ;;  %v2977_v37 = vmul.f32 %v2976_v5, %v5766_v12  ;;  %3443 = vmatpush.bf16.msra.mxu0 %v4559_v17  ;;  %3414 = vmatpush.bf16.msra.mxu2 %v4544_v56  ;;  %v4543_v3 = vld [vmem:[%s5040_s7 + $0x28] sm:$0xff] }
 0x996   : > { %vm2962_vm12 = vweird.f32 %v5741_v57  ;;  %vm5815_vm13 = vcmp.eq.f32.partialorder %v2965_v39, 8.507059e+37  ;;  %v3098_v62 = vadd.f32 0.0036580483, %v3097_v52  ;;  %v2988_v14 = vmul.f32 %v2987_v28, %v5766_v12 }
 0x997   : > { %v2847_v18 = vand.u32 2147483648, %v5729_v32  ;;  %v2874_v43 = vmul.f32 %v2873_v63, %v5670_v61  ;;  %v5824_v38 = vadd.f32 1.0, %v3074_v10  ;;  %v3110_v39 = vmul.f32 %v3109_v11, %v5732_v44  ;;  %vm5845_vm14 = vmor %vm2961_vm10, %vm2962_vm12  ;;  %3428 = vmatpush.bf16.msrb.mxu3 %v4552_v53 }
 0x998   : > { %v2929_v23 = vsel %vm5775_vm8, %v2928_v33, %v2924_v50  ;;  %v2960_v24 = vadd.f32 %v5741_v57, %v2959_v7  ;;  %v2978_v29 = vadd.f32 0.0036580483, %v2977_v37  ;;  %v2989_v52 = vadd.f32 0.014752088, %v2988_v14  ;;  %v4558_v50 = vld [vmem:[%s5040_s7 + $0xa0] sm:$0xff]  ;;  %v4557_v14 = vld [vmem:[%s5040_s7 + $0x98] sm:$0xff] }
 0x999   : > { %v2838_v60 = vsub.f32 1.0, %v2837_v36  ;;  %v3062_v1 = vadd.f32 0.18741608, %v3061_v45  ;;  %4725 = vrcp.f32 %v5824_v38  ;;  %v5835_v63 = vadd.f32 %v2766_v15, %v2574_v41  ;;  %v4566_v36 = vld [vmem:[%s5040_s7 + $0xe0] sm:$0xff]  ;;  %3444 = vmatpush.bf16.msra.mxu0 %v4558_v50  ;;  %v4551_v45 = vld [vmem:[%s5040_s7 + $0x68] sm:$0xff]  ;;  %3415 = vmatpush.bf16.msra.mxu2 %v4543_v3  ;;  %v4565_v15 = vld [vmem:[%s5040_s7 + $0xd8] sm:$0xff] }
 0x99a   : > { %v2968_v35 = vor.u32 1.1754944e-38, %v2967_v40  ;;  %v5837_v16 = vadd.f32 1.1283791, %v2823_v34  ;;  %v3099_v33 = vmul.f32 %v3098_v62, %v5732_v44  ;;  %v3111_v5 = vadd.f32 0.112945676, %v3110_v39  ;;  %3458 = vmatpush.bf16.msrb.mxu1 %v4566_v36  ;;  %v4556_v7 = vld [vmem:[%s5040_s7 + $0x90] sm:$0xff] }
 0x99b   : > { %v2845_v30 = vand.u32 2147483647, %v5729_v32  ;;  %v5850_v41 = vor.u32 1.1754944e-38, %v2847_v18  ;;  %v5852_v40 = vadd.f32 1.0, %v2874_v43  ;;  %v2990_v34 = vmul.f32 %v2989_v52, %v5766_v12  ;;  %3429 = vmatpush.bf16.msrb.mxu3 %v4551_v45  ;;  %v4550_v52 = vld [vmem:[%s5040_s7 + $0x60] sm:$0xff]  ;;  %v4541_v45 = vld [vmem:[%s5040_s7 + $0x18] sm:$0xff] }
 0x99c   : > { %v5857_v28 = vmul.f32 %v2929_v23, %v5762_v9  ;;  %v2964_v42 = vsel %vm5845_vm14, %v5741_v57, %v2960_v24  ;;  %v3112_v46 = vmul.f32 %v3111_v5, %v5732_v44  ;;  %v2979_v8 = vmul.f32 %v2978_v29, %v5766_v12  ;;  %v4542_v29 = vld [vmem:[%s5040_s7 + $0x20] sm:$0xff] }
 0x99d   : > { %v2839_v10 = vmul.f32 %v5784_v22, %v2838_v60  ;;  %v3063_v11 = vmul.f32 %v3062_v1, %v5699_v6  ;;  %v2991_v37 = vadd.f32 0.112945676, %v2990_v34  ;;  %v5869_v9 = vmul.f32 0.70710677, %v5835_v63  ;;  %3445 = vmatpush.bf16.msra.mxu0 %v4557_v14  ;;  %3416 = vmatpush.bf16.msra.mxu2 %v4542_v29  ;;  %v4540_v29 = vld [vmem:[%s5040_s7 + $0x10] sm:$0xff]  ;;  %v4562_v39 = vld [vmem:[%s5040_s7 + $0xc0] sm:$0xff] }
 0x99e   : > { %vm2841_vm15 = vweird.f32 %v5729_v32  ;;  %vm2842_vm0 = vweird.f32 %v5784_v22  ;;  %v3100_v57 = vadd.f32 0.05243302, %v3099_v33  ;;  %v3113_v62 = vadd.f32 0.4994258, %v3112_v46  ;;  %3459 = vmatpush.bf16.msrb.mxu1 %v4565_v15 }
 0x99f   : > { %v5875_v17 = vpop.eup %4725  ;;  %v2969_v6 = vsel %vm5815_vm13, %v2968_v35, %v2964_v42  ;;  %4727 = vrcp.f32 %v5852_v40  ;;  %v2992_v19 = vmul.f32 %v2991_v37, %v5766_v12  ;;  %v3013_v18 = vmul.f32 %v5869_v9, %v5869_v9  ;;  %3430 = vmatpush.bf16.msrb.mxu3 %v4550_v52  ;;  %vm5910_vm2 = vmor %vm2841_vm15, %vm2842_vm0 }
 0x9a0   : > { %v4254_v43 = vclamps-f32 %v5857_v28, 1.0  ;;  %vm5884_vm1 = vcmp.eq.f32.partialorder %v2845_v30, 8.507059e+37  ;;  %v3077_v23 = vmul.f32 %v5875_v17, %v5824_v38  ;;  %v3114_v13 = vmul.f32 %v3113_v62, %v5732_v44  ;;  %v4564_v30 = vld [vmem:[%s5040_s7 + $0xd0] sm:$0xff] }
 0x9a1   : > { %v2980_v24 = vadd.f32 0.05243302, %v2979_v8  ;;  %v2840_v56 = vadd.f32 %v5784_v22, %v2839_v10  ;;  %v3064_v53 = vadd.f32 1.1283791, %v3063_v11  ;;  %v2993_v60 = vadd.f32 0.4994258, %v2992_v19  ;;  %3446 = vmatpush.bf16.msra.mxu0 %v4556_v7  ;;  %3417 = vmatpush.bf16.msra.mxu2 %v4541_v45 }
 0x9a2   : > { %v5894_v1 = vmin.f32 %v3013_v18, 16.0  ;;  %v3078_v35 = vsub.f32 1.0, %v3077_v23  ;;  %v3085_v33 = vand.u32 2147483647, %v5824_v38  ;;  %v3101_v5 = vmul.f32 %v3100_v57, %v5732_v44  ;;  %v4549_v10 = vld [vmem:[%s5040_s7 + $0x58] sm:$0xff]  ;;  %3460 = vmatpush.bf16.msrb.mxu1 %v4564_v30  ;;  %v4555_v18 = vld [vmem:[%s5040_s7 + $0x88] sm:$0xff] }
 0x9a3   : > { %v5898_v50 = vadd.f32 1.0, %v3114_v13  ;;  %v3087_v34 = vand.u32 2147483648, %v5824_v38  ;;  %v2994_v36 = vmul.f32 %v2993_v60, %v5766_v12  ;;  %vm3082_vm3 = vweird.f32 %v5875_v17  ;;  %3431 = vmatpush.bf16.msrb.mxu3 %v4549_v10 }
 0x9a4   : > { %v3015_v28 = vmul.f32 2.1237322e-06, %v5894_v1  ;;  %v3026_v42 = vmul.f32 3.8918573e-05, %v5894_v1  ;;  %v3079_v8 = vmul.f32 %v5875_v17, %v3078_v35  ;;  %v2981_v3 = vmul.f32 %v2980_v24, %v5766_v12 }
 0x9a5   : > { %4729 = vrcp.f32 %v5898_v50  ;;  %v5920_v11 = vpop.eup %4727  ;;  %v5923_v32 = vmul.f32 %v2969_v6, %v5771_v2  ;;  %v2844_v37 = vsel %vm5910_vm2, %v5784_v22, %v2840_v56  ;;  %v5928_v57 = vadd.f32 1.0, %v2994_v36  ;;  %v4563_v2 = vld [vmem:[%s5040_s7 + $0xc8] sm:$0xff]  ;;  %3447 = vmatpush.bf16.msra.mxu0 %v4555_v18  ;;  %3418 = vmatpush.bf16.msra.mxu2 %v4540_v29 }
 0x9a6   : > { %v3016_v62 = vadd.f32 0.00028619796, %v3015_v28  ;;  %v3080_v14 = vadd.f32 %v5875_v17, %v3079_v8  ;;  %vm3081_vm4 = vweird.f32 %v5824_v38  ;;  %v3102_v15 = vadd.f32 0.18741608, %v3101_v5  ;;  %3461 = vmatpush.bf16.msrb.mxu1 %v4563_v2 }
 0x9a7   : > { %v3027_v19 = vadd.f32 0.001143296, %v3026_v42  ;;  %v3135_v6 = vadd.f32 1.0, %v4254_v43  ;;  %v3065_v23 = vmul.f32 %v3064_v53, %v5681_v26  ;;  %vm3083_vm5 = vmor %vm3081_vm4, %vm3082_vm3  ;;  %v3088_v22 = vor.u32 1.1754944e-38, %v3087_v34  ;;  %v4548_v43 = vld [vmem:[%s5040_s7 + $0x50] sm:$0xff]  ;;  %v4547_v42 = vld [vmem:[%s5040_s7 + $0x48] sm:$0xff] }
 0x9a8   : > { %4731 = vrcp.f32 %v5928_v57  ;;  %v3084_v38 = vsel %vm3083_vm5, %v5875_v17, %v3080_v14  ;;  %vm3086_vm6 = vcmp.eq.f32.partialorder %v3085_v33, 8.507059e+37  ;;  %v2982_v13 = vadd.f32 0.18741608, %v2981_v3  ;;  %3432 = vmatpush.bf16.msrb.mxu3 %v4548_v43 }
 0x9a9   : > { %v3017_v24 = vmul.f32 %v3016_v62, %v5894_v1  ;;  %v2849_v26 = vsel %vm5884_vm1, %v5850_v41, %v2844_v37  ;;  %v5947_v52 = vmul.f32 %v5920_v11, %v5852_v40  ;;  %v3089_v56 = vsel %vm3086_vm6, %v3088_v22, %v3084_v38  ;;  %v4554_v41 = vld [vmem:[%s5040_s7 + $0x80] sm:$0xff] }
 0x9aa   : > { %v3028_v17 = vmul.f32 %v3027_v19, %v5894_v1  ;;  %v2825_v60 = vmul.f32 %v5837_v16, %v5647_v55  ;;  %v5953_v35 = vadd.f32 0.18741608, %v5751_v51  ;;  %v3090_v33 = vmul.f32 %v3089_v56, %v3065_v23  ;;  %3448 = vmatpush.bf16.msra.mxu0 %v4554_v41  ;;  %3462 = vmatpush.bf16.msrb.mxu1 %v4562_v39  ;;  %v4546_v23 = vld [vmem:[%s5040_s7 + $0x40] sm:$0xff] }
 0x9ab   : > { %v4730_v53 = vpop.eup %4729  ;;  %v3103_v5 = vmul.f32 %v3102_v15, %v5732_v44  ;;  %v3143_v7 = vmul.f32 %v3135_v6, %v5738_v48  ;;  %v4255_v30 = vclamps-f32 %v5923_v32, 1.0  ;;  %v2983_v16 = vmul.f32 %v2982_v13, %v5766_v12  ;;  %v4539_v44 = vld [vmem:[%s5040_s7 + $0x8] sm:$0xff]  ;;  %v4538_v6 = vld [vmem:[%s5040_s7] sm:$0xff] }
 0x9ac   : > { %v3117_v34 = vmul.f32 %v4730_v53, %v5898_v50  ;;  %v3029_v36 = vadd.f32 0.014752088, %v3028_v17  ;;  %v5961_v55 = vmul.f32 %v2849_v26, %v2825_v60  ;;  %v4258_v51 = vclamps-f32 %v3090_v33, 1.0  ;;  %3419 = vmatpush.bf16.msra.mxu2 %v4539_v44  ;;  %3433 = vmatpush.bf16.msrb.mxu3 %v4547_v42 }
 0x9ad   : > { %v3018_v28 = vadd.f32 0.0036580483, %v3017_v24  ;;  %v2878_v8 = vsub.f32 1.0, %v5947_v52  ;;  %v3127_v48 = vand.u32 2147483648, %v5898_v50  ;;  %v3104_v32 = vadd.f32 1.1283791, %v3103_v5 }
 0x9ae   : > { %v4732_v46 = vpop.eup %4731  ;;  %v3118_v3 = vsub.f32 1.0, %v3117_v34  ;;  %v3030_v45 = vmul.f32 %v3029_v36, %v5894_v1  ;;  %v3139_v10 = vadd.f32 1.0, %v4258_v51  ;;  %vm3121_vm7 = vweird.f32 %v5898_v50 }
 0x9af   : > { %v2997_v12 = vmul.f32 %v4732_v46, %v5928_v57  ;;  %vm3122_vm8 = vweird.f32 %v4730_v53  ;;  %v3125_v62 = vand.u32 2147483647, %v5898_v50  ;;  %v2984_v19 = vadd.f32 1.1283791, %v2983_v16 }
 0x9b0   : > { %v3119_v37 = vmul.f32 %v4730_v53, %v3118_v3  ;;  %v3031_v14 = vadd.f32 0.112945676, %v3030_v45  ;;  %v3147_v15 = vmul.f32 %v3139_v10, %v5747_v59  ;;  %v3019_v2 = vmul.f32 %v3018_v28, %v5894_v1  ;;  %vm3123_vm9 = vmor %vm3121_vm7, %vm3122_vm8  ;;  %3420 = vmatpush.bf16.msra.mxu2 %v4538_v6  ;;  %3434 = vmatpush.bf16.msrb.mxu3 %v4546_v23 }
 0x9b1   : > { %v2998_v18 = vsub.f32 1.0, %v2997_v12  ;;  %v3128_v38 = vor.u32 1.1754944e-38, %v3127_v48  ;;  %v3007_v13 = vand.u32 2147483648, %v5928_v57  ;;  %vm3002_vm10 = vweird.f32 %v4732_v46 }
 0x9b2   : > { %v3120_v22 = vadd.f32 %v4730_v53, %v3119_v37  ;;  %v3032_v24 = vmul.f32 %v3031_v14, %v5894_v1  ;;  %v3151_v29 = vpack.c.bf16 %v3147_v15, %v3143_v7  ;;  %v3005_v59 = vand.u32 2147483647, %v5928_v57 }
 0x9b3   : > { %v2999_v43 = vmul.f32 %v4732_v46, %v2998_v18  ;;  %v3105_v26 = vmul.f32 %v3104_v32, %v5709_v31  ;;  %vm3126_vm11 = vcmp.eq.f32.partialorder %v3125_v62, 8.507059e+37  ;;  %vm3001_vm12 = vweird.f32 %v5928_v57 }
 0x9b4   : > { %v3124_v52 = vsel %vm3123_vm9, %v4730_v53, %v3120_v22  ;;  %v3033_v56 = vadd.f32 0.4994258, %v3032_v24  ;;  %v3020_v33 = vadd.f32 0.05243302, %v3019_v2  ;;  %3449 = vmatmul.bf16.vlgmr.msra.gmra.mxu0 %v3151_v29  ;;  %v2879_v50 = vmul.f32 %v5920_v11, %v2878_v8  ;;  %vm3003_vm13 = vmor %vm3001_vm12, %vm3002_vm10 }
 0x9b5   : > { %v3129_v17 = vsel %vm3126_vm11, %v3128_v38, %v3124_v52  ;;  %v3000_v60 = vadd.f32 %v4732_v46, %v2999_v43  ;;  %v3008_v41 = vor.u32 1.1754944e-38, %v3007_v13  ;;  %v4252_v31 = vclamps-f32 %v5961_v55, 1.0 }
 0x9b6   : > { %v3130_v5 = vmul.f32 %v3129_v17, %v3105_v26  ;;  %v3034_v39 = vmul.f32 %v3033_v56, %v5894_v1  ;;  %v2985_v53 = vmul.f32 %v2984_v19, %v5735_v47  ;;  %vm3006_vm14 = vcmp.eq.f32.partialorder %v3005_v59, 8.507059e+37 }
 0x9b7   : > { %v3004_v7 = vsel %vm3003_vm13, %v4732_v46, %v3000_v60  ;;  %v3136_v34 = vadd.f32 1.0, %v4255_v30  ;;  %v2863_v16 = vmul.f32 %v5953_v35, %v5670_v61  ;;  %v2804_v28 = vmul.f32 0.5, %v5697_v4 }
 0x9b8   : > { %v4259_v36 = vclamps-f32 %v3130_v5, 1.0  ;;  %v3009_v51 = vsel %vm3006_vm14, %v3008_v41, %v3004_v7  ;;  %v3035_v57 = vadd.f32 1.0, %v3034_v39  ;;  %v3021_v42 = vmul.f32 %v3020_v33, %v5894_v1 }
 0x9b9   : > { %v3010_v44 = vmul.f32 %v3009_v51, %v2985_v53  ;;  %v2880_v8 = vadd.f32 %v5920_v11, %v2879_v50  ;;  %vm2882_vm15 = vweird.f32 %v5920_v11  ;;  %v3133_v47 = vadd.f32 1.0, %v4252_v31 }
 0x9ba   : > { %v3140_v55 = vadd.f32 1.0, %v4259_v36  ;;  %4733 = vrcp.f32 %v3035_v57  ;;  %v2887_v30 = vand.u32 2147483648, %v5852_v40  ;;  %v3144_v3 = vmul.f32 %v3136_v34, %v5744_v58 }
 0x9bb   : > { %v4256_v46 = vclamps-f32 %v3010_v44, 1.0  ;;  %vm2881_vm0 = vweird.f32 %v5852_v40  ;;  %v2885_v61 = vand.u32 2147483647, %v5852_v40  ;;  %v2797_v35 = vmul.f32 0.5, %v5636_v49 }
 0x9bc   : > { %v3148_v4 = vmul.f32 %v3140_v55, %v2804_v28  ;;  %vm2883_vm1 = vmor %vm2881_vm0, %vm2882_vm15  ;;  %v2801_v48 = vmul.f32 0.5, %v5716_v25  ;;  %v3022_v10 = vadd.f32 0.18741608, %v3021_v42  ;;  %v2864_v32 = vadd.f32 1.1283791, %v2863_v16 }
 0x9bd   : > { %v3137_v45 = vadd.f32 1.0, %v4256_v46  ;;  %v2884_v12 = vsel %vm2883_vm1, %v5920_v11, %v2880_v8  ;;  %v3141_v62 = vmul.f32 %v3133_v47, %v2797_v35  ;;  %v2888_v14 = vor.u32 1.1754944e-38, %v2887_v30 }
 0x9be   : > { %v3152_v37 = vpack.c.bf16 %v3148_v4, %v3144_v3  ;;  %vm2886_vm2 = vcmp.eq.f32.partialorder %v2885_v61, 8.507059e+37  ;;  %v3023_v18 = vmul.f32 %v3022_v10, %v5894_v1  ;;  %v2865_v2 = vmul.f32 %v2864_v32, %v5656_v0 }
 0x9bf   : > { %v3145_v15 = vmul.f32 %v3137_v45, %v2801_v48  ;;  %v2889_v19 = vsel %vm2886_vm2, %v2888_v14, %v2884_v12  ;;  %v3047_v23 = vand.u32 2147483648, %v3035_v57  ;;  %v3045_v38 = vand.u32 2147483647, %v3035_v57 }
 0x9c0   : > { %v4734_v58 = vpop.eup %4733  ;;  %3463 = vmatmul.bf16.vlgmr.msrb.gmra.mxu1 %v3152_v37  ;;  %v2890_v6 = vmul.f32 %v2889_v19, %v2865_v2  ;;  %v3024_v22 = vadd.f32 1.1283791, %v3023_v18  ;;  %vm3041_vm4 = vweird.f32 %v3035_v57  ;;  %v2798_v56 = vmul.f32 0.5, %v5644_v54  ;;  %v4679_v2 = vld [vmem:[%s1095_s3] ss:$0 sm:$0xff]  ;;  %s6283_s3 = sld [smem:[#allocation35_spill]] (!%p4388_p9) }
 0x9c1   : > { %v3149_v40 = vpack.c.bf16 %v3145_v15, %v3141_v62  ;;  %v3037_v49 = vmul.f32 %v4734_v58, %v3035_v57  ;;  %vm3042_vm3 = vweird.f32 %v4734_v58  ;;  %v3048_v24 = vor.u32 1.1754944e-38, %v3047_v23 }
 0x9c2   : > { %vm3043_vm5 = vmor %vm3041_vm4, %vm3042_vm3  ;;  %v4253_v29 = vclamps-f32 %v2890_v6, 1.0  ;;  %v3025_v43 = vmul.f32 %v3024_v22, %v5869_v9  ;;  %vm3046_vm6 = vcmp.eq.f32.partialorder %v3045_v38, 8.507059e+37  ;;  %v2802_v17 = vmul.f32 0.5, %v5835_v63  ;;  %v4678_v9 = vld [vmem:[%s1092_s16] ss:$0 sm:$0xff] }
 0x9c3   : > { %v3038_v25 = vsub.f32 1.0, %v3037_v49  ;;  %3421 = vmatmul.bf16.vlgmr.msra.gmra.mxu2 %v3149_v40  ;;  %v4680_v6 = vld [vmem:[%s1098_s14] ss:$0 sm:$0xff] }
 0x9c4   : > { %v3134_v26 = vadd.f32 1.0, %v4253_v29 }
 0x9c5   : > { %v3039_v11 = vmul.f32 %v4734_v58, %v3038_v25 }
 0x9c6   : > { %v3142_v33 = vmul.f32 %v3134_v26, %v2798_v56  ;;  %s6284_s23 = smov (!%p4388_p9), %s6283_s3 }
 0x9c7   : > { %v3040_v13 = vadd.f32 %v4734_v58, %v3039_v11 }
 0x9c9   : > { %v3044_v1 = vsel %vm3043_vm5, %v4734_v58, %v3040_v13 }
 0x9ca   : > { %v3049_v59 = vsel %vm3046_vm6, %v3048_v24, %v3044_v1 }
 0x9cb   : > { %v3050_v0 = vmul.f32 %v3049_v59, %v3025_v43 }
 0x9cd   : > { %v4257_v52 = vclamps-f32 %v3050_v0, 1.0 }
 0x9cf   : > { %v3138_v60 = vadd.f32 1.0, %v4257_v52 }
 0x9d1   : > { %v3146_v50 = vmul.f32 %v3138_v60, %v2802_v17 }
 0x9d3   : > { %v3150_v5 = vpack.c.bf16 %v3146_v50, %v3142_v33 }
 0x9d5   : > { %3435 = vmatmul.bf16.vlgmr.msrb.gmra.mxu3 %v3150_v5 }
 0xa31   : > { %v3450_v31 = vpop.f32.mrf.mxu0 }
 0xa39   : > { %v3452_v44 = vpop.f32.mrf.mxu0 }
 0xa3d   : > { %v3464_v34 = vpop.f32.mrf.mxu1 }
 0xa45   : > { %v3466_v8 = vpop.f32.mrf.mxu1 }
 0xa46   : > { %v3422_v41 = vpop.f32.mrf.mxu2 }
 0xa47   : > { %v3423_v39 = vadd.f32 %v4678_v9, %v3422_v41 }
 0xa4e   : > { %v3424_v36 = vpop.f32.mrf.mxu2 }
 0xa4f   : > { %v3425_v51 = vadd.f32 %v4678_v9, %v3424_v36 }
 0xa58   : > { %v3436_v53 = vpop.f32.mrf.mxu3 }
 0xa59   : > { %v3437_v7 = vadd.f32 %v3436_v53, %v3423_v39 }
 0xa5b   : > { %v3451_v54 = vadd.f32 %v3450_v31, %v3437_v7 }
 0xa5d   : > { %v3465_v63 = vadd.f32 %v3464_v34, %v3451_v54 }
 0xa5f   : > { %v3469_v57 = vadd.f32 %v3465_v63, %v5605_v21 }
 0xa60   : > { %v3438_v16 = vpop.f32.mrf.mxu3 }
 0xa61   : > { %v3439_v28 = vadd.f32 %v3438_v16, %v3425_v51  ;;  %3473 = vadd.xlane.f32.xlu2 %v3469_v57 }
 0xa63   : > { %v3453_v42 = vadd.f32 %v3452_v44, %v3439_v28 }
 0xa65   : > { %v3467_v55 = vadd.f32 %v3466_v8, %v3453_v42 }
 0xa67   : > { %v3470_v47 = vadd.f32 %v3467_v55, %v5607_v27 }
 0xa69   : > { %3475 = vadd.xlane.f32.xlu2 %v3470_v47 }
 0xad4   : > { %v3474_v30 = vpop.xlane.xlu2 %3473 }
 0xad5   : > { %v3477_v46 = vmul.f32 %v3474_v30, %v5515_v20 }
 0xad7   : > { %v3479_v3 = vsub.f32 %v3469_v57, %v3477_v46 }
 0xad9   : > { %v3481_v61 = vmul.f32 %v3479_v3, %v3479_v3 }
 0xadb   : > { %3483 = vadd.xlane.f32.xlu1 %v3481_v61 }
 0xadc   : > { %v3476_v4 = vpop.xlane.xlu2 %3475 }
 0xadd   : > { %v3478_v35 = vmul.f32 %v3476_v4, %v5515_v20 }
 0xadf   : > { %v3480_v21 = vsub.f32 %v3470_v47, %v3478_v35 }
 0xae1   : > { %v3482_v48 = vmul.f32 %v3480_v21, %v3480_v21 }
 0xae3   : > { %3485 = vadd.xlane.f32.xlu2 %v3482_v48 }
 0xb4e   : > { %v3484_v45 = vpop.xlane.xlu1 %3483 }
 0xb4f   : > { %v3487_v10 = vmul.f32 %v3484_v45, %v5515_v20 }
 0xb51   : > { %v3489_v32 = vadd.f32 1e-05, %v3487_v10 }
 0xb53   : > { %4735 = vrsqrt.f32 %v3489_v32  ;;  %vm3497_vm8 = vweird.f32 %v3489_v32 }
 0xb56   : > { %v3486_v27 = vpop.xlane.xlu2 %3485 }
 0xb57   : > { %v3488_v12 = vmul.f32 %v3486_v27, %v5515_v20 }
 0xb59   : > { %v4736_v37 = vpop.eup %4735  ;;  %v3490_v62 = vadd.f32 1e-05, %v3488_v12 }
 0xb5a   : > { %v3492_v14 = vmul.f32 %v4736_v37, %v3489_v32  ;;  %vm3498_vm7 = vweird.f32 %v4736_v37 }
 0xb5b   : > { %4737 = vrsqrt.f32 %v3490_v62  ;;  %vm3499_vm9 = vmor %vm3497_vm8, %vm3498_vm7  ;;  %vm3507_vm11 = vweird.f32 %v3490_v62 }
 0xb5c   : > { %v3493_v15 = vmul.f32 %v4736_v37, %v3492_v14 }
 0xb5e   : > { %v3494_v58 = vmul.f32 0.5, %v3493_v15 }
 0xb60   : > { %v3495_v19 = vsub.f32 1.5, %v3494_v58 }
 0xb61   : > { %v4738_v40 = vpop.eup %4737 }
 0xb62   : > { %v3496_v18 = vmul.f32 %v4736_v37, %v3495_v19  ;;  %v3502_v49 = vmul.f32 %v4738_v40, %v3490_v62  ;;  %vm3508_vm10 = vweird.f32 %v4738_v40 }
 0xb63   : > { %vm3509_vm12 = vmor %vm3507_vm11, %vm3508_vm10 }
 0xb64   : > { %v3500_v20 = vsel %vm3499_vm9, %v4736_v37, %v3496_v18  ;;  %v3503_v25 = vmul.f32 %v4738_v40, %v3502_v49 }
 0xb65   : > { %v3511_v23 = vmul.f32 %v3500_v20, %v3479_v3 }
 0xb66   : > { %v3504_v22 = vmul.f32 0.5, %v3503_v25 }
 0xb67   : > { %v3516_v11 = vmul.f32 %v4679_v2, %v3511_v23 }
 0xb68   : > { %v3505_v38 = vsub.f32 1.5, %v3504_v22 }
 0xb69   : > { %v6028_v13 = vadd.f32 %v4680_v6, %v3516_v11 }
 0xb6a   : > { %v3506_v24 = vmul.f32 %v4738_v40, %v3505_v38 }
 0xb6b   : > { %3523 = vst [vmem:[#allocation2] sm:$0xff] %v6028_v13 }
 0xb6c   : > { %v3510_v29 = vsel %vm3509_vm12, %v4738_v40, %v3506_v24 }
 0xb6d   : > { %v3512_v43 = vmul.f32 %v3510_v29, %v3480_v21 }
 0xb6f   : > { %v3517_v1 = vmul.f32 %v4679_v2, %v3512_v43  ;;  %3528 = sbr.rel (%p4388_p9) target bundleno = 3104 (0xc20), region = 140 }
 0xb71   : > { %v6031_v59 = vadd.f32 %v4680_v6, %v3517_v1 }
 0xb73   : > { %3524 = vst [vmem:[#allocation2 + $0x8] sm:$0xff] %v6031_v59 }
 0xb74   : > { %v4447_v0 = vld [vmem:[%s6283_s3 + $0x70] sm:$0xf]  ;;  %v4585_v26 = vld [vmem:[%s6284_s23 + $0x74] sm:$0xf0]  ;;  %v4584_v52 = vld [vmem:[%s6284_s23 + $0x74] sm:$0xf]  ;;  %v3529_v18 = vpack.c.bf16 %v6031_v59, %v6028_v13 }
 0xb75   : > { %v4448_v56 = vor.u32 %v4585_v26, %v4447_v0  ;;  %v4449_v17 = vld [vmem:[%s6284_s23 + $0x78] sm:$0xf0]  ;;  %v4439_v60 = vld [vmem:[%s6284_s23 + $0x60] sm:$0xf]  ;;  %v4583_v33 = vld [vmem:[%s6284_s23 + $0x64] sm:$0xf0] }
 0xb76   : > { %v4452_v50 = vor.u32 %v4584_v52, %v4449_v17  ;;  %v4582_v5 = vld [vmem:[%s6284_s23 + $0x64] sm:$0xf]  ;;  %v4441_v41 = vld [vmem:[%s6284_s23 + $0x68] sm:$0xf0]  ;;  %v4440_v9 = vor.u32 %v4583_v33, %v4439_v60  ;;  %v4431_v31 = vld [vmem:[%s6284_s23 + $0x50] sm:$0xf] }
 0xb77   : > { %3632 = vmatpush.bf16.msra.mxu0 %v4448_v56  ;;  %v4444_v39 = vor.u32 %v4582_v5, %v4441_v41  ;;  %v4581_v53 = vld [vmem:[%s6284_s23 + $0x54] sm:$0xf0]  ;;  %v4580_v7 = vld [vmem:[%s6284_s23 + $0x54] sm:$0xf]  ;;  %v4433_v34 = vld [vmem:[%s6284_s23 + $0x58] sm:$0xf0] }
 0xb78   : > { %3646 = vmatpush.bf16.msra.mxu1 %v4452_v50  ;;  %v4432_v36 = vor.u32 %v4581_v53, %v4431_v31  ;;  %v4436_v54 = vor.u32 %v4580_v7, %v4433_v34  ;;  %v4423_v51 = vld [vmem:[%s6284_s23 + $0x40] sm:$0xf]  ;;  %v4579_v63 = vld [vmem:[%s6284_s23 + $0x44] sm:$0xf0]  ;;  %v4578_v57 = vld [vmem:[%s6284_s23 + $0x44] sm:$0xf] }
 0xb79   : > { %v4425_v16 = vld [vmem:[%s6284_s23 + $0x48] sm:$0xf0]  ;;  %v4424_v28 = vor.u32 %v4579_v63, %v4423_v51  ;;  %v4415_v42 = vld [vmem:[%s6284_s23 + $0x30] sm:$0xf]  ;;  %v4577_v8 = vld [vmem:[%s6284_s23 + $0x34] sm:$0xf0] }
 0xb7a   : > { %v4428_v44 = vor.u32 %v4578_v57, %v4425_v16  ;;  %v4576_v55 = vld [vmem:[%s6284_s23 + $0x34] sm:$0xf]  ;;  %v4417_v47 = vld [vmem:[%s6284_s23 + $0x38] sm:$0xf0]  ;;  %v4416_v30 = vor.u32 %v4577_v8, %v4415_v42  ;;  %v4407_v3 = vld [vmem:[%s6284_s23 + $0x20] sm:$0xf] }
 0xb7b   : > { %3633 = vmatpush.bf16.msra.mxu0 %v4440_v9  ;;  %v4420_v46 = vor.u32 %v4576_v55, %v4417_v47  ;;  %v4575_v61 = vld [vmem:[%s6284_s23 + $0x24] sm:$0xf0]  ;;  %v4574_v4 = vld [vmem:[%s6284_s23 + $0x24] sm:$0xf]  ;;  %v4409_v35 = vld [vmem:[%s6284_s23 + $0x28] sm:$0xf0] }
 0xb7c   : > { %3647 = vmatpush.bf16.msra.mxu1 %v4444_v39  ;;  %v4408_v21 = vor.u32 %v4575_v61, %v4407_v3  ;;  %v4412_v48 = vor.u32 %v4574_v4, %v4409_v35  ;;  %v4399_v45 = vld [vmem:[%s6284_s23 + $0x10] sm:$0xf]  ;;  %v4573_v10 = vld [vmem:[%s6284_s23 + $0x14] sm:$0xf0]  ;;  %v4572_v32 = vld [vmem:[%s6284_s23 + $0x14] sm:$0xf] }
 0xb7d   : > { %v4401_v27 = vld [vmem:[%s6284_s23 + $0x18] sm:$0xf0]  ;;  %v4400_v12 = vor.u32 %v4573_v10, %v4399_v45  ;;  %v4391_v62 = vld [vmem:[%s6284_s23] sm:$0xf]  ;;  %v4571_v14 = vld [vmem:[%s6284_s23 + $0x4] sm:$0xf0] }
 0xb7e   : > { %v4404_v37 = vor.u32 %v4572_v32, %v4401_v27  ;;  %v4570_v15 = vld [vmem:[%s6284_s23 + $0x4] sm:$0xf]  ;;  %v4393_v58 = vld [vmem:[%s6284_s23 + $0x8] sm:$0xf0]  ;;  %v4392_v19 = vor.u32 %v4571_v14, %v4391_v62  ;;  %v3546_v49 = vld [vmem:[%s6286_s18] sm:$0x3] }
 0xb7f   : > { %3634 = vmatpush.bf16.msra.mxu0 %v4432_v36  ;;  %v4396_v40 = vor.u32 %v4570_v15, %v4393_v58  ;;  %v3548_v2 = vperm.slane %v3546_v49, 0  ;;  %v3549_v20 = vperm.slane %v3546_v49, 1 }
 0xb80   : > { %3648 = vmatpush.bf16.msra.mxu1 %v4436_v54 }
 0xb83   : > { %3635 = vmatpush.bf16.msra.mxu0 %v4424_v28 }
 0xb84   : > { %3649 = vmatpush.bf16.msra.mxu1 %v4428_v44 }
 0xb87   : > { %3636 = vmatpush.bf16.msra.mxu0 %v4416_v30 }
 0xb88   : > { %3650 = vmatpush.bf16.msra.mxu1 %v4420_v46 }
 0xb8b   : > { %3637 = vmatpush.bf16.msra.mxu0 %v4408_v21 }
 0xb8c   : > { %3651 = vmatpush.bf16.msra.mxu1 %v4412_v48 }
 0xb8f   : > { %3638 = vmatpush.bf16.msra.mxu0 %v4400_v12 }
 0xb90   : > { %3652 = vmatpush.bf16.msra.mxu1 %v4404_v37 }
 0xb93   : > { %3639 = vmatpush.bf16.msra.mxu0 %v4392_v19 }
 0xb94   : > { %3653 = vmatpush.bf16.msra.mxu1 %v4396_v40 }
 0xb96   : > { %3640 = vmatmul.bf16.vlgmr.msra.gmra.mxu0 %v3529_v18 }
 0xb97   : > { %3654 = vmatmul.bf16.vlgmr.msra.gmra.mxu1 %v3529_v18 }
 0xc13   : > { %v3641_v25 = vpop.f32.mrf.mxu0 }
 0xc14   : > { %v3642_v6 = vadd.f32 %v3641_v25, %v3548_v2  ;;  %v3655_v23 = vpop.f32.mrf.mxu1 }
 0xc15   : > { %v3656_v22 = vadd.f32 %v3655_v23, %v3549_v20 }
 0xc16   : > { %3660 = vst [vmem:[%s6285_s12] sm:$0xff] %v3642_v6 }
 0xc17   : > { %3661 = vst [vmem:[%s6285_s12 + $0x8] sm:$0xff] %v3656_v22 }
 0xc1b   : > { %v3643_v11 = vpop.f32.mrf.mxu0 }
 0xc1c   : > { %v3644_v38 = vadd.f32 %v3643_v11, %v3548_v2  ;;  %v3657_v13 = vpop.f32.mrf.mxu1 }
 0xc1d   : > { %v3658_v24 = vadd.f32 %v3657_v13, %v3549_v20 }
 0xc1e   : > { %3662 = vst [vmem:[%s6285_s12 + $0x10] sm:$0xff] %v3644_v38 }
 0xc1f   : > { %3663 = vst [vmem:[%s6285_s12 + $0x18] sm:$0xff] %v3658_v24 }
 0xc20 PF: > { %s6287_s19 = sld [smem:[#allocation5_spill]] }
 0xc21   : > { %s6288_s8 = sld [smem:[#allocation3_spill]] }
 0xc22   : > { %s6289_s5 = sld [smem:[#allocation4_spill]] }
 0xc23   : > { %s6290_s9 = sld [smem:[#allocation6_spill]] }
 0xc24   : > { %s6291_s30 = sld [smem:[#allocation7_spill]] }
 0xc26   : > { %s38_s3 = sadd.s32 1, %s6287_s19  }
 0xc27   : > { %p35_p10 = scmp.ge.s32.totalorder %s38_s3, 6  }
 0xc29   :  { %37 = sbr.rel (!%p35_p10) target bundleno = 29 (0x1d), region = 215 }

</bundles_post_ra>
